<compile_context>
chip_gen: v7x
topology: tpu7x:2x2x1
jax: 0.10.0
libtpu: 0.0.40
codegen_flags: <defaults>
</compile_context>

<pallas_src>
import jax
import jax.numpy as jnp
from jax import lax
from jax.experimental import pallas as pl
from jax.experimental.pallas import tpu as pltpu

# ----------------------------- hyperparameters ------------------------------
LENGTHSCALE = 0.5     # RBF kernel lengthscale
NOISE = 0.1           # GaussianLikelihood noise (also SPD jitter on K)

B = 2                 # batch
D = 4                 # n_input_dims (tasks)
N_OBS = 16            # observed points per series
T_SEQ = 8             # query grid length (classifier sequence length)
HIDDEN = 32           # GRU hidden_size
OUT_DIM = 2           # out_dimension
GPAD = 128            # per-gate lane padding (H=32 lives in lanes 0..31)

_VMEM = pl.BlockSpec(memory_space=pltpu.MemorySpace.VMEM)


# ------------------- single fused kernel: GP + GRU + head --------------------
def _gp_gru_fused_kernel(xo_col_ref, xo_row_ref, xt_col_ref, y_ref,
                         w_im_ref, w_iv_ref, b_gi_ref, b_hn_ref,
                         w_hh_ref, w_out_ref, b_out_ref, out_ref):
    f32 = jnp.float32
    xo_col = xo_col_ref[...]                       # (B, N, 1)
    xo_row = xo_row_ref[...]                       # (B, 1, N)
    xt_col = xt_col_ref[...]                       # (B, T, 1)
    y = y_ref[...]                                 # (B, N, D)
    bsz, n, _ = xo_col.shape
    t_len = xt_col.shape[1]

    inv2l2 = 0.5 / (LENGTHSCALE ** 2)

    # ---- RBF covariances, built and consumed entirely in VMEM -------------
    row = lax.broadcasted_iota(jnp.int32, (bsz, n, n), 1)
    col = lax.broadcasted_iota(jnp.int32, (bsz, n, n), 2)
    a = (jnp.exp(-inv2l2 * (xo_col - xo_row) ** 2)
         + NOISE * (row == col).astype(f32))       # K + sigma^2 I   (B,N,N)
    zs = jnp.exp(-inv2l2 * (xt_col - xo_row) ** 2)  # K*             (B,T,N)
    zy = y                                          #                (B,N,D)

    # ---- fused rank-1 Cholesky + forward substitution (unrolled, N=16) ----
    # `a` stays symmetric under the rank-1 downdates, so column j of L can be
    # read in either orientation directly from `a` (no relayouts).  After the
    # loop: zy = L^{-1} y (N on sublanes), zs = (L^{-1} K*^T)^T (N on lanes).
    ridx = lax.broadcasted_iota(jnp.int32, (bsz, n, 1), 1)
    cidx = lax.broadcasted_iota(jnp.int32, (bsz, 1, n), 2)
    for j in range(n):
        inv_d = lax.rsqrt(a[:, j:j + 1, j:j + 1])                     # (B,1,1)
        c_col = jnp.where(ridx >= j, a[:, :, j:j + 1] * inv_d, 0.0)   # (B,N,1)
        c_row = jnp.where(cidx >= j, a[:, j:j + 1, :] * inv_d, 0.0)   # (B,1,N)
        zyj = zy[:, j:j + 1, :] * inv_d                               # (B,1,D)
        zsj = zs[:, :, j:j + 1] * inv_d                               # (B,T,1)
        # rows/lanes < j: c_* is zero -> unchanged; row/lane j: overwritten;
        # rows/lanes > j: standard forward-substitution downdate.
        zy = jnp.where(ridx == j, zyj, zy - c_col * zyj)
        zs = jnp.where(cidx == j, zsj, zs - c_row * zsj)
        if j + 1 < n:                                                 # trailing
            a = a - c_col * c_row

    # ---- GP posterior moments ('moments' sampling) — never leave VMEM -----
    # mean = K* K^{-1} y = (L^{-1}K*^T)^T (L^{-1}y);  qvar = ||L^{-1}k*||^2.
    mean = jnp.einsum('btn,bnd->btd', zs, zy,
                      preferred_element_type=f32)                     # (B,T,D)
    qvar = jnp.sum(zs * zs, axis=-1, keepdims=True)                   # (B,T,1)
    var = 1.0 + NOISE - qvar                                          # (B,T,1)
    # TODO(synk): drop "+ NOISE" if the reference feeds the latent (not
    # predictive) posterior variance to the classifier.

    # ---- GRU input projection, hoisted over all timesteps -----------------
    # Classifier input is concat([mean, var broadcast over D]); the var
    # channels are folded algebraically into one pre-summed row w_iv, so no
    # concat / broadcast_to is needed.  Gate axis is padded to 3*GPAD lanes.
    gpad = w_hh_ref.shape[0]
    w_im = jnp.broadcast_to(w_im_ref[...], (bsz,) + w_im_ref.shape)   # (B,D,3G)
    gi = (jnp.einsum('btd,bdg->btg', mean.astype(jnp.bfloat16), w_im,
                     preferred_element_type=f32)
          + var * w_iv_ref[...] + b_gi_ref[...])                      # (B,T,3G)
    gi_r = gi[..., :gpad]
    gi_z = gi[..., gpad:2 * gpad]
    gi_n = gi[..., 2 * gpad:]

    # ---- fully-unrolled GRU recurrence (torch gate order [r, z, n]) -------
    # Only h @ W_hh sits on the serial chain; gate slices are 128-aligned.
    # Padded lanes (32..127 of each gate block) stay exactly zero throughout.
    w_hh = w_hh_ref[...]
    b_hn = b_hn_ref[...]
    h = jnp.zeros((bsz, gpad), f32)
    for t in range(t_len):
        gh = jnp.dot(h.astype(jnp.bfloat16), w_hh, preferred_element_type=f32)
        r = jax.nn.sigmoid(gi_r[:, t, :] + gh[:, :gpad])
        zg = jax.nn.sigmoid(gi_z[:, t, :] + gh[:, gpad:2 * gpad])
        ng = jnp.tanh(gi_n[:, t, :] + r * (gh[:, 2 * gpad:] + b_hn))
        h = (1.0 - zg) * ng + zg * h

    # ---- linear head on the last hidden state ------------------------------
    out_ref[...] = (jnp.dot(h.astype(jnp.bfloat16), w_out_ref[...],
                            preferred_element_type=f32) + b_out_ref[...])


# ------------------------------- full forward --------------------------------
@jax.jit
def gp_rnn_forward(x_obs, y_obs, x_test, packed):
    """
    x_obs : (B, N)     observation times
    y_obs : (B, N, D)  observed values per task
    x_test: (B, T)     query grid (classifier sequence positions)
    packed: kernel-layout parameters from pack_params()
    returns logits (B, OUT_DIM)   (n_mc_smps == 1 for 'moments' sampling)
    """
    bsz, n = x_obs.shape
    t = x_test.shape[1]
    out_dim = packed["b_out"].shape[-1]
    # TODO(synk): on v7x at batch >= ~16-32 add grid=(B_blocks,) with
    # dimension_semantics=("parallel",) to shard across the 2 TensorCores;
    # at B=2 grid-free is strictly faster on every generation.
    return pl.pallas_call(
        _gp_gru_fused_kernel,
        out_shape=jax.ShapeDtypeStruct((bsz, out_dim), jnp.float32),
        in_specs=[_VMEM] * 11,
        out_specs=_VMEM,
    )(x_obs.reshape(bsz, n, 1), x_obs.reshape(bsz, 1, n),
      x_test.reshape(bsz, t, 1), y_obs,
      packed["w_im"], packed["w_iv"], packed["b_gi"], packed["b_hn"],
      packed["w_hh"], packed["w_out"], packed["b_out"])


# ------------------------------ parameters -----------------------------------
def init_params(key, input_size, hidden_size, out_dim):
    """torch-equivalent GRU/Linear params, pre-transposed for x @ W.
    Gate order along the 3H axis: [r, z, n] (torch convention)."""
    ks = jax.random.split(key, 6)
    lim = 1.0 / jnp.sqrt(hidden_size)
    u = lambda k, shape: jax.random.uniform(k, shape, jnp.float32, -lim, lim)
    return {
        "w_ih": u(ks[0], (input_size, 3 * hidden_size)),
        "w_hh": u(ks[1], (hidden_size, 3 * hidden_size)),
        "b_ih": u(ks[2], (1, 3 * hidden_size)),
        "b_hh": u(ks[3], (1, 3 * hidden_size)),
        "w_out": u(ks[4], (hidden_size, out_dim)),
        "b_out": u(ks[5], (1, out_dim)),
    }


def pack_params(params, n_input_dims=D, hidden=HIDDEN, gpad=GPAD):
    """Convert torch-layout params to the kernel layout:
      * W_ih split into mean rows and a pre-summed var row,
      * b_hh for r/z folded into b_ih (n-gate b_hh kept separate),
      * each gate padded to `gpad` lanes (zeros keep padded lanes inert),
      * W_hh / W_out rows padded to `gpad`, matmul weights cast to bf16."""
    d, h, g = n_input_dims, hidden, gpad

    def pad_gates(x):  # (..., 3h) -> (..., 3g), per-gate zero padding
        x3 = x.reshape(x.shape[:-1] + (3, h))
        x3 = jnp.pad(x3, [(0, 0)] * (x3.ndim - 1) + [(0, g - h)])
        return x3.reshape(x.shape[:-1] + (3 * g,))

    w_ih, w_hh = params["w_ih"], params["w_hh"]
    b_ih, b_hh = params["b_ih"], params["b_hh"]
    b_gi = b_ih + jnp.concatenate(
        [b_hh[:, :2 * h], jnp.zeros((1, h), jnp.float32)], axis=-1)
    return {
        "w_im": pad_gates(w_ih[:d, :]).astype(jnp.bfloat16),              # (D,3G)
        "w_iv": pad_gates(jnp.sum(w_ih[d:2 * d, :], axis=0, keepdims=True)),  # (1,3G)
        "b_gi": pad_gates(b_gi),                                          # (1,3G)
        "b_hn": jnp.pad(b_hh[:, 2 * h:], ((0, 0), (0, g - h))),           # (1,G)
        "w_hh": jnp.pad(pad_gates(w_hh),
                        ((0, g - h), (0, 0))).astype(jnp.bfloat16),       # (G,3G)
        "w_out": jnp.pad(params["w_out"],
                         ((0, g - h), (0, 0))).astype(jnp.bfloat16),      # (G,OUT)
        "b_out": params["b_out"],                                         # (1,OUT)
    }


# --------------------- pure-JAX reference (spec semantics) -------------------
def reference_forward(x_obs, y_obs, x_test, params):
    h = params["w_hh"].shape[0]
    n = x_obs.shape[1]
    t_len = x_test.shape[1]
    inv2l2 = 0.5 / (LENGTHSCALE ** 2)
    k = (jnp.exp(-inv2l2 * (x_obs[:, :, None] - x_obs[:, None, :]) ** 2)
         + NOISE * jnp.eye(n, dtype=jnp.float32))
    ks = jnp.exp(-inv2l2 * (x_test[:, :, None] - x_obs[:, None, :]) ** 2)
    alpha = jnp.linalg.solve(k, y_obs)                                    # (B,N,D)
    vsol = jnp.linalg.solve(k, jnp.transpose(ks, (0, 2, 1)))              # (B,N,T)
    mean = jnp.einsum('btn,bnd->btd', ks, alpha)
    qvar = jnp.sum(ks * jnp.transpose(vsol, (0, 2, 1)), axis=-1)          # (B,T)
    var = 1.0 + NOISE - qvar
    z = jnp.concatenate(
        [mean, jnp.broadcast_to(var[..., None], mean.shape)], axis=-1)    # (B,T,2D)
    # GRU, mirroring the kernel's precision (bf16 matmul operands, f32 math)
    w_ih = params["w_ih"].astype(jnp.bfloat16)
    w_hh = params["w_hh"].astype(jnp.bfloat16)
    gi_all = (jnp.einsum('bti,ig->btg', z.astype(jnp.bfloat16), w_ih,
                         preferred_element_type=jnp.float32) + params["b_ih"])
    hstate = jnp.zeros((x_obs.shape[0], h), jnp.float32)
    for tt in range(t_len):
        gh = (jnp.dot(hstate.astype(jnp.bfloat16), w_hh,
                      preferred_element_type=jnp.float32) + params["b_hh"])
        gi = gi_all[:, tt, :]
        r = jax.nn.sigmoid(gi[:, :h] + gh[:, :h])
        zg = jax.nn.sigmoid(gi[:, h:2 * h] + gh[:, h:2 * h])
        ng = jnp.tanh(gi[:, 2 * h:] + r * gh[:, 2 * h:])
        hstate = (1.0 - zg) * ng + zg * hstate
    return (jnp.dot(hstate.astype(jnp.bfloat16),
                    params["w_out"].astype(jnp.bfloat16),
                    preferred_element_type=jnp.float32) + params["b_out"])


if __name__ == "__main__":
    key = jax.random.PRNGKey(0)
    k1, k2, k3 = jax.random.split(key, 3)

    x_obs = jnp.sort(jax.random.uniform(k1, (B, N_OBS), jnp.float32), axis=-1)
    y_obs = jax.random.normal(k2, (B, N_OBS, D), jnp.float32)
    x_test = jnp.broadcast_to(jnp.linspace(0.0, 1.0, T_SEQ, dtype=jnp.float32),
                              (B, T_SEQ))

    params = init_params(k3, input_size=2 * D, hidden_size=HIDDEN,
                         out_dim=OUT_DIM)
    packed = pack_params(params)

    logits = gp_rnn_forward(x_obs, y_obs, x_test, packed)
    logits = jax.block_until_ready(logits)
    assert logits.shape == (B, OUT_DIM)
    assert bool(jnp.all(jnp.isfinite(logits)))

    ref = reference_forward(x_obs, y_obs, x_test, params)
    assert bool(jnp.allclose(logits, ref, atol=5e-2, rtol=5e-2)), (logits, ref)
    print("KERNEL_OK")
</pallas_src>

<mosaic_0001>
module attributes {stable_mosaic.version = 11 : i64} {
  func.func @_gp_gru_fused_kernel(%arg0: memref<2x16x1xf32, #tpu.memory_space<vmem>>, %arg1: memref<2x1x16xf32, #tpu.memory_space<vmem>>, %arg2: memref<2x8x1xf32, #tpu.memory_space<vmem>>, %arg3: memref<2x16x4xf32, #tpu.memory_space<vmem>>, %arg4: memref<4x384xbf16, #tpu.memory_space<vmem>>, %arg5: memref<1x384xf32, #tpu.memory_space<vmem>>, %arg6: memref<1x384xf32, #tpu.memory_space<vmem>>, %arg7: memref<1x128xf32, #tpu.memory_space<vmem>>, %arg8: memref<128x384xbf16, #tpu.memory_space<vmem>>, %arg9: memref<128x2xbf16, #tpu.memory_space<vmem>>, %arg10: memref<1x2xf32, #tpu.memory_space<vmem>>, %arg11: memref<2x2xf32, #tpu.memory_space<vmem>>) attributes {dimension_semantics = [], scalar_prefetch = 0 : i64, scratch_operands = 0 : i64, tpu.core_type = #tpu.core_type<tc>} {
    %c0 = arith.constant 0 : index
    %c0_0 = arith.constant 0 : index
    %c0_1 = arith.constant 0 : index
    %0 = vector.load %arg0[%c0, %c0_0, %c0_1] : memref<2x16x1xf32, #tpu.memory_space<vmem>>, vector<2x16x1xf32>
    %c0_2 = arith.constant 0 : index
    %c0_3 = arith.constant 0 : index
    %c0_4 = arith.constant 0 : index
    %1 = vector.load %arg1[%c0_2, %c0_3, %c0_4] : memref<2x1x16xf32, #tpu.memory_space<vmem>>, vector<2x1x16xf32>
    %c0_5 = arith.constant 0 : index
    %c0_6 = arith.constant 0 : index
    %c0_7 = arith.constant 0 : index
    %2 = vector.load %arg2[%c0_5, %c0_6, %c0_7] : memref<2x8x1xf32, #tpu.memory_space<vmem>>, vector<2x8x1xf32>
    %c0_8 = arith.constant 0 : index
    %c0_9 = arith.constant 0 : index
    %c0_10 = arith.constant 0 : index
    %3 = vector.load %arg3[%c0_8, %c0_9, %c0_10] : memref<2x16x4xf32, #tpu.memory_space<vmem>>, vector<2x16x4xf32>
    %4 = tpu.iota {dimensions = array<i32: 1>} : vector<2x16x16xi32>
    %5 = tpu.iota {dimensions = array<i32: 2>} : vector<2x16x16xi32>
    %6 = vector.broadcast %0 : vector<2x16x1xf32> to vector<2x16x16xf32>
    %7 = vector.broadcast %1 : vector<2x1x16xf32> to vector<2x16x16xf32>
    %8 = arith.subf %6, %7 : vector<2x16x16xf32>
    %9 = arith.mulf %8, %8 : vector<2x16x16xf32>
    %cst = arith.constant -2.000000e+00 : f32
    %10 = vector.broadcast %cst : f32 to vector<2x16x16xf32>
    %11 = arith.mulf %10, %9 : vector<2x16x16xf32>
    %12 = math.exp %11 : vector<2x16x16xf32>
    %13 = arith.cmpi eq, %4, %5 : vector<2x16x16xi32>
    %14 = arith.extui %13 : vector<2x16x16xi1> to vector<2x16x16xi32>
    %15 = arith.sitofp %14 : vector<2x16x16xi32> to vector<2x16x16xf32>
    %cst_11 = arith.constant 1.000000e-01 : f32
    %16 = vector.broadcast %cst_11 : f32 to vector<2x16x16xf32>
    %17 = arith.mulf %16, %15 : vector<2x16x16xf32>
    %18 = arith.addf %12, %17 : vector<2x16x16xf32>
    %19 = vector.broadcast %2 : vector<2x8x1xf32> to vector<2x8x16xf32>
    %20 = vector.broadcast %1 : vector<2x1x16xf32> to vector<2x8x16xf32>
    %21 = arith.subf %19, %20 : vector<2x8x16xf32>
    %22 = arith.mulf %21, %21 : vector<2x8x16xf32>
    %cst_12 = arith.constant -2.000000e+00 : f32
    %23 = vector.broadcast %cst_12 : f32 to vector<2x8x16xf32>
    %24 = arith.mulf %23, %22 : vector<2x8x16xf32>
    %25 = math.exp %24 : vector<2x8x16xf32>
    %26 = tpu.iota {dimensions = array<i32: 1>} : vector<2x16x1xi32>
    %27 = tpu.iota {dimensions = array<i32: 2>} : vector<2x1x16xi32>
    %28 = vector.extract_strided_slice %18 {offsets = [0, 0, 0], sizes = [2, 1, 1], strides = [1, 1, 1]} : vector<2x16x16xf32> to vector<2x1x1xf32>
    %29 = math.rsqrt %28 : vector<2x1x1xf32>
    %c0_i32 = arith.constant 0 : i32
    %30 = vector.broadcast %c0_i32 : i32 to vector<2x16x1xi32>
    %31 = arith.cmpi sge, %26, %30 : vector<2x16x1xi32>
    %32 = vector.extract_strided_slice %18 {offsets = [0, 0, 0], sizes = [2, 16, 1], strides = [1, 1, 1]} : vector<2x16x16xf32> to vector<2x16x1xf32>
    %33 = vector.broadcast %29 : vector<2x1x1xf32> to vector<2x16x1xf32>
    %34 = arith.mulf %32, %33 : vector<2x16x1xf32>
    %cst_13 = arith.constant 0.000000e+00 : f32
    %35 = vector.broadcast %cst_13 : f32 to vector<2x16x1xf32>
    %36 = arith.select %31, %34, %35 : vector<2x16x1xi1>, vector<2x16x1xf32>
    %c0_i32_14 = arith.constant 0 : i32
    %37 = vector.broadcast %c0_i32_14 : i32 to vector<2x1x16xi32>
    %38 = arith.cmpi sge, %27, %37 : vector<2x1x16xi32>
    %39 = vector.extract_strided_slice %18 {offsets = [0, 0, 0], sizes = [2, 1, 16], strides = [1, 1, 1]} : vector<2x16x16xf32> to vector<2x1x16xf32>
    %40 = vector.broadcast %29 : vector<2x1x1xf32> to vector<2x1x16xf32>
    %41 = arith.mulf %39, %40 : vector<2x1x16xf32>
    %cst_15 = arith.constant 0.000000e+00 : f32
    %42 = vector.broadcast %cst_15 : f32 to vector<2x1x16xf32>
    %43 = arith.select %38, %41, %42 : vector<2x1x16xi1>, vector<2x1x16xf32>
    %44 = vector.extract_strided_slice %3 {offsets = [0, 0, 0], sizes = [2, 1, 4], strides = [1, 1, 1]} : vector<2x16x4xf32> to vector<2x1x4xf32>
    %45 = vector.broadcast %29 : vector<2x1x1xf32> to vector<2x1x4xf32>
    %46 = arith.mulf %44, %45 : vector<2x1x4xf32>
    %47 = vector.extract_strided_slice %25 {offsets = [0, 0, 0], sizes = [2, 8, 1], strides = [1, 1, 1]} : vector<2x8x16xf32> to vector<2x8x1xf32>
    %48 = vector.broadcast %29 : vector<2x1x1xf32> to vector<2x8x1xf32>
    %49 = arith.mulf %47, %48 : vector<2x8x1xf32>
    %c0_i32_16 = arith.constant 0 : i32
    %50 = vector.broadcast %c0_i32_16 : i32 to vector<2x16x1xi32>
    %51 = arith.cmpi eq, %26, %50 : vector<2x16x1xi32>
    %52 = vector.broadcast %36 : vector<2x16x1xf32> to vector<2x16x4xf32>
    %53 = vector.broadcast %46 : vector<2x1x4xf32> to vector<2x16x4xf32>
    %54 = arith.mulf %52, %53 : vector<2x16x4xf32>
    %55 = arith.subf %3, %54 : vector<2x16x4xf32>
    %56 = vector.shape_cast %51 : vector<2x16x1xi1> to vector<2x16x1xi1>
    %57 = vector.broadcast %56 : vector<2x16x1xi1> to vector<2x16x4xi1>
    %58 = vector.shape_cast %46 : vector<2x1x4xf32> to vector<2x1x4xf32>
    %59 = vector.broadcast %58 : vector<2x1x4xf32> to vector<2x16x4xf32>
    %60 = arith.select %57, %59, %55 : vector<2x16x4xi1>, vector<2x16x4xf32>
    %c0_i32_17 = arith.constant 0 : i32
    %61 = vector.broadcast %c0_i32_17 : i32 to vector<2x1x16xi32>
    %62 = arith.cmpi eq, %27, %61 : vector<2x1x16xi32>
    %63 = vector.broadcast %43 : vector<2x1x16xf32> to vector<2x8x16xf32>
    %64 = vector.broadcast %49 : vector<2x8x1xf32> to vector<2x8x16xf32>
    %65 = arith.mulf %63, %64 : vector<2x8x16xf32>
    %66 = arith.subf %25, %65 : vector<2x8x16xf32>
    %67 = vector.shape_cast %62 : vector<2x1x16xi1> to vector<2x1x16xi1>
    %68 = vector.broadcast %67 : vector<2x1x16xi1> to vector<2x8x16xi1>
    %69 = vector.shape_cast %49 : vector<2x8x1xf32> to vector<2x8x1xf32>
    %70 = vector.broadcast %69 : vector<2x8x1xf32> to vector<2x8x16xf32>
    %71 = arith.select %68, %70, %66 : vector<2x8x16xi1>, vector<2x8x16xf32>
    %72 = vector.broadcast %36 : vector<2x16x1xf32> to vector<2x16x16xf32>
    %73 = vector.broadcast %43 : vector<2x1x16xf32> to vector<2x16x16xf32>
    %74 = arith.mulf %72, %73 : vector<2x16x16xf32>
    %75 = arith.subf %18, %74 : vector<2x16x16xf32>
    %76 = vector.extract_strided_slice %75 {offsets = [0, 1, 1], sizes = [2, 1, 1], strides = [1, 1, 1]} : vector<2x16x16xf32> to vector<2x1x1xf32>
    %77 = math.rsqrt %76 : vector<2x1x1xf32>
    %c1_i32 = arith.constant 1 : i32
    %78 = vector.broadcast %c1_i32 : i32 to vector<2x16x1xi32>
    %79 = arith.cmpi sge, %26, %78 : vector<2x16x1xi32>
    %80 = vector.extract_strided_slice %75 {offsets = [0, 0, 1], sizes = [2, 16, 1], strides = [1, 1, 1]} : vector<2x16x16xf32> to vector<2x16x1xf32>
    %81 = vector.broadcast %77 : vector<2x1x1xf32> to vector<2x16x1xf32>
    %82 = arith.mulf %80, %81 : vector<2x16x1xf32>
    %cst_18 = arith.constant 0.000000e+00 : f32
    %83 = vector.broadcast %cst_18 : f32 to vector<2x16x1xf32>
    %84 = arith.select %79, %82, %83 : vector<2x16x1xi1>, vector<2x16x1xf32>
    %c1_i32_19 = arith.constant 1 : i32
    %85 = vector.broadcast %c1_i32_19 : i32 to vector<2x1x16xi32>
    %86 = arith.cmpi sge, %27, %85 : vector<2x1x16xi32>
    %87 = vector.extract_strided_slice %75 {offsets = [0, 1, 0], sizes = [2, 1, 16], strides = [1, 1, 1]} : vector<2x16x16xf32> to vector<2x1x16xf32>
    %88 = vector.broadcast %77 : vector<2x1x1xf32> to vector<2x1x16xf32>
    %89 = arith.mulf %87, %88 : vector<2x1x16xf32>
    %cst_20 = arith.constant 0.000000e+00 : f32
    %90 = vector.broadcast %cst_20 : f32 to vector<2x1x16xf32>
    %91 = arith.select %86, %89, %90 : vector<2x1x16xi1>, vector<2x1x16xf32>
    %92 = vector.extract_strided_slice %60 {offsets = [0, 1, 0], sizes = [2, 1, 4], strides = [1, 1, 1]} : vector<2x16x4xf32> to vector<2x1x4xf32>
    %93 = vector.broadcast %77 : vector<2x1x1xf32> to vector<2x1x4xf32>
    %94 = arith.mulf %92, %93 : vector<2x1x4xf32>
    %95 = vector.extract_strided_slice %71 {offsets = [0, 0, 1], sizes = [2, 8, 1], strides = [1, 1, 1]} : vector<2x8x16xf32> to vector<2x8x1xf32>
    %96 = vector.broadcast %77 : vector<2x1x1xf32> to vector<2x8x1xf32>
    %97 = arith.mulf %95, %96 : vector<2x8x1xf32>
    %c1_i32_21 = arith.constant 1 : i32
    %98 = vector.broadcast %c1_i32_21 : i32 to vector<2x16x1xi32>
    %99 = arith.cmpi eq, %26, %98 : vector<2x16x1xi32>
    %100 = vector.broadcast %84 : vector<2x16x1xf32> to vector<2x16x4xf32>
    %101 = vector.broadcast %94 : vector<2x1x4xf32> to vector<2x16x4xf32>
    %102 = arith.mulf %100, %101 : vector<2x16x4xf32>
    %103 = arith.subf %60, %102 : vector<2x16x4xf32>
    %104 = vector.shape_cast %99 : vector<2x16x1xi1> to vector<2x16x1xi1>
    %105 = vector.broadcast %104 : vector<2x16x1xi1> to vector<2x16x4xi1>
    %106 = vector.shape_cast %94 : vector<2x1x4xf32> to vector<2x1x4xf32>
    %107 = vector.broadcast %106 : vector<2x1x4xf32> to vector<2x16x4xf32>
    %108 = arith.select %105, %107, %103 : vector<2x16x4xi1>, vector<2x16x4xf32>
    %c1_i32_22 = arith.constant 1 : i32
    %109 = vector.broadcast %c1_i32_22 : i32 to vector<2x1x16xi32>
    %110 = arith.cmpi eq, %27, %109 : vector<2x1x16xi32>
    %111 = vector.broadcast %91 : vector<2x1x16xf32> to vector<2x8x16xf32>
    %112 = vector.broadcast %97 : vector<2x8x1xf32> to vector<2x8x16xf32>
    %113 = arith.mulf %111, %112 : vector<2x8x16xf32>
    %114 = arith.subf %71, %113 : vector<2x8x16xf32>
    %115 = vector.shape_cast %110 : vector<2x1x16xi1> to vector<2x1x16xi1>
    %116 = vector.broadcast %115 : vector<2x1x16xi1> to vector<2x8x16xi1>
    %117 = vector.shape_cast %97 : vector<2x8x1xf32> to vector<2x8x1xf32>
    %118 = vector.broadcast %117 : vector<2x8x1xf32> to vector<2x8x16xf32>
    %119 = arith.select %116, %118, %114 : vector<2x8x16xi1>, vector<2x8x16xf32>
    %120 = vector.broadcast %84 : vector<2x16x1xf32> to vector<2x16x16xf32>
    %121 = vector.broadcast %91 : vector<2x1x16xf32> to vector<2x16x16xf32>
    %122 = arith.mulf %120, %121 : vector<2x16x16xf32>
    %123 = arith.subf %75, %122 : vector<2x16x16xf32>
    %124 = vector.extract_strided_slice %123 {offsets = [0, 2, 2], sizes = [2, 1, 1], strides = [1, 1, 1]} : vector<2x16x16xf32> to vector<2x1x1xf32>
    %125 = math.rsqrt %124 : vector<2x1x1xf32>
    %c2_i32 = arith.constant 2 : i32
    %126 = vector.broadcast %c2_i32 : i32 to vector<2x16x1xi32>
    %127 = arith.cmpi sge, %26, %126 : vector<2x16x1xi32>
    %128 = vector.extract_strided_slice %123 {offsets = [0, 0, 2], sizes = [2, 16, 1], strides = [1, 1, 1]} : vector<2x16x16xf32> to vector<2x16x1xf32>
    %129 = vector.broadcast %125 : vector<2x1x1xf32> to vector<2x16x1xf32>
    %130 = arith.mulf %128, %129 : vector<2x16x1xf32>
    %cst_23 = arith.constant 0.000000e+00 : f32
    %131 = vector.broadcast %cst_23 : f32 to vector<2x16x1xf32>
    %132 = arith.select %127, %130, %131 : vector<2x16x1xi1>, vector<2x16x1xf32>
    %c2_i32_24 = arith.constant 2 : i32
    %133 = vector.broadcast %c2_i32_24 : i32 to vector<2x1x16xi32>
    %134 = arith.cmpi sge, %27, %133 : vector<2x1x16xi32>
    %135 = vector.extract_strided_slice %123 {offsets = [0, 2, 0], sizes = [2, 1, 16], strides = [1, 1, 1]} : vector<2x16x16xf32> to vector<2x1x16xf32>
    %136 = vector.broadcast %125 : vector<2x1x1xf32> to vector<2x1x16xf32>
    %137 = arith.mulf %135, %136 : vector<2x1x16xf32>
    %cst_25 = arith.constant 0.000000e+00 : f32
    %138 = vector.broadcast %cst_25 : f32 to vector<2x1x16xf32>
    %139 = arith.select %134, %137, %138 : vector<2x1x16xi1>, vector<2x1x16xf32>
    %140 = vector.extract_strided_slice %108 {offsets = [0, 2, 0], sizes = [2, 1, 4], strides = [1, 1, 1]} : vector<2x16x4xf32> to vector<2x1x4xf32>
    %141 = vector.broadcast %125 : vector<2x1x1xf32> to vector<2x1x4xf32>
    %142 = arith.mulf %140, %141 : vector<2x1x4xf32>
    %143 = vector.extract_strided_slice %119 {offsets = [0, 0, 2], sizes = [2, 8, 1], strides = [1, 1, 1]} : vector<2x8x16xf32> to vector<2x8x1xf32>
    %144 = vector.broadcast %125 : vector<2x1x1xf32> to vector<2x8x1xf32>
    %145 = arith.mulf %143, %144 : vector<2x8x1xf32>
    %c2_i32_26 = arith.constant 2 : i32
    %146 = vector.broadcast %c2_i32_26 : i32 to vector<2x16x1xi32>
    %147 = arith.cmpi eq, %26, %146 : vector<2x16x1xi32>
    %148 = vector.broadcast %132 : vector<2x16x1xf32> to vector<2x16x4xf32>
    %149 = vector.broadcast %142 : vector<2x1x4xf32> to vector<2x16x4xf32>
    %150 = arith.mulf %148, %149 : vector<2x16x4xf32>
    %151 = arith.subf %108, %150 : vector<2x16x4xf32>
    %152 = vector.shape_cast %147 : vector<2x16x1xi1> to vector<2x16x1xi1>
    %153 = vector.broadcast %152 : vector<2x16x1xi1> to vector<2x16x4xi1>
    %154 = vector.shape_cast %142 : vector<2x1x4xf32> to vector<2x1x4xf32>
    %155 = vector.broadcast %154 : vector<2x1x4xf32> to vector<2x16x4xf32>
    %156 = arith.select %153, %155, %151 : vector<2x16x4xi1>, vector<2x16x4xf32>
    %c2_i32_27 = arith.constant 2 : i32
    %157 = vector.broadcast %c2_i32_27 : i32 to vector<2x1x16xi32>
    %158 = arith.cmpi eq, %27, %157 : vector<2x1x16xi32>
    %159 = vector.broadcast %139 : vector<2x1x16xf32> to vector<2x8x16xf32>
    %160 = vector.broadcast %145 : vector<2x8x1xf32> to vector<2x8x16xf32>
    %161 = arith.mulf %159, %160 : vector<2x8x16xf32>
    %162 = arith.subf %119, %161 : vector<2x8x16xf32>
    %163 = vector.shape_cast %158 : vector<2x1x16xi1> to vector<2x1x16xi1>
    %164 = vector.broadcast %163 : vector<2x1x16xi1> to vector<2x8x16xi1>
    %165 = vector.shape_cast %145 : vector<2x8x1xf32> to vector<2x8x1xf32>
    %166 = vector.broadcast %165 : vector<2x8x1xf32> to vector<2x8x16xf32>
    %167 = arith.select %164, %166, %162 : vector<2x8x16xi1>, vector<2x8x16xf32>
    %168 = vector.broadcast %132 : vector<2x16x1xf32> to vector<2x16x16xf32>
    %169 = vector.broadcast %139 : vector<2x1x16xf32> to vector<2x16x16xf32>
    %170 = arith.mulf %168, %169 : vector<2x16x16xf32>
    %171 = arith.subf %123, %170 : vector<2x16x16xf32>
    %172 = vector.extract_strided_slice %171 {offsets = [0, 3, 3], sizes = [2, 1, 1], strides = [1, 1, 1]} : vector<2x16x16xf32> to vector<2x1x1xf32>
    %173 = math.rsqrt %172 : vector<2x1x1xf32>
    %c3_i32 = arith.constant 3 : i32
    %174 = vector.broadcast %c3_i32 : i32 to vector<2x16x1xi32>
    %175 = arith.cmpi sge, %26, %174 : vector<2x16x1xi32>
    %176 = vector.extract_strided_slice %171 {offsets = [0, 0, 3], sizes = [2, 16, 1], strides = [1, 1, 1]} : vector<2x16x16xf32> to vector<2x16x1xf32>
    %177 = vector.broadcast %173 : vector<2x1x1xf32> to vector<2x16x1xf32>
    %178 = arith.mulf %176, %177 : vector<2x16x1xf32>
    %cst_28 = arith.constant 0.000000e+00 : f32
    %179 = vector.broadcast %cst_28 : f32 to vector<2x16x1xf32>
    %180 = arith.select %175, %178, %179 : vector<2x16x1xi1>, vector<2x16x1xf32>
    %c3_i32_29 = arith.constant 3 : i32
    %181 = vector.broadcast %c3_i32_29 : i32 to vector<2x1x16xi32>
    %182 = arith.cmpi sge, %27, %181 : vector<2x1x16xi32>
    %183 = vector.extract_strided_slice %171 {offsets = [0, 3, 0], sizes = [2, 1, 16], strides = [1, 1, 1]} : vector<2x16x16xf32> to vector<2x1x16xf32>
    %184 = vector.broadcast %173 : vector<2x1x1xf32> to vector<2x1x16xf32>
    %185 = arith.mulf %183, %184 : vector<2x1x16xf32>
    %cst_30 = arith.constant 0.000000e+00 : f32
    %186 = vector.broadcast %cst_30 : f32 to vector<2x1x16xf32>
    %187 = arith.select %182, %185, %186 : vector<2x1x16xi1>, vector<2x1x16xf32>
    %188 = vector.extract_strided_slice %156 {offsets = [0, 3, 0], sizes = [2, 1, 4], strides = [1, 1, 1]} : vector<2x16x4xf32> to vector<2x1x4xf32>
    %189 = vector.broadcast %173 : vector<2x1x1xf32> to vector<2x1x4xf32>
    %190 = arith.mulf %188, %189 : vector<2x1x4xf32>
    %191 = vector.extract_strided_slice %167 {offsets = [0, 0, 3], sizes = [2, 8, 1], strides = [1, 1, 1]} : vector<2x8x16xf32> to vector<2x8x1xf32>
    %192 = vector.broadcast %173 : vector<2x1x1xf32> to vector<2x8x1xf32>
    %193 = arith.mulf %191, %192 : vector<2x8x1xf32>
    %c3_i32_31 = arith.constant 3 : i32
    %194 = vector.broadcast %c3_i32_31 : i32 to vector<2x16x1xi32>
    %195 = arith.cmpi eq, %26, %194 : vector<2x16x1xi32>
    %196 = vector.broadcast %180 : vector<2x16x1xf32> to vector<2x16x4xf32>
    %197 = vector.broadcast %190 : vector<2x1x4xf32> to vector<2x16x4xf32>
    %198 = arith.mulf %196, %197 : vector<2x16x4xf32>
    %199 = arith.subf %156, %198 : vector<2x16x4xf32>
    %200 = vector.shape_cast %195 : vector<2x16x1xi1> to vector<2x16x1xi1>
    %201 = vector.broadcast %200 : vector<2x16x1xi1> to vector<2x16x4xi1>
    %202 = vector.shape_cast %190 : vector<2x1x4xf32> to vector<2x1x4xf32>
    %203 = vector.broadcast %202 : vector<2x1x4xf32> to vector<2x16x4xf32>
    %204 = arith.select %201, %203, %199 : vector<2x16x4xi1>, vector<2x16x4xf32>
    %c3_i32_32 = arith.constant 3 : i32
    %205 = vector.broadcast %c3_i32_32 : i32 to vector<2x1x16xi32>
    %206 = arith.cmpi eq, %27, %205 : vector<2x1x16xi32>
    %207 = vector.broadcast %187 : vector<2x1x16xf32> to vector<2x8x16xf32>
    %208 = vector.broadcast %193 : vector<2x8x1xf32> to vector<2x8x16xf32>
    %209 = arith.mulf %207, %208 : vector<2x8x16xf32>
    %210 = arith.subf %167, %209 : vector<2x8x16xf32>
    %211 = vector.shape_cast %206 : vector<2x1x16xi1> to vector<2x1x16xi1>
    %212 = vector.broadcast %211 : vector<2x1x16xi1> to vector<2x8x16xi1>
    %213 = vector.shape_cast %193 : vector<2x8x1xf32> to vector<2x8x1xf32>
    %214 = vector.broadcast %213 : vector<2x8x1xf32> to vector<2x8x16xf32>
    %215 = arith.select %212, %214, %210 : vector<2x8x16xi1>, vector<2x8x16xf32>
    %216 = vector.broadcast %180 : vector<2x16x1xf32> to vector<2x16x16xf32>
    %217 = vector.broadcast %187 : vector<2x1x16xf32> to vector<2x16x16xf32>
    %218 = arith.mulf %216, %217 : vector<2x16x16xf32>
    %219 = arith.subf %171, %218 : vector<2x16x16xf32>
    %220 = vector.extract_strided_slice %219 {offsets = [0, 4, 4], sizes = [2, 1, 1], strides = [1, 1, 1]} : vector<2x16x16xf32> to vector<2x1x1xf32>
    %221 = math.rsqrt %220 : vector<2x1x1xf32>
    %c4_i32 = arith.constant 4 : i32
    %222 = vector.broadcast %c4_i32 : i32 to vector<2x16x1xi32>
    %223 = arith.cmpi sge, %26, %222 : vector<2x16x1xi32>
    %224 = vector.extract_strided_slice %219 {offsets = [0, 0, 4], sizes = [2, 16, 1], strides = [1, 1, 1]} : vector<2x16x16xf32> to vector<2x16x1xf32>
    %225 = vector.broadcast %221 : vector<2x1x1xf32> to vector<2x16x1xf32>
    %226 = arith.mulf %224, %225 : vector<2x16x1xf32>
    %cst_33 = arith.constant 0.000000e+00 : f32
    %227 = vector.broadcast %cst_33 : f32 to vector<2x16x1xf32>
    %228 = arith.select %223, %226, %227 : vector<2x16x1xi1>, vector<2x16x1xf32>
    %c4_i32_34 = arith.constant 4 : i32
    %229 = vector.broadcast %c4_i32_34 : i32 to vector<2x1x16xi32>
    %230 = arith.cmpi sge, %27, %229 : vector<2x1x16xi32>
    %231 = vector.extract_strided_slice %219 {offsets = [0, 4, 0], sizes = [2, 1, 16], strides = [1, 1, 1]} : vector<2x16x16xf32> to vector<2x1x16xf32>
    %232 = vector.broadcast %221 : vector<2x1x1xf32> to vector<2x1x16xf32>
    %233 = arith.mulf %231, %232 : vector<2x1x16xf32>
    %cst_35 = arith.constant 0.000000e+00 : f32
    %234 = vector.broadcast %cst_35 : f32 to vector<2x1x16xf32>
    %235 = arith.select %230, %233, %234 : vector<2x1x16xi1>, vector<2x1x16xf32>
    %236 = vector.extract_strided_slice %204 {offsets = [0, 4, 0], sizes = [2, 1, 4], strides = [1, 1, 1]} : vector<2x16x4xf32> to vector<2x1x4xf32>
    %237 = vector.broadcast %221 : vector<2x1x1xf32> to vector<2x1x4xf32>
    %238 = arith.mulf %236, %237 : vector<2x1x4xf32>
    %239 = vector.extract_strided_slice %215 {offsets = [0, 0, 4], sizes = [2, 8, 1], strides = [1, 1, 1]} : vector<2x8x16xf32> to vector<2x8x1xf32>
    %240 = vector.broadcast %221 : vector<2x1x1xf32> to vector<2x8x1xf32>
    %241 = arith.mulf %239, %240 : vector<2x8x1xf32>
    %c4_i32_36 = arith.constant 4 : i32
    %242 = vector.broadcast %c4_i32_36 : i32 to vector<2x16x1xi32>
    %243 = arith.cmpi eq, %26, %242 : vector<2x16x1xi32>
    %244 = vector.broadcast %228 : vector<2x16x1xf32> to vector<2x16x4xf32>
    %245 = vector.broadcast %238 : vector<2x1x4xf32> to vector<2x16x4xf32>
    %246 = arith.mulf %244, %245 : vector<2x16x4xf32>
    %247 = arith.subf %204, %246 : vector<2x16x4xf32>
    %248 = vector.shape_cast %243 : vector<2x16x1xi1> to vector<2x16x1xi1>
    %249 = vector.broadcast %248 : vector<2x16x1xi1> to vector<2x16x4xi1>
    %250 = vector.shape_cast %238 : vector<2x1x4xf32> to vector<2x1x4xf32>
    %251 = vector.broadcast %250 : vector<2x1x4xf32> to vector<2x16x4xf32>
    %252 = arith.select %249, %251, %247 : vector<2x16x4xi1>, vector<2x16x4xf32>
    %c4_i32_37 = arith.constant 4 : i32
    %253 = vector.broadcast %c4_i32_37 : i32 to vector<2x1x16xi32>
    %254 = arith.cmpi eq, %27, %253 : vector<2x1x16xi32>
    %255 = vector.broadcast %235 : vector<2x1x16xf32> to vector<2x8x16xf32>
    %256 = vector.broadcast %241 : vector<2x8x1xf32> to vector<2x8x16xf32>
    %257 = arith.mulf %255, %256 : vector<2x8x16xf32>
    %258 = arith.subf %215, %257 : vector<2x8x16xf32>
    %259 = vector.shape_cast %254 : vector<2x1x16xi1> to vector<2x1x16xi1>
    %260 = vector.broadcast %259 : vector<2x1x16xi1> to vector<2x8x16xi1>
    %261 = vector.shape_cast %241 : vector<2x8x1xf32> to vector<2x8x1xf32>
    %262 = vector.broadcast %261 : vector<2x8x1xf32> to vector<2x8x16xf32>
    %263 = arith.select %260, %262, %258 : vector<2x8x16xi1>, vector<2x8x16xf32>
    %264 = vector.broadcast %228 : vector<2x16x1xf32> to vector<2x16x16xf32>
    %265 = vector.broadcast %235 : vector<2x1x16xf32> to vector<2x16x16xf32>
    %266 = arith.mulf %264, %265 : vector<2x16x16xf32>
    %267 = arith.subf %219, %266 : vector<2x16x16xf32>
    %268 = vector.extract_strided_slice %267 {offsets = [0, 5, 5], sizes = [2, 1, 1], strides = [1, 1, 1]} : vector<2x16x16xf32> to vector<2x1x1xf32>
    %269 = math.rsqrt %268 : vector<2x1x1xf32>
    %c5_i32 = arith.constant 5 : i32
    %270 = vector.broadcast %c5_i32 : i32 to vector<2x16x1xi32>
    %271 = arith.cmpi sge, %26, %270 : vector<2x16x1xi32>
    %272 = vector.extract_strided_slice %267 {offsets = [0, 0, 5], sizes = [2, 16, 1], strides = [1, 1, 1]} : vector<2x16x16xf32> to vector<2x16x1xf32>
    %273 = vector.broadcast %269 : vector<2x1x1xf32> to vector<2x16x1xf32>
    %274 = arith.mulf %272, %273 : vector<2x16x1xf32>
    %cst_38 = arith.constant 0.000000e+00 : f32
    %275 = vector.broadcast %cst_38 : f32 to vector<2x16x1xf32>
    %276 = arith.select %271, %274, %275 : vector<2x16x1xi1>, vector<2x16x1xf32>
    %c5_i32_39 = arith.constant 5 : i32
    %277 = vector.broadcast %c5_i32_39 : i32 to vector<2x1x16xi32>
    %278 = arith.cmpi sge, %27, %277 : vector<2x1x16xi32>
    %279 = vector.extract_strided_slice %267 {offsets = [0, 5, 0], sizes = [2, 1, 16], strides = [1, 1, 1]} : vector<2x16x16xf32> to vector<2x1x16xf32>
    %280 = vector.broadcast %269 : vector<2x1x1xf32> to vector<2x1x16xf32>
    %281 = arith.mulf %279, %280 : vector<2x1x16xf32>
    %cst_40 = arith.constant 0.000000e+00 : f32
    %282 = vector.broadcast %cst_40 : f32 to vector<2x1x16xf32>
    %283 = arith.select %278, %281, %282 : vector<2x1x16xi1>, vector<2x1x16xf32>
    %284 = vector.extract_strided_slice %252 {offsets = [0, 5, 0], sizes = [2, 1, 4], strides = [1, 1, 1]} : vector<2x16x4xf32> to vector<2x1x4xf32>
    %285 = vector.broadcast %269 : vector<2x1x1xf32> to vector<2x1x4xf32>
    %286 = arith.mulf %284, %285 : vector<2x1x4xf32>
    %287 = vector.extract_strided_slice %263 {offsets = [0, 0, 5], sizes = [2, 8, 1], strides = [1, 1, 1]} : vector<2x8x16xf32> to vector<2x8x1xf32>
    %288 = vector.broadcast %269 : vector<2x1x1xf32> to vector<2x8x1xf32>
    %289 = arith.mulf %287, %288 : vector<2x8x1xf32>
    %c5_i32_41 = arith.constant 5 : i32
    %290 = vector.broadcast %c5_i32_41 : i32 to vector<2x16x1xi32>
    %291 = arith.cmpi eq, %26, %290 : vector<2x16x1xi32>
    %292 = vector.broadcast %276 : vector<2x16x1xf32> to vector<2x16x4xf32>
    %293 = vector.broadcast %286 : vector<2x1x4xf32> to vector<2x16x4xf32>
    %294 = arith.mulf %292, %293 : vector<2x16x4xf32>
    %295 = arith.subf %252, %294 : vector<2x16x4xf32>
    %296 = vector.shape_cast %291 : vector<2x16x1xi1> to vector<2x16x1xi1>
    %297 = vector.broadcast %296 : vector<2x16x1xi1> to vector<2x16x4xi1>
    %298 = vector.shape_cast %286 : vector<2x1x4xf32> to vector<2x1x4xf32>
    %299 = vector.broadcast %298 : vector<2x1x4xf32> to vector<2x16x4xf32>
    %300 = arith.select %297, %299, %295 : vector<2x16x4xi1>, vector<2x16x4xf32>
    %c5_i32_42 = arith.constant 5 : i32
    %301 = vector.broadcast %c5_i32_42 : i32 to vector<2x1x16xi32>
    %302 = arith.cmpi eq, %27, %301 : vector<2x1x16xi32>
    %303 = vector.broadcast %283 : vector<2x1x16xf32> to vector<2x8x16xf32>
    %304 = vector.broadcast %289 : vector<2x8x1xf32> to vector<2x8x16xf32>
    %305 = arith.mulf %303, %304 : vector<2x8x16xf32>
    %306 = arith.subf %263, %305 : vector<2x8x16xf32>
    %307 = vector.shape_cast %302 : vector<2x1x16xi1> to vector<2x1x16xi1>
    %308 = vector.broadcast %307 : vector<2x1x16xi1> to vector<2x8x16xi1>
    %309 = vector.shape_cast %289 : vector<2x8x1xf32> to vector<2x8x1xf32>
    %310 = vector.broadcast %309 : vector<2x8x1xf32> to vector<2x8x16xf32>
    %311 = arith.select %308, %310, %306 : vector<2x8x16xi1>, vector<2x8x16xf32>
    %312 = vector.broadcast %276 : vector<2x16x1xf32> to vector<2x16x16xf32>
    %313 = vector.broadcast %283 : vector<2x1x16xf32> to vector<2x16x16xf32>
    %314 = arith.mulf %312, %313 : vector<2x16x16xf32>
    %315 = arith.subf %267, %314 : vector<2x16x16xf32>
    %316 = vector.extract_strided_slice %315 {offsets = [0, 6, 6], sizes = [2, 1, 1], strides = [1, 1, 1]} : vector<2x16x16xf32> to vector<2x1x1xf32>
    %317 = math.rsqrt %316 : vector<2x1x1xf32>
    %c6_i32 = arith.constant 6 : i32
    %318 = vector.broadcast %c6_i32 : i32 to vector<2x16x1xi32>
    %319 = arith.cmpi sge, %26, %318 : vector<2x16x1xi32>
    %320 = vector.extract_strided_slice %315 {offsets = [0, 0, 6], sizes = [2, 16, 1], strides = [1, 1, 1]} : vector<2x16x16xf32> to vector<2x16x1xf32>
    %321 = vector.broadcast %317 : vector<2x1x1xf32> to vector<2x16x1xf32>
    %322 = arith.mulf %320, %321 : vector<2x16x1xf32>
    %cst_43 = arith.constant 0.000000e+00 : f32
    %323 = vector.broadcast %cst_43 : f32 to vector<2x16x1xf32>
    %324 = arith.select %319, %322, %323 : vector<2x16x1xi1>, vector<2x16x1xf32>
    %c6_i32_44 = arith.constant 6 : i32
    %325 = vector.broadcast %c6_i32_44 : i32 to vector<2x1x16xi32>
    %326 = arith.cmpi sge, %27, %325 : vector<2x1x16xi32>
    %327 = vector.extract_strided_slice %315 {offsets = [0, 6, 0], sizes = [2, 1, 16], strides = [1, 1, 1]} : vector<2x16x16xf32> to vector<2x1x16xf32>
    %328 = vector.broadcast %317 : vector<2x1x1xf32> to vector<2x1x16xf32>
    %329 = arith.mulf %327, %328 : vector<2x1x16xf32>
    %cst_45 = arith.constant 0.000000e+00 : f32
    %330 = vector.broadcast %cst_45 : f32 to vector<2x1x16xf32>
    %331 = arith.select %326, %329, %330 : vector<2x1x16xi1>, vector<2x1x16xf32>
    %332 = vector.extract_strided_slice %300 {offsets = [0, 6, 0], sizes = [2, 1, 4], strides = [1, 1, 1]} : vector<2x16x4xf32> to vector<2x1x4xf32>
    %333 = vector.broadcast %317 : vector<2x1x1xf32> to vector<2x1x4xf32>
    %334 = arith.mulf %332, %333 : vector<2x1x4xf32>
    %335 = vector.extract_strided_slice %311 {offsets = [0, 0, 6], sizes = [2, 8, 1], strides = [1, 1, 1]} : vector<2x8x16xf32> to vector<2x8x1xf32>
    %336 = vector.broadcast %317 : vector<2x1x1xf32> to vector<2x8x1xf32>
    %337 = arith.mulf %335, %336 : vector<2x8x1xf32>
    %c6_i32_46 = arith.constant 6 : i32
    %338 = vector.broadcast %c6_i32_46 : i32 to vector<2x16x1xi32>
    %339 = arith.cmpi eq, %26, %338 : vector<2x16x1xi32>
    %340 = vector.broadcast %324 : vector<2x16x1xf32> to vector<2x16x4xf32>
    %341 = vector.broadcast %334 : vector<2x1x4xf32> to vector<2x16x4xf32>
    %342 = arith.mulf %340, %341 : vector<2x16x4xf32>
    %343 = arith.subf %300, %342 : vector<2x16x4xf32>
    %344 = vector.shape_cast %339 : vector<2x16x1xi1> to vector<2x16x1xi1>
    %345 = vector.broadcast %344 : vector<2x16x1xi1> to vector<2x16x4xi1>
    %346 = vector.shape_cast %334 : vector<2x1x4xf32> to vector<2x1x4xf32>
    %347 = vector.broadcast %346 : vector<2x1x4xf32> to vector<2x16x4xf32>
    %348 = arith.select %345, %347, %343 : vector<2x16x4xi1>, vector<2x16x4xf32>
    %c6_i32_47 = arith.constant 6 : i32
    %349 = vector.broadcast %c6_i32_47 : i32 to vector<2x1x16xi32>
    %350 = arith.cmpi eq, %27, %349 : vector<2x1x16xi32>
    %351 = vector.broadcast %331 : vector<2x1x16xf32> to vector<2x8x16xf32>
    %352 = vector.broadcast %337 : vector<2x8x1xf32> to vector<2x8x16xf32>
    %353 = arith.mulf %351, %352 : vector<2x8x16xf32>
    %354 = arith.subf %311, %353 : vector<2x8x16xf32>
    %355 = vector.shape_cast %350 : vector<2x1x16xi1> to vector<2x1x16xi1>
    %356 = vector.broadcast %355 : vector<2x1x16xi1> to vector<2x8x16xi1>
    %357 = vector.shape_cast %337 : vector<2x8x1xf32> to vector<2x8x1xf32>
    %358 = vector.broadcast %357 : vector<2x8x1xf32> to vector<2x8x16xf32>
    %359 = arith.select %356, %358, %354 : vector<2x8x16xi1>, vector<2x8x16xf32>
    %360 = vector.broadcast %324 : vector<2x16x1xf32> to vector<2x16x16xf32>
    %361 = vector.broadcast %331 : vector<2x1x16xf32> to vector<2x16x16xf32>
    %362 = arith.mulf %360, %361 : vector<2x16x16xf32>
    %363 = arith.subf %315, %362 : vector<2x16x16xf32>
    %364 = vector.extract_strided_slice %363 {offsets = [0, 7, 7], sizes = [2, 1, 1], strides = [1, 1, 1]} : vector<2x16x16xf32> to vector<2x1x1xf32>
    %365 = math.rsqrt %364 : vector<2x1x1xf32>
    %c7_i32 = arith.constant 7 : i32
    %366 = vector.broadcast %c7_i32 : i32 to vector<2x16x1xi32>
    %367 = arith.cmpi sge, %26, %366 : vector<2x16x1xi32>
    %368 = vector.extract_strided_slice %363 {offsets = [0, 0, 7], sizes = [2, 16, 1], strides = [1, 1, 1]} : vector<2x16x16xf32> to vector<2x16x1xf32>
    %369 = vector.broadcast %365 : vector<2x1x1xf32> to vector<2x16x1xf32>
    %370 = arith.mulf %368, %369 : vector<2x16x1xf32>
    %cst_48 = arith.constant 0.000000e+00 : f32
    %371 = vector.broadcast %cst_48 : f32 to vector<2x16x1xf32>
    %372 = arith.select %367, %370, %371 : vector<2x16x1xi1>, vector<2x16x1xf32>
    %c7_i32_49 = arith.constant 7 : i32
    %373 = vector.broadcast %c7_i32_49 : i32 to vector<2x1x16xi32>
    %374 = arith.cmpi sge, %27, %373 : vector<2x1x16xi32>
    %375 = vector.extract_strided_slice %363 {offsets = [0, 7, 0], sizes = [2, 1, 16], strides = [1, 1, 1]} : vector<2x16x16xf32> to vector<2x1x16xf32>
    %376 = vector.broadcast %365 : vector<2x1x1xf32> to vector<2x1x16xf32>
    %377 = arith.mulf %375, %376 : vector<2x1x16xf32>
    %cst_50 = arith.constant 0.000000e+00 : f32
    %378 = vector.broadcast %cst_50 : f32 to vector<2x1x16xf32>
    %379 = arith.select %374, %377, %378 : vector<2x1x16xi1>, vector<2x1x16xf32>
    %380 = vector.extract_strided_slice %348 {offsets = [0, 7, 0], sizes = [2, 1, 4], strides = [1, 1, 1]} : vector<2x16x4xf32> to vector<2x1x4xf32>
    %381 = vector.broadcast %365 : vector<2x1x1xf32> to vector<2x1x4xf32>
    %382 = arith.mulf %380, %381 : vector<2x1x4xf32>
    %383 = vector.extract_strided_slice %359 {offsets = [0, 0, 7], sizes = [2, 8, 1], strides = [1, 1, 1]} : vector<2x8x16xf32> to vector<2x8x1xf32>
    %384 = vector.broadcast %365 : vector<2x1x1xf32> to vector<2x8x1xf32>
    %385 = arith.mulf %383, %384 : vector<2x8x1xf32>
    %c7_i32_51 = arith.constant 7 : i32
    %386 = vector.broadcast %c7_i32_51 : i32 to vector<2x16x1xi32>
    %387 = arith.cmpi eq, %26, %386 : vector<2x16x1xi32>
    %388 = vector.broadcast %372 : vector<2x16x1xf32> to vector<2x16x4xf32>
    %389 = vector.broadcast %382 : vector<2x1x4xf32> to vector<2x16x4xf32>
    %390 = arith.mulf %388, %389 : vector<2x16x4xf32>
    %391 = arith.subf %348, %390 : vector<2x16x4xf32>
    %392 = vector.shape_cast %387 : vector<2x16x1xi1> to vector<2x16x1xi1>
    %393 = vector.broadcast %392 : vector<2x16x1xi1> to vector<2x16x4xi1>
    %394 = vector.shape_cast %382 : vector<2x1x4xf32> to vector<2x1x4xf32>
    %395 = vector.broadcast %394 : vector<2x1x4xf32> to vector<2x16x4xf32>
    %396 = arith.select %393, %395, %391 : vector<2x16x4xi1>, vector<2x16x4xf32>
    %c7_i32_52 = arith.constant 7 : i32
    %397 = vector.broadcast %c7_i32_52 : i32 to vector<2x1x16xi32>
    %398 = arith.cmpi eq, %27, %397 : vector<2x1x16xi32>
    %399 = vector.broadcast %379 : vector<2x1x16xf32> to vector<2x8x16xf32>
    %400 = vector.broadcast %385 : vector<2x8x1xf32> to vector<2x8x16xf32>
    %401 = arith.mulf %399, %400 : vector<2x8x16xf32>
    %402 = arith.subf %359, %401 : vector<2x8x16xf32>
    %403 = vector.shape_cast %398 : vector<2x1x16xi1> to vector<2x1x16xi1>
    %404 = vector.broadcast %403 : vector<2x1x16xi1> to vector<2x8x16xi1>
    %405 = vector.shape_cast %385 : vector<2x8x1xf32> to vector<2x8x1xf32>
    %406 = vector.broadcast %405 : vector<2x8x1xf32> to vector<2x8x16xf32>
    %407 = arith.select %404, %406, %402 : vector<2x8x16xi1>, vector<2x8x16xf32>
    %408 = vector.broadcast %372 : vector<2x16x1xf32> to vector<2x16x16xf32>
    %409 = vector.broadcast %379 : vector<2x1x16xf32> to vector<2x16x16xf32>
    %410 = arith.mulf %408, %409 : vector<2x16x16xf32>
    %411 = arith.subf %363, %410 : vector<2x16x16xf32>
    %412 = vector.extract_strided_slice %411 {offsets = [0, 8, 8], sizes = [2, 1, 1], strides = [1, 1, 1]} : vector<2x16x16xf32> to vector<2x1x1xf32>
    %413 = math.rsqrt %412 : vector<2x1x1xf32>
    %c8_i32 = arith.constant 8 : i32
    %414 = vector.broadcast %c8_i32 : i32 to vector<2x16x1xi32>
    %415 = arith.cmpi sge, %26, %414 : vector<2x16x1xi32>
    %416 = vector.extract_strided_slice %411 {offsets = [0, 0, 8], sizes = [2, 16, 1], strides = [1, 1, 1]} : vector<2x16x16xf32> to vector<2x16x1xf32>
    %417 = vector.broadcast %413 : vector<2x1x1xf32> to vector<2x16x1xf32>
    %418 = arith.mulf %416, %417 : vector<2x16x1xf32>
    %cst_53 = arith.constant 0.000000e+00 : f32
    %419 = vector.broadcast %cst_53 : f32 to vector<2x16x1xf32>
    %420 = arith.select %415, %418, %419 : vector<2x16x1xi1>, vector<2x16x1xf32>
    %c8_i32_54 = arith.constant 8 : i32
    %421 = vector.broadcast %c8_i32_54 : i32 to vector<2x1x16xi32>
    %422 = arith.cmpi sge, %27, %421 : vector<2x1x16xi32>
    %423 = vector.extract_strided_slice %411 {offsets = [0, 8, 0], sizes = [2, 1, 16], strides = [1, 1, 1]} : vector<2x16x16xf32> to vector<2x1x16xf32>
    %424 = vector.broadcast %413 : vector<2x1x1xf32> to vector<2x1x16xf32>
    %425 = arith.mulf %423, %424 : vector<2x1x16xf32>
    %cst_55 = arith.constant 0.000000e+00 : f32
    %426 = vector.broadcast %cst_55 : f32 to vector<2x1x16xf32>
    %427 = arith.select %422, %425, %426 : vector<2x1x16xi1>, vector<2x1x16xf32>
    %428 = vector.extract_strided_slice %396 {offsets = [0, 8, 0], sizes = [2, 1, 4], strides = [1, 1, 1]} : vector<2x16x4xf32> to vector<2x1x4xf32>
    %429 = vector.broadcast %413 : vector<2x1x1xf32> to vector<2x1x4xf32>
    %430 = arith.mulf %428, %429 : vector<2x1x4xf32>
    %431 = vector.extract_strided_slice %407 {offsets = [0, 0, 8], sizes = [2, 8, 1], strides = [1, 1, 1]} : vector<2x8x16xf32> to vector<2x8x1xf32>
    %432 = vector.broadcast %413 : vector<2x1x1xf32> to vector<2x8x1xf32>
    %433 = arith.mulf %431, %432 : vector<2x8x1xf32>
    %c8_i32_56 = arith.constant 8 : i32
    %434 = vector.broadcast %c8_i32_56 : i32 to vector<2x16x1xi32>
    %435 = arith.cmpi eq, %26, %434 : vector<2x16x1xi32>
    %436 = vector.broadcast %420 : vector<2x16x1xf32> to vector<2x16x4xf32>
    %437 = vector.broadcast %430 : vector<2x1x4xf32> to vector<2x16x4xf32>
    %438 = arith.mulf %436, %437 : vector<2x16x4xf32>
    %439 = arith.subf %396, %438 : vector<2x16x4xf32>
    %440 = vector.shape_cast %435 : vector<2x16x1xi1> to vector<2x16x1xi1>
    %441 = vector.broadcast %440 : vector<2x16x1xi1> to vector<2x16x4xi1>
    %442 = vector.shape_cast %430 : vector<2x1x4xf32> to vector<2x1x4xf32>
    %443 = vector.broadcast %442 : vector<2x1x4xf32> to vector<2x16x4xf32>
    %444 = arith.select %441, %443, %439 : vector<2x16x4xi1>, vector<2x16x4xf32>
    %c8_i32_57 = arith.constant 8 : i32
    %445 = vector.broadcast %c8_i32_57 : i32 to vector<2x1x16xi32>
    %446 = arith.cmpi eq, %27, %445 : vector<2x1x16xi32>
    %447 = vector.broadcast %427 : vector<2x1x16xf32> to vector<2x8x16xf32>
    %448 = vector.broadcast %433 : vector<2x8x1xf32> to vector<2x8x16xf32>
    %449 = arith.mulf %447, %448 : vector<2x8x16xf32>
    %450 = arith.subf %407, %449 : vector<2x8x16xf32>
    %451 = vector.shape_cast %446 : vector<2x1x16xi1> to vector<2x1x16xi1>
    %452 = vector.broadcast %451 : vector<2x1x16xi1> to vector<2x8x16xi1>
    %453 = vector.shape_cast %433 : vector<2x8x1xf32> to vector<2x8x1xf32>
    %454 = vector.broadcast %453 : vector<2x8x1xf32> to vector<2x8x16xf32>
    %455 = arith.select %452, %454, %450 : vector<2x8x16xi1>, vector<2x8x16xf32>
    %456 = vector.broadcast %420 : vector<2x16x1xf32> to vector<2x16x16xf32>
    %457 = vector.broadcast %427 : vector<2x1x16xf32> to vector<2x16x16xf32>
    %458 = arith.mulf %456, %457 : vector<2x16x16xf32>
    %459 = arith.subf %411, %458 : vector<2x16x16xf32>
    %460 = vector.extract_strided_slice %459 {offsets = [0, 9, 9], sizes = [2, 1, 1], strides = [1, 1, 1]} : vector<2x16x16xf32> to vector<2x1x1xf32>
    %461 = math.rsqrt %460 : vector<2x1x1xf32>
    %c9_i32 = arith.constant 9 : i32
    %462 = vector.broadcast %c9_i32 : i32 to vector<2x16x1xi32>
    %463 = arith.cmpi sge, %26, %462 : vector<2x16x1xi32>
    %464 = vector.extract_strided_slice %459 {offsets = [0, 0, 9], sizes = [2, 16, 1], strides = [1, 1, 1]} : vector<2x16x16xf32> to vector<2x16x1xf32>
    %465 = vector.broadcast %461 : vector<2x1x1xf32> to vector<2x16x1xf32>
    %466 = arith.mulf %464, %465 : vector<2x16x1xf32>
    %cst_58 = arith.constant 0.000000e+00 : f32
    %467 = vector.broadcast %cst_58 : f32 to vector<2x16x1xf32>
    %468 = arith.select %463, %466, %467 : vector<2x16x1xi1>, vector<2x16x1xf32>
    %c9_i32_59 = arith.constant 9 : i32
    %469 = vector.broadcast %c9_i32_59 : i32 to vector<2x1x16xi32>
    %470 = arith.cmpi sge, %27, %469 : vector<2x1x16xi32>
    %471 = vector.extract_strided_slice %459 {offsets = [0, 9, 0], sizes = [2, 1, 16], strides = [1, 1, 1]} : vector<2x16x16xf32> to vector<2x1x16xf32>
    %472 = vector.broadcast %461 : vector<2x1x1xf32> to vector<2x1x16xf32>
    %473 = arith.mulf %471, %472 : vector<2x1x16xf32>
    %cst_60 = arith.constant 0.000000e+00 : f32
    %474 = vector.broadcast %cst_60 : f32 to vector<2x1x16xf32>
    %475 = arith.select %470, %473, %474 : vector<2x1x16xi1>, vector<2x1x16xf32>
    %476 = vector.extract_strided_slice %444 {offsets = [0, 9, 0], sizes = [2, 1, 4], strides = [1, 1, 1]} : vector<2x16x4xf32> to vector<2x1x4xf32>
    %477 = vector.broadcast %461 : vector<2x1x1xf32> to vector<2x1x4xf32>
    %478 = arith.mulf %476, %477 : vector<2x1x4xf32>
    %479 = vector.extract_strided_slice %455 {offsets = [0, 0, 9], sizes = [2, 8, 1], strides = [1, 1, 1]} : vector<2x8x16xf32> to vector<2x8x1xf32>
    %480 = vector.broadcast %461 : vector<2x1x1xf32> to vector<2x8x1xf32>
    %481 = arith.mulf %479, %480 : vector<2x8x1xf32>
    %c9_i32_61 = arith.constant 9 : i32
    %482 = vector.broadcast %c9_i32_61 : i32 to vector<2x16x1xi32>
    %483 = arith.cmpi eq, %26, %482 : vector<2x16x1xi32>
    %484 = vector.broadcast %468 : vector<2x16x1xf32> to vector<2x16x4xf32>
    %485 = vector.broadcast %478 : vector<2x1x4xf32> to vector<2x16x4xf32>
    %486 = arith.mulf %484, %485 : vector<2x16x4xf32>
    %487 = arith.subf %444, %486 : vector<2x16x4xf32>
    %488 = vector.shape_cast %483 : vector<2x16x1xi1> to vector<2x16x1xi1>
    %489 = vector.broadcast %488 : vector<2x16x1xi1> to vector<2x16x4xi1>
    %490 = vector.shape_cast %478 : vector<2x1x4xf32> to vector<2x1x4xf32>
    %491 = vector.broadcast %490 : vector<2x1x4xf32> to vector<2x16x4xf32>
    %492 = arith.select %489, %491, %487 : vector<2x16x4xi1>, vector<2x16x4xf32>
    %c9_i32_62 = arith.constant 9 : i32
    %493 = vector.broadcast %c9_i32_62 : i32 to vector<2x1x16xi32>
    %494 = arith.cmpi eq, %27, %493 : vector<2x1x16xi32>
    %495 = vector.broadcast %475 : vector<2x1x16xf32> to vector<2x8x16xf32>
    %496 = vector.broadcast %481 : vector<2x8x1xf32> to vector<2x8x16xf32>
    %497 = arith.mulf %495, %496 : vector<2x8x16xf32>
    %498 = arith.subf %455, %497 : vector<2x8x16xf32>
    %499 = vector.shape_cast %494 : vector<2x1x16xi1> to vector<2x1x16xi1>
    %500 = vector.broadcast %499 : vector<2x1x16xi1> to vector<2x8x16xi1>
    %501 = vector.shape_cast %481 : vector<2x8x1xf32> to vector<2x8x1xf32>
    %502 = vector.broadcast %501 : vector<2x8x1xf32> to vector<2x8x16xf32>
    %503 = arith.select %500, %502, %498 : vector<2x8x16xi1>, vector<2x8x16xf32>
    %504 = vector.broadcast %468 : vector<2x16x1xf32> to vector<2x16x16xf32>
    %505 = vector.broadcast %475 : vector<2x1x16xf32> to vector<2x16x16xf32>
    %506 = arith.mulf %504, %505 : vector<2x16x16xf32>
    %507 = arith.subf %459, %506 : vector<2x16x16xf32>
    %508 = vector.extract_strided_slice %507 {offsets = [0, 10, 10], sizes = [2, 1, 1], strides = [1, 1, 1]} : vector<2x16x16xf32> to vector<2x1x1xf32>
    %509 = math.rsqrt %508 : vector<2x1x1xf32>
    %c10_i32 = arith.constant 10 : i32
    %510 = vector.broadcast %c10_i32 : i32 to vector<2x16x1xi32>
    %511 = arith.cmpi sge, %26, %510 : vector<2x16x1xi32>
    %512 = vector.extract_strided_slice %507 {offsets = [0, 0, 10], sizes = [2, 16, 1], strides = [1, 1, 1]} : vector<2x16x16xf32> to vector<2x16x1xf32>
    %513 = vector.broadcast %509 : vector<2x1x1xf32> to vector<2x16x1xf32>
    %514 = arith.mulf %512, %513 : vector<2x16x1xf32>
    %cst_63 = arith.constant 0.000000e+00 : f32
    %515 = vector.broadcast %cst_63 : f32 to vector<2x16x1xf32>
    %516 = arith.select %511, %514, %515 : vector<2x16x1xi1>, vector<2x16x1xf32>
    %c10_i32_64 = arith.constant 10 : i32
    %517 = vector.broadcast %c10_i32_64 : i32 to vector<2x1x16xi32>
    %518 = arith.cmpi sge, %27, %517 : vector<2x1x16xi32>
    %519 = vector.extract_strided_slice %507 {offsets = [0, 10, 0], sizes = [2, 1, 16], strides = [1, 1, 1]} : vector<2x16x16xf32> to vector<2x1x16xf32>
    %520 = vector.broadcast %509 : vector<2x1x1xf32> to vector<2x1x16xf32>
    %521 = arith.mulf %519, %520 : vector<2x1x16xf32>
    %cst_65 = arith.constant 0.000000e+00 : f32
    %522 = vector.broadcast %cst_65 : f32 to vector<2x1x16xf32>
    %523 = arith.select %518, %521, %522 : vector<2x1x16xi1>, vector<2x1x16xf32>
    %524 = vector.extract_strided_slice %492 {offsets = [0, 10, 0], sizes = [2, 1, 4], strides = [1, 1, 1]} : vector<2x16x4xf32> to vector<2x1x4xf32>
    %525 = vector.broadcast %509 : vector<2x1x1xf32> to vector<2x1x4xf32>
    %526 = arith.mulf %524, %525 : vector<2x1x4xf32>
    %527 = vector.extract_strided_slice %503 {offsets = [0, 0, 10], sizes = [2, 8, 1], strides = [1, 1, 1]} : vector<2x8x16xf32> to vector<2x8x1xf32>
    %528 = vector.broadcast %509 : vector<2x1x1xf32> to vector<2x8x1xf32>
    %529 = arith.mulf %527, %528 : vector<2x8x1xf32>
    %c10_i32_66 = arith.constant 10 : i32
    %530 = vector.broadcast %c10_i32_66 : i32 to vector<2x16x1xi32>
    %531 = arith.cmpi eq, %26, %530 : vector<2x16x1xi32>
    %532 = vector.broadcast %516 : vector<2x16x1xf32> to vector<2x16x4xf32>
    %533 = vector.broadcast %526 : vector<2x1x4xf32> to vector<2x16x4xf32>
    %534 = arith.mulf %532, %533 : vector<2x16x4xf32>
    %535 = arith.subf %492, %534 : vector<2x16x4xf32>
    %536 = vector.shape_cast %531 : vector<2x16x1xi1> to vector<2x16x1xi1>
    %537 = vector.broadcast %536 : vector<2x16x1xi1> to vector<2x16x4xi1>
    %538 = vector.shape_cast %526 : vector<2x1x4xf32> to vector<2x1x4xf32>
    %539 = vector.broadcast %538 : vector<2x1x4xf32> to vector<2x16x4xf32>
    %540 = arith.select %537, %539, %535 : vector<2x16x4xi1>, vector<2x16x4xf32>
    %c10_i32_67 = arith.constant 10 : i32
    %541 = vector.broadcast %c10_i32_67 : i32 to vector<2x1x16xi32>
    %542 = arith.cmpi eq, %27, %541 : vector<2x1x16xi32>
    %543 = vector.broadcast %523 : vector<2x1x16xf32> to vector<2x8x16xf32>
    %544 = vector.broadcast %529 : vector<2x8x1xf32> to vector<2x8x16xf32>
    %545 = arith.mulf %543, %544 : vector<2x8x16xf32>
    %546 = arith.subf %503, %545 : vector<2x8x16xf32>
    %547 = vector.shape_cast %542 : vector<2x1x16xi1> to vector<2x1x16xi1>
    %548 = vector.broadcast %547 : vector<2x1x16xi1> to vector<2x8x16xi1>
    %549 = vector.shape_cast %529 : vector<2x8x1xf32> to vector<2x8x1xf32>
    %550 = vector.broadcast %549 : vector<2x8x1xf32> to vector<2x8x16xf32>
    %551 = arith.select %548, %550, %546 : vector<2x8x16xi1>, vector<2x8x16xf32>
    %552 = vector.broadcast %516 : vector<2x16x1xf32> to vector<2x16x16xf32>
    %553 = vector.broadcast %523 : vector<2x1x16xf32> to vector<2x16x16xf32>
    %554 = arith.mulf %552, %553 : vector<2x16x16xf32>
    %555 = arith.subf %507, %554 : vector<2x16x16xf32>
    %556 = vector.extract_strided_slice %555 {offsets = [0, 11, 11], sizes = [2, 1, 1], strides = [1, 1, 1]} : vector<2x16x16xf32> to vector<2x1x1xf32>
    %557 = math.rsqrt %556 : vector<2x1x1xf32>
    %c11_i32 = arith.constant 11 : i32
    %558 = vector.broadcast %c11_i32 : i32 to vector<2x16x1xi32>
    %559 = arith.cmpi sge, %26, %558 : vector<2x16x1xi32>
    %560 = vector.extract_strided_slice %555 {offsets = [0, 0, 11], sizes = [2, 16, 1], strides = [1, 1, 1]} : vector<2x16x16xf32> to vector<2x16x1xf32>
    %561 = vector.broadcast %557 : vector<2x1x1xf32> to vector<2x16x1xf32>
    %562 = arith.mulf %560, %561 : vector<2x16x1xf32>
    %cst_68 = arith.constant 0.000000e+00 : f32
    %563 = vector.broadcast %cst_68 : f32 to vector<2x16x1xf32>
    %564 = arith.select %559, %562, %563 : vector<2x16x1xi1>, vector<2x16x1xf32>
    %c11_i32_69 = arith.constant 11 : i32
    %565 = vector.broadcast %c11_i32_69 : i32 to vector<2x1x16xi32>
    %566 = arith.cmpi sge, %27, %565 : vector<2x1x16xi32>
    %567 = vector.extract_strided_slice %555 {offsets = [0, 11, 0], sizes = [2, 1, 16], strides = [1, 1, 1]} : vector<2x16x16xf32> to vector<2x1x16xf32>
    %568 = vector.broadcast %557 : vector<2x1x1xf32> to vector<2x1x16xf32>
    %569 = arith.mulf %567, %568 : vector<2x1x16xf32>
    %cst_70 = arith.constant 0.000000e+00 : f32
    %570 = vector.broadcast %cst_70 : f32 to vector<2x1x16xf32>
    %571 = arith.select %566, %569, %570 : vector<2x1x16xi1>, vector<2x1x16xf32>
    %572 = vector.extract_strided_slice %540 {offsets = [0, 11, 0], sizes = [2, 1, 4], strides = [1, 1, 1]} : vector<2x16x4xf32> to vector<2x1x4xf32>
    %573 = vector.broadcast %557 : vector<2x1x1xf32> to vector<2x1x4xf32>
    %574 = arith.mulf %572, %573 : vector<2x1x4xf32>
    %575 = vector.extract_strided_slice %551 {offsets = [0, 0, 11], sizes = [2, 8, 1], strides = [1, 1, 1]} : vector<2x8x16xf32> to vector<2x8x1xf32>
    %576 = vector.broadcast %557 : vector<2x1x1xf32> to vector<2x8x1xf32>
    %577 = arith.mulf %575, %576 : vector<2x8x1xf32>
    %c11_i32_71 = arith.constant 11 : i32
    %578 = vector.broadcast %c11_i32_71 : i32 to vector<2x16x1xi32>
    %579 = arith.cmpi eq, %26, %578 : vector<2x16x1xi32>
    %580 = vector.broadcast %564 : vector<2x16x1xf32> to vector<2x16x4xf32>
    %581 = vector.broadcast %574 : vector<2x1x4xf32> to vector<2x16x4xf32>
    %582 = arith.mulf %580, %581 : vector<2x16x4xf32>
    %583 = arith.subf %540, %582 : vector<2x16x4xf32>
    %584 = vector.shape_cast %579 : vector<2x16x1xi1> to vector<2x16x1xi1>
    %585 = vector.broadcast %584 : vector<2x16x1xi1> to vector<2x16x4xi1>
    %586 = vector.shape_cast %574 : vector<2x1x4xf32> to vector<2x1x4xf32>
    %587 = vector.broadcast %586 : vector<2x1x4xf32> to vector<2x16x4xf32>
    %588 = arith.select %585, %587, %583 : vector<2x16x4xi1>, vector<2x16x4xf32>
    %c11_i32_72 = arith.constant 11 : i32
    %589 = vector.broadcast %c11_i32_72 : i32 to vector<2x1x16xi32>
    %590 = arith.cmpi eq, %27, %589 : vector<2x1x16xi32>
    %591 = vector.broadcast %571 : vector<2x1x16xf32> to vector<2x8x16xf32>
    %592 = vector.broadcast %577 : vector<2x8x1xf32> to vector<2x8x16xf32>
    %593 = arith.mulf %591, %592 : vector<2x8x16xf32>
    %594 = arith.subf %551, %593 : vector<2x8x16xf32>
    %595 = vector.shape_cast %590 : vector<2x1x16xi1> to vector<2x1x16xi1>
    %596 = vector.broadcast %595 : vector<2x1x16xi1> to vector<2x8x16xi1>
    %597 = vector.shape_cast %577 : vector<2x8x1xf32> to vector<2x8x1xf32>
    %598 = vector.broadcast %597 : vector<2x8x1xf32> to vector<2x8x16xf32>
    %599 = arith.select %596, %598, %594 : vector<2x8x16xi1>, vector<2x8x16xf32>
    %600 = vector.broadcast %564 : vector<2x16x1xf32> to vector<2x16x16xf32>
    %601 = vector.broadcast %571 : vector<2x1x16xf32> to vector<2x16x16xf32>
    %602 = arith.mulf %600, %601 : vector<2x16x16xf32>
    %603 = arith.subf %555, %602 : vector<2x16x16xf32>
    %604 = vector.extract_strided_slice %603 {offsets = [0, 12, 12], sizes = [2, 1, 1], strides = [1, 1, 1]} : vector<2x16x16xf32> to vector<2x1x1xf32>
    %605 = math.rsqrt %604 : vector<2x1x1xf32>
    %c12_i32 = arith.constant 12 : i32
    %606 = vector.broadcast %c12_i32 : i32 to vector<2x16x1xi32>
    %607 = arith.cmpi sge, %26, %606 : vector<2x16x1xi32>
    %608 = vector.extract_strided_slice %603 {offsets = [0, 0, 12], sizes = [2, 16, 1], strides = [1, 1, 1]} : vector<2x16x16xf32> to vector<2x16x1xf32>
    %609 = vector.broadcast %605 : vector<2x1x1xf32> to vector<2x16x1xf32>
    %610 = arith.mulf %608, %609 : vector<2x16x1xf32>
    %cst_73 = arith.constant 0.000000e+00 : f32
    %611 = vector.broadcast %cst_73 : f32 to vector<2x16x1xf32>
    %612 = arith.select %607, %610, %611 : vector<2x16x1xi1>, vector<2x16x1xf32>
    %c12_i32_74 = arith.constant 12 : i32
    %613 = vector.broadcast %c12_i32_74 : i32 to vector<2x1x16xi32>
    %614 = arith.cmpi sge, %27, %613 : vector<2x1x16xi32>
    %615 = vector.extract_strided_slice %603 {offsets = [0, 12, 0], sizes = [2, 1, 16], strides = [1, 1, 1]} : vector<2x16x16xf32> to vector<2x1x16xf32>
    %616 = vector.broadcast %605 : vector<2x1x1xf32> to vector<2x1x16xf32>
    %617 = arith.mulf %615, %616 : vector<2x1x16xf32>
    %cst_75 = arith.constant 0.000000e+00 : f32
    %618 = vector.broadcast %cst_75 : f32 to vector<2x1x16xf32>
    %619 = arith.select %614, %617, %618 : vector<2x1x16xi1>, vector<2x1x16xf32>
    %620 = vector.extract_strided_slice %588 {offsets = [0, 12, 0], sizes = [2, 1, 4], strides = [1, 1, 1]} : vector<2x16x4xf32> to vector<2x1x4xf32>
    %621 = vector.broadcast %605 : vector<2x1x1xf32> to vector<2x1x4xf32>
    %622 = arith.mulf %620, %621 : vector<2x1x4xf32>
    %623 = vector.extract_strided_slice %599 {offsets = [0, 0, 12], sizes = [2, 8, 1], strides = [1, 1, 1]} : vector<2x8x16xf32> to vector<2x8x1xf32>
    %624 = vector.broadcast %605 : vector<2x1x1xf32> to vector<2x8x1xf32>
    %625 = arith.mulf %623, %624 : vector<2x8x1xf32>
    %c12_i32_76 = arith.constant 12 : i32
    %626 = vector.broadcast %c12_i32_76 : i32 to vector<2x16x1xi32>
    %627 = arith.cmpi eq, %26, %626 : vector<2x16x1xi32>
    %628 = vector.broadcast %612 : vector<2x16x1xf32> to vector<2x16x4xf32>
    %629 = vector.broadcast %622 : vector<2x1x4xf32> to vector<2x16x4xf32>
    %630 = arith.mulf %628, %629 : vector<2x16x4xf32>
    %631 = arith.subf %588, %630 : vector<2x16x4xf32>
    %632 = vector.shape_cast %627 : vector<2x16x1xi1> to vector<2x16x1xi1>
    %633 = vector.broadcast %632 : vector<2x16x1xi1> to vector<2x16x4xi1>
    %634 = vector.shape_cast %622 : vector<2x1x4xf32> to vector<2x1x4xf32>
    %635 = vector.broadcast %634 : vector<2x1x4xf32> to vector<2x16x4xf32>
    %636 = arith.select %633, %635, %631 : vector<2x16x4xi1>, vector<2x16x4xf32>
    %c12_i32_77 = arith.constant 12 : i32
    %637 = vector.broadcast %c12_i32_77 : i32 to vector<2x1x16xi32>
    %638 = arith.cmpi eq, %27, %637 : vector<2x1x16xi32>
    %639 = vector.broadcast %619 : vector<2x1x16xf32> to vector<2x8x16xf32>
    %640 = vector.broadcast %625 : vector<2x8x1xf32> to vector<2x8x16xf32>
    %641 = arith.mulf %639, %640 : vector<2x8x16xf32>
    %642 = arith.subf %599, %641 : vector<2x8x16xf32>
    %643 = vector.shape_cast %638 : vector<2x1x16xi1> to vector<2x1x16xi1>
    %644 = vector.broadcast %643 : vector<2x1x16xi1> to vector<2x8x16xi1>
    %645 = vector.shape_cast %625 : vector<2x8x1xf32> to vector<2x8x1xf32>
    %646 = vector.broadcast %645 : vector<2x8x1xf32> to vector<2x8x16xf32>
    %647 = arith.select %644, %646, %642 : vector<2x8x16xi1>, vector<2x8x16xf32>
    %648 = vector.broadcast %612 : vector<2x16x1xf32> to vector<2x16x16xf32>
    %649 = vector.broadcast %619 : vector<2x1x16xf32> to vector<2x16x16xf32>
    %650 = arith.mulf %648, %649 : vector<2x16x16xf32>
    %651 = arith.subf %603, %650 : vector<2x16x16xf32>
    %652 = vector.extract_strided_slice %651 {offsets = [0, 13, 13], sizes = [2, 1, 1], strides = [1, 1, 1]} : vector<2x16x16xf32> to vector<2x1x1xf32>
    %653 = math.rsqrt %652 : vector<2x1x1xf32>
    %c13_i32 = arith.constant 13 : i32
    %654 = vector.broadcast %c13_i32 : i32 to vector<2x16x1xi32>
    %655 = arith.cmpi sge, %26, %654 : vector<2x16x1xi32>
    %656 = vector.extract_strided_slice %651 {offsets = [0, 0, 13], sizes = [2, 16, 1], strides = [1, 1, 1]} : vector<2x16x16xf32> to vector<2x16x1xf32>
    %657 = vector.broadcast %653 : vector<2x1x1xf32> to vector<2x16x1xf32>
    %658 = arith.mulf %656, %657 : vector<2x16x1xf32>
    %cst_78 = arith.constant 0.000000e+00 : f32
    %659 = vector.broadcast %cst_78 : f32 to vector<2x16x1xf32>
    %660 = arith.select %655, %658, %659 : vector<2x16x1xi1>, vector<2x16x1xf32>
    %c13_i32_79 = arith.constant 13 : i32
    %661 = vector.broadcast %c13_i32_79 : i32 to vector<2x1x16xi32>
    %662 = arith.cmpi sge, %27, %661 : vector<2x1x16xi32>
    %663 = vector.extract_strided_slice %651 {offsets = [0, 13, 0], sizes = [2, 1, 16], strides = [1, 1, 1]} : vector<2x16x16xf32> to vector<2x1x16xf32>
    %664 = vector.broadcast %653 : vector<2x1x1xf32> to vector<2x1x16xf32>
    %665 = arith.mulf %663, %664 : vector<2x1x16xf32>
    %cst_80 = arith.constant 0.000000e+00 : f32
    %666 = vector.broadcast %cst_80 : f32 to vector<2x1x16xf32>
    %667 = arith.select %662, %665, %666 : vector<2x1x16xi1>, vector<2x1x16xf32>
    %668 = vector.extract_strided_slice %636 {offsets = [0, 13, 0], sizes = [2, 1, 4], strides = [1, 1, 1]} : vector<2x16x4xf32> to vector<2x1x4xf32>
    %669 = vector.broadcast %653 : vector<2x1x1xf32> to vector<2x1x4xf32>
    %670 = arith.mulf %668, %669 : vector<2x1x4xf32>
    %671 = vector.extract_strided_slice %647 {offsets = [0, 0, 13], sizes = [2, 8, 1], strides = [1, 1, 1]} : vector<2x8x16xf32> to vector<2x8x1xf32>
    %672 = vector.broadcast %653 : vector<2x1x1xf32> to vector<2x8x1xf32>
    %673 = arith.mulf %671, %672 : vector<2x8x1xf32>
    %c13_i32_81 = arith.constant 13 : i32
    %674 = vector.broadcast %c13_i32_81 : i32 to vector<2x16x1xi32>
    %675 = arith.cmpi eq, %26, %674 : vector<2x16x1xi32>
    %676 = vector.broadcast %660 : vector<2x16x1xf32> to vector<2x16x4xf32>
    %677 = vector.broadcast %670 : vector<2x1x4xf32> to vector<2x16x4xf32>
    %678 = arith.mulf %676, %677 : vector<2x16x4xf32>
    %679 = arith.subf %636, %678 : vector<2x16x4xf32>
    %680 = vector.shape_cast %675 : vector<2x16x1xi1> to vector<2x16x1xi1>
    %681 = vector.broadcast %680 : vector<2x16x1xi1> to vector<2x16x4xi1>
    %682 = vector.shape_cast %670 : vector<2x1x4xf32> to vector<2x1x4xf32>
    %683 = vector.broadcast %682 : vector<2x1x4xf32> to vector<2x16x4xf32>
    %684 = arith.select %681, %683, %679 : vector<2x16x4xi1>, vector<2x16x4xf32>
    %c13_i32_82 = arith.constant 13 : i32
    %685 = vector.broadcast %c13_i32_82 : i32 to vector<2x1x16xi32>
    %686 = arith.cmpi eq, %27, %685 : vector<2x1x16xi32>
    %687 = vector.broadcast %667 : vector<2x1x16xf32> to vector<2x8x16xf32>
    %688 = vector.broadcast %673 : vector<2x8x1xf32> to vector<2x8x16xf32>
    %689 = arith.mulf %687, %688 : vector<2x8x16xf32>
    %690 = arith.subf %647, %689 : vector<2x8x16xf32>
    %691 = vector.shape_cast %686 : vector<2x1x16xi1> to vector<2x1x16xi1>
    %692 = vector.broadcast %691 : vector<2x1x16xi1> to vector<2x8x16xi1>
    %693 = vector.shape_cast %673 : vector<2x8x1xf32> to vector<2x8x1xf32>
    %694 = vector.broadcast %693 : vector<2x8x1xf32> to vector<2x8x16xf32>
    %695 = arith.select %692, %694, %690 : vector<2x8x16xi1>, vector<2x8x16xf32>
    %696 = vector.broadcast %660 : vector<2x16x1xf32> to vector<2x16x16xf32>
    %697 = vector.broadcast %667 : vector<2x1x16xf32> to vector<2x16x16xf32>
    %698 = arith.mulf %696, %697 : vector<2x16x16xf32>
    %699 = arith.subf %651, %698 : vector<2x16x16xf32>
    %700 = vector.extract_strided_slice %699 {offsets = [0, 14, 14], sizes = [2, 1, 1], strides = [1, 1, 1]} : vector<2x16x16xf32> to vector<2x1x1xf32>
    %701 = math.rsqrt %700 : vector<2x1x1xf32>
    %c14_i32 = arith.constant 14 : i32
    %702 = vector.broadcast %c14_i32 : i32 to vector<2x16x1xi32>
    %703 = arith.cmpi sge, %26, %702 : vector<2x16x1xi32>
    %704 = vector.extract_strided_slice %699 {offsets = [0, 0, 14], sizes = [2, 16, 1], strides = [1, 1, 1]} : vector<2x16x16xf32> to vector<2x16x1xf32>
    %705 = vector.broadcast %701 : vector<2x1x1xf32> to vector<2x16x1xf32>
    %706 = arith.mulf %704, %705 : vector<2x16x1xf32>
    %cst_83 = arith.constant 0.000000e+00 : f32
    %707 = vector.broadcast %cst_83 : f32 to vector<2x16x1xf32>
    %708 = arith.select %703, %706, %707 : vector<2x16x1xi1>, vector<2x16x1xf32>
    %c14_i32_84 = arith.constant 14 : i32
    %709 = vector.broadcast %c14_i32_84 : i32 to vector<2x1x16xi32>
    %710 = arith.cmpi sge, %27, %709 : vector<2x1x16xi32>
    %711 = vector.extract_strided_slice %699 {offsets = [0, 14, 0], sizes = [2, 1, 16], strides = [1, 1, 1]} : vector<2x16x16xf32> to vector<2x1x16xf32>
    %712 = vector.broadcast %701 : vector<2x1x1xf32> to vector<2x1x16xf32>
    %713 = arith.mulf %711, %712 : vector<2x1x16xf32>
    %cst_85 = arith.constant 0.000000e+00 : f32
    %714 = vector.broadcast %cst_85 : f32 to vector<2x1x16xf32>
    %715 = arith.select %710, %713, %714 : vector<2x1x16xi1>, vector<2x1x16xf32>
    %716 = vector.extract_strided_slice %684 {offsets = [0, 14, 0], sizes = [2, 1, 4], strides = [1, 1, 1]} : vector<2x16x4xf32> to vector<2x1x4xf32>
    %717 = vector.broadcast %701 : vector<2x1x1xf32> to vector<2x1x4xf32>
    %718 = arith.mulf %716, %717 : vector<2x1x4xf32>
    %719 = vector.extract_strided_slice %695 {offsets = [0, 0, 14], sizes = [2, 8, 1], strides = [1, 1, 1]} : vector<2x8x16xf32> to vector<2x8x1xf32>
    %720 = vector.broadcast %701 : vector<2x1x1xf32> to vector<2x8x1xf32>
    %721 = arith.mulf %719, %720 : vector<2x8x1xf32>
    %c14_i32_86 = arith.constant 14 : i32
    %722 = vector.broadcast %c14_i32_86 : i32 to vector<2x16x1xi32>
    %723 = arith.cmpi eq, %26, %722 : vector<2x16x1xi32>
    %724 = vector.broadcast %708 : vector<2x16x1xf32> to vector<2x16x4xf32>
    %725 = vector.broadcast %718 : vector<2x1x4xf32> to vector<2x16x4xf32>
    %726 = arith.mulf %724, %725 : vector<2x16x4xf32>
    %727 = arith.subf %684, %726 : vector<2x16x4xf32>
    %728 = vector.shape_cast %723 : vector<2x16x1xi1> to vector<2x16x1xi1>
    %729 = vector.broadcast %728 : vector<2x16x1xi1> to vector<2x16x4xi1>
    %730 = vector.shape_cast %718 : vector<2x1x4xf32> to vector<2x1x4xf32>
    %731 = vector.broadcast %730 : vector<2x1x4xf32> to vector<2x16x4xf32>
    %732 = arith.select %729, %731, %727 : vector<2x16x4xi1>, vector<2x16x4xf32>
    %c14_i32_87 = arith.constant 14 : i32
    %733 = vector.broadcast %c14_i32_87 : i32 to vector<2x1x16xi32>
    %734 = arith.cmpi eq, %27, %733 : vector<2x1x16xi32>
    %735 = vector.broadcast %715 : vector<2x1x16xf32> to vector<2x8x16xf32>
    %736 = vector.broadcast %721 : vector<2x8x1xf32> to vector<2x8x16xf32>
    %737 = arith.mulf %735, %736 : vector<2x8x16xf32>
    %738 = arith.subf %695, %737 : vector<2x8x16xf32>
    %739 = vector.shape_cast %734 : vector<2x1x16xi1> to vector<2x1x16xi1>
    %740 = vector.broadcast %739 : vector<2x1x16xi1> to vector<2x8x16xi1>
    %741 = vector.shape_cast %721 : vector<2x8x1xf32> to vector<2x8x1xf32>
    %742 = vector.broadcast %741 : vector<2x8x1xf32> to vector<2x8x16xf32>
    %743 = arith.select %740, %742, %738 : vector<2x8x16xi1>, vector<2x8x16xf32>
    %744 = vector.broadcast %708 : vector<2x16x1xf32> to vector<2x16x16xf32>
    %745 = vector.broadcast %715 : vector<2x1x16xf32> to vector<2x16x16xf32>
    %746 = arith.mulf %744, %745 : vector<2x16x16xf32>
    %747 = arith.subf %699, %746 : vector<2x16x16xf32>
    %748 = vector.extract_strided_slice %747 {offsets = [0, 15, 15], sizes = [2, 1, 1], strides = [1, 1, 1]} : vector<2x16x16xf32> to vector<2x1x1xf32>
    %749 = math.rsqrt %748 : vector<2x1x1xf32>
    %c15_i32 = arith.constant 15 : i32
    %750 = vector.broadcast %c15_i32 : i32 to vector<2x16x1xi32>
    %751 = arith.cmpi sge, %26, %750 : vector<2x16x1xi32>
    %752 = vector.extract_strided_slice %747 {offsets = [0, 0, 15], sizes = [2, 16, 1], strides = [1, 1, 1]} : vector<2x16x16xf32> to vector<2x16x1xf32>
    %753 = vector.broadcast %749 : vector<2x1x1xf32> to vector<2x16x1xf32>
    %754 = arith.mulf %752, %753 : vector<2x16x1xf32>
    %cst_88 = arith.constant 0.000000e+00 : f32
    %755 = vector.broadcast %cst_88 : f32 to vector<2x16x1xf32>
    %756 = arith.select %751, %754, %755 : vector<2x16x1xi1>, vector<2x16x1xf32>
    %c15_i32_89 = arith.constant 15 : i32
    %757 = vector.broadcast %c15_i32_89 : i32 to vector<2x1x16xi32>
    %758 = arith.cmpi sge, %27, %757 : vector<2x1x16xi32>
    %759 = vector.extract_strided_slice %747 {offsets = [0, 15, 0], sizes = [2, 1, 16], strides = [1, 1, 1]} : vector<2x16x16xf32> to vector<2x1x16xf32>
    %760 = vector.broadcast %749 : vector<2x1x1xf32> to vector<2x1x16xf32>
    %761 = arith.mulf %759, %760 : vector<2x1x16xf32>
    %cst_90 = arith.constant 0.000000e+00 : f32
    %762 = vector.broadcast %cst_90 : f32 to vector<2x1x16xf32>
    %763 = arith.select %758, %761, %762 : vector<2x1x16xi1>, vector<2x1x16xf32>
    %764 = vector.extract_strided_slice %732 {offsets = [0, 15, 0], sizes = [2, 1, 4], strides = [1, 1, 1]} : vector<2x16x4xf32> to vector<2x1x4xf32>
    %765 = vector.broadcast %749 : vector<2x1x1xf32> to vector<2x1x4xf32>
    %766 = arith.mulf %764, %765 : vector<2x1x4xf32>
    %767 = vector.extract_strided_slice %743 {offsets = [0, 0, 15], sizes = [2, 8, 1], strides = [1, 1, 1]} : vector<2x8x16xf32> to vector<2x8x1xf32>
    %768 = vector.broadcast %749 : vector<2x1x1xf32> to vector<2x8x1xf32>
    %769 = arith.mulf %767, %768 : vector<2x8x1xf32>
    %c15_i32_91 = arith.constant 15 : i32
    %770 = vector.broadcast %c15_i32_91 : i32 to vector<2x16x1xi32>
    %771 = arith.cmpi eq, %26, %770 : vector<2x16x1xi32>
    %772 = vector.broadcast %756 : vector<2x16x1xf32> to vector<2x16x4xf32>
    %773 = vector.broadcast %766 : vector<2x1x4xf32> to vector<2x16x4xf32>
    %774 = arith.mulf %772, %773 : vector<2x16x4xf32>
    %775 = arith.subf %732, %774 : vector<2x16x4xf32>
    %776 = vector.shape_cast %771 : vector<2x16x1xi1> to vector<2x16x1xi1>
    %777 = vector.broadcast %776 : vector<2x16x1xi1> to vector<2x16x4xi1>
    %778 = vector.shape_cast %766 : vector<2x1x4xf32> to vector<2x1x4xf32>
    %779 = vector.broadcast %778 : vector<2x1x4xf32> to vector<2x16x4xf32>
    %780 = arith.select %777, %779, %775 : vector<2x16x4xi1>, vector<2x16x4xf32>
    %c15_i32_92 = arith.constant 15 : i32
    %781 = vector.broadcast %c15_i32_92 : i32 to vector<2x1x16xi32>
    %782 = arith.cmpi eq, %27, %781 : vector<2x1x16xi32>
    %783 = vector.broadcast %763 : vector<2x1x16xf32> to vector<2x8x16xf32>
    %784 = vector.broadcast %769 : vector<2x8x1xf32> to vector<2x8x16xf32>
    %785 = arith.mulf %783, %784 : vector<2x8x16xf32>
    %786 = arith.subf %743, %785 : vector<2x8x16xf32>
    %787 = vector.shape_cast %782 : vector<2x1x16xi1> to vector<2x1x16xi1>
    %788 = vector.broadcast %787 : vector<2x1x16xi1> to vector<2x8x16xi1>
    %789 = vector.shape_cast %769 : vector<2x8x1xf32> to vector<2x8x1xf32>
    %790 = vector.broadcast %789 : vector<2x8x1xf32> to vector<2x8x16xf32>
    %791 = arith.select %788, %790, %786 : vector<2x8x16xi1>, vector<2x8x16xf32>
    "tpu.trace_start"() <{level = 10 : i32, message = "btn,bnd->btd"}> : () -> ()
    %cst_93 = arith.constant dense<0.000000e+00> : vector<2x8x4xf32>
    %792 = tpu.matmul %791, %780, %cst_93 {dimension_numbers = #tpu.dot_dimension_numbers<[2], [1], [1], [2], [0, 0, 0, 1, 1, 2], [0], [0]>} : vector<2x8x16xf32>, vector<2x16x4xf32>, vector<2x8x4xf32> -> vector<2x8x4xf32>
    "tpu.trace_stop"() : () -> ()
    %793 = arith.mulf %791, %791 : vector<2x8x16xf32>
    %cst_94 = arith.constant dense<0.000000e+00> : vector<2x8xf32>
    %794 = vector.multi_reduction <add>, %793, %cst_94 [2] : vector<2x8x16xf32> to vector<2x8xf32>
    %795 = vector.shape_cast %794 : vector<2x8xf32> to vector<2x8x1xf32>
    %cst_95 = arith.constant 1.100000e+00 : f32
    %796 = vector.broadcast %cst_95 : f32 to vector<2x8x1xf32>
    %797 = arith.subf %796, %795 : vector<2x8x1xf32>
    %c0_96 = arith.constant 0 : index
    %c0_97 = arith.constant 0 : index
    %798 = vector.load %arg4[%c0_96, %c0_97] : memref<4x384xbf16, #tpu.memory_space<vmem>>, vector<4x384xbf16>
    %799 = vector.shape_cast %798 : vector<4x384xbf16> to vector<1x4x384xbf16>
    %800 = vector.broadcast %799 : vector<1x4x384xbf16> to vector<2x4x384xbf16>
    %801 = arith.truncf %792 : vector<2x8x4xf32> to vector<2x8x4xbf16>
    "tpu.trace_start"() <{level = 10 : i32, message = "btd,bdg->btg"}> : () -> ()
    %cst_98 = arith.constant dense<0.000000e+00> : vector<2x8x384xf32>
    %802 = tpu.matmul %801, %800, %cst_98 {dimension_numbers = #tpu.dot_dimension_numbers<[2], [1], [1], [2], [0, 0, 0, 1, 1, 2], [0], [0]>} : vector<2x8x4xbf16>, vector<2x4x384xbf16>, vector<2x8x384xf32> -> vector<2x8x384xf32>
    "tpu.trace_stop"() : () -> ()
    %c0_99 = arith.constant 0 : index
    %c0_100 = arith.constant 0 : index
    %803 = vector.load %arg5[%c0_99, %c0_100] : memref<1x384xf32, #tpu.memory_space<vmem>>, vector<1x384xf32>
    %804 = vector.shape_cast %803 : vector<1x384xf32> to vector<1x1x384xf32>
    %805 = vector.broadcast %797 : vector<2x8x1xf32> to vector<2x8x384xf32>
    %806 = vector.broadcast %804 : vector<1x1x384xf32> to vector<2x8x384xf32>
    %807 = arith.mulf %805, %806 : vector<2x8x384xf32>
    %808 = arith.addf %802, %807 : vector<2x8x384xf32>
    %c0_101 = arith.constant 0 : index
    %c0_102 = arith.constant 0 : index
    %809 = vector.load %arg6[%c0_101, %c0_102] : memref<1x384xf32, #tpu.memory_space<vmem>>, vector<1x384xf32>
    %810 = vector.shape_cast %809 : vector<1x384xf32> to vector<1x1x384xf32>
    %811 = vector.broadcast %810 : vector<1x1x384xf32> to vector<2x8x384xf32>
    %812 = arith.addf %808, %811 : vector<2x8x384xf32>
    %813 = vector.extract_strided_slice %812 {offsets = [0, 0, 0], sizes = [2, 8, 128], strides = [1, 1, 1]} : vector<2x8x384xf32> to vector<2x8x128xf32>
    %814 = vector.extract_strided_slice %812 {offsets = [0, 0, 128], sizes = [2, 8, 128], strides = [1, 1, 1]} : vector<2x8x384xf32> to vector<2x8x128xf32>
    %815 = vector.extract_strided_slice %812 {offsets = [0, 0, 256], sizes = [2, 8, 128], strides = [1, 1, 1]} : vector<2x8x384xf32> to vector<2x8x128xf32>
    %c0_103 = arith.constant 0 : index
    %c0_104 = arith.constant 0 : index
    %816 = vector.load %arg8[%c0_103, %c0_104] : memref<128x384xbf16, #tpu.memory_space<vmem>>, vector<128x384xbf16>
    %c0_105 = arith.constant 0 : index
    %c0_106 = arith.constant 0 : index
    %817 = vector.load %arg7[%c0_105, %c0_106] : memref<1x128xf32, #tpu.memory_space<vmem>>, vector<1x128xf32>
    %cst_107 = arith.constant 0.000000e+00 : f32
    %818 = vector.broadcast %cst_107 : f32 to vector<2x128xf32>
    %819 = arith.truncf %818 : vector<2x128xf32> to vector<2x128xbf16>
    %cst_108 = arith.constant dense<0.000000e+00> : vector<2x384xf32>
    %820 = tpu.matmul %819, %816, %cst_108 {dimension_numbers = #tpu.dot_dimension_numbers<[1], [0], [0], [1], [0, 0, 1, 1], [], []>} : vector<2x128xbf16>, vector<128x384xbf16>, vector<2x384xf32> -> vector<2x384xf32>
    %821 = vector.extract_strided_slice %813 {offsets = [0, 0, 0], sizes = [2, 1, 128], strides = [1, 1, 1]} : vector<2x8x128xf32> to vector<2x1x128xf32>
    %822 = vector.shape_cast %821 : vector<2x1x128xf32> to vector<2x128xf32>
    %823 = vector.extract_strided_slice %820 {offsets = [0, 0], sizes = [2, 128], strides = [1, 1]} : vector<2x384xf32> to vector<2x128xf32>
    %824 = arith.addf %822, %823 : vector<2x128xf32>
    %825 = arith.negf %824 : vector<2x128xf32>
    %826 = math.exp %825 : vector<2x128xf32>
    %cst_109 = arith.constant 1.000000e+00 : f32
    %827 = vector.broadcast %cst_109 : f32 to vector<2x128xf32>
    %828 = arith.addf %827, %826 : vector<2x128xf32>
    %829 = arith.divf %827, %828 : vector<2x128xf32>
    %830 = vector.extract_strided_slice %814 {offsets = [0, 0, 0], sizes = [2, 1, 128], strides = [1, 1, 1]} : vector<2x8x128xf32> to vector<2x1x128xf32>
    %831 = vector.shape_cast %830 : vector<2x1x128xf32> to vector<2x128xf32>
    %832 = vector.extract_strided_slice %820 {offsets = [0, 128], sizes = [2, 128], strides = [1, 1]} : vector<2x384xf32> to vector<2x128xf32>
    %833 = arith.addf %831, %832 : vector<2x128xf32>
    %834 = arith.negf %833 : vector<2x128xf32>
    %835 = math.exp %834 : vector<2x128xf32>
    %cst_110 = arith.constant 1.000000e+00 : f32
    %836 = vector.broadcast %cst_110 : f32 to vector<2x128xf32>
    %837 = arith.addf %836, %835 : vector<2x128xf32>
    %838 = arith.divf %836, %837 : vector<2x128xf32>
    %839 = vector.extract_strided_slice %815 {offsets = [0, 0, 0], sizes = [2, 1, 128], strides = [1, 1, 1]} : vector<2x8x128xf32> to vector<2x1x128xf32>
    %840 = vector.shape_cast %839 : vector<2x1x128xf32> to vector<2x128xf32>
    %841 = vector.extract_strided_slice %820 {offsets = [0, 256], sizes = [2, 128], strides = [1, 1]} : vector<2x384xf32> to vector<2x128xf32>
    %842 = vector.broadcast %817 : vector<1x128xf32> to vector<2x128xf32>
    %843 = arith.addf %841, %842 : vector<2x128xf32>
    %844 = arith.mulf %829, %843 : vector<2x128xf32>
    %845 = arith.addf %840, %844 : vector<2x128xf32>
    %846 = math.tanh %845 : vector<2x128xf32>
    %cst_111 = arith.constant 1.000000e+00 : f32
    %847 = vector.broadcast %cst_111 : f32 to vector<2x128xf32>
    %848 = arith.subf %847, %838 : vector<2x128xf32>
    %849 = arith.mulf %848, %846 : vector<2x128xf32>
    %850 = arith.mulf %838, %818 : vector<2x128xf32>
    %851 = arith.addf %849, %850 : vector<2x128xf32>
    %852 = arith.truncf %851 : vector<2x128xf32> to vector<2x128xbf16>
    %cst_112 = arith.constant dense<0.000000e+00> : vector<2x384xf32>
    %853 = tpu.matmul %852, %816, %cst_112 {dimension_numbers = #tpu.dot_dimension_numbers<[1], [0], [0], [1], [0, 0, 1, 1], [], []>} : vector<2x128xbf16>, vector<128x384xbf16>, vector<2x384xf32> -> vector<2x384xf32>
    %854 = vector.extract_strided_slice %813 {offsets = [0, 1, 0], sizes = [2, 1, 128], strides = [1, 1, 1]} : vector<2x8x128xf32> to vector<2x1x128xf32>
    %855 = vector.shape_cast %854 : vector<2x1x128xf32> to vector<2x128xf32>
    %856 = vector.extract_strided_slice %853 {offsets = [0, 0], sizes = [2, 128], strides = [1, 1]} : vector<2x384xf32> to vector<2x128xf32>
    %857 = arith.addf %855, %856 : vector<2x128xf32>
    %858 = arith.negf %857 : vector<2x128xf32>
    %859 = math.exp %858 : vector<2x128xf32>
    %cst_113 = arith.constant 1.000000e+00 : f32
    %860 = vector.broadcast %cst_113 : f32 to vector<2x128xf32>
    %861 = arith.addf %860, %859 : vector<2x128xf32>
    %862 = arith.divf %860, %861 : vector<2x128xf32>
    %863 = vector.extract_strided_slice %814 {offsets = [0, 1, 0], sizes = [2, 1, 128], strides = [1, 1, 1]} : vector<2x8x128xf32> to vector<2x1x128xf32>
    %864 = vector.shape_cast %863 : vector<2x1x128xf32> to vector<2x128xf32>
    %865 = vector.extract_strided_slice %853 {offsets = [0, 128], sizes = [2, 128], strides = [1, 1]} : vector<2x384xf32> to vector<2x128xf32>
    %866 = arith.addf %864, %865 : vector<2x128xf32>
    %867 = arith.negf %866 : vector<2x128xf32>
    %868 = math.exp %867 : vector<2x128xf32>
    %cst_114 = arith.constant 1.000000e+00 : f32
    %869 = vector.broadcast %cst_114 : f32 to vector<2x128xf32>
    %870 = arith.addf %869, %868 : vector<2x128xf32>
    %871 = arith.divf %869, %870 : vector<2x128xf32>
    %872 = vector.extract_strided_slice %815 {offsets = [0, 1, 0], sizes = [2, 1, 128], strides = [1, 1, 1]} : vector<2x8x128xf32> to vector<2x1x128xf32>
    %873 = vector.shape_cast %872 : vector<2x1x128xf32> to vector<2x128xf32>
    %874 = vector.extract_strided_slice %853 {offsets = [0, 256], sizes = [2, 128], strides = [1, 1]} : vector<2x384xf32> to vector<2x128xf32>
    %875 = vector.broadcast %817 : vector<1x128xf32> to vector<2x128xf32>
    %876 = arith.addf %874, %875 : vector<2x128xf32>
    %877 = arith.mulf %862, %876 : vector<2x128xf32>
    %878 = arith.addf %873, %877 : vector<2x128xf32>
    %879 = math.tanh %878 : vector<2x128xf32>
    %cst_115 = arith.constant 1.000000e+00 : f32
    %880 = vector.broadcast %cst_115 : f32 to vector<2x128xf32>
    %881 = arith.subf %880, %871 : vector<2x128xf32>
    %882 = arith.mulf %881, %879 : vector<2x128xf32>
    %883 = arith.mulf %871, %851 : vector<2x128xf32>
    %884 = arith.addf %882, %883 : vector<2x128xf32>
    %885 = arith.truncf %884 : vector<2x128xf32> to vector<2x128xbf16>
    %cst_116 = arith.constant dense<0.000000e+00> : vector<2x384xf32>
    %886 = tpu.matmul %885, %816, %cst_116 {dimension_numbers = #tpu.dot_dimension_numbers<[1], [0], [0], [1], [0, 0, 1, 1], [], []>} : vector<2x128xbf16>, vector<128x384xbf16>, vector<2x384xf32> -> vector<2x384xf32>
    %887 = vector.extract_strided_slice %813 {offsets = [0, 2, 0], sizes = [2, 1, 128], strides = [1, 1, 1]} : vector<2x8x128xf32> to vector<2x1x128xf32>
    %888 = vector.shape_cast %887 : vector<2x1x128xf32> to vector<2x128xf32>
    %889 = vector.extract_strided_slice %886 {offsets = [0, 0], sizes = [2, 128], strides = [1, 1]} : vector<2x384xf32> to vector<2x128xf32>
    %890 = arith.addf %888, %889 : vector<2x128xf32>
    %891 = arith.negf %890 : vector<2x128xf32>
    %892 = math.exp %891 : vector<2x128xf32>
    %cst_117 = arith.constant 1.000000e+00 : f32
    %893 = vector.broadcast %cst_117 : f32 to vector<2x128xf32>
    %894 = arith.addf %893, %892 : vector<2x128xf32>
    %895 = arith.divf %893, %894 : vector<2x128xf32>
    %896 = vector.extract_strided_slice %814 {offsets = [0, 2, 0], sizes = [2, 1, 128], strides = [1, 1, 1]} : vector<2x8x128xf32> to vector<2x1x128xf32>
    %897 = vector.shape_cast %896 : vector<2x1x128xf32> to vector<2x128xf32>
    %898 = vector.extract_strided_slice %886 {offsets = [0, 128], sizes = [2, 128], strides = [1, 1]} : vector<2x384xf32> to vector<2x128xf32>
    %899 = arith.addf %897, %898 : vector<2x128xf32>
    %900 = arith.negf %899 : vector<2x128xf32>
    %901 = math.exp %900 : vector<2x128xf32>
    %cst_118 = arith.constant 1.000000e+00 : f32
    %902 = vector.broadcast %cst_118 : f32 to vector<2x128xf32>
    %903 = arith.addf %902, %901 : vector<2x128xf32>
    %904 = arith.divf %902, %903 : vector<2x128xf32>
    %905 = vector.extract_strided_slice %815 {offsets = [0, 2, 0], sizes = [2, 1, 128], strides = [1, 1, 1]} : vector<2x8x128xf32> to vector<2x1x128xf32>
    %906 = vector.shape_cast %905 : vector<2x1x128xf32> to vector<2x128xf32>
    %907 = vector.extract_strided_slice %886 {offsets = [0, 256], sizes = [2, 128], strides = [1, 1]} : vector<2x384xf32> to vector<2x128xf32>
    %908 = vector.broadcast %817 : vector<1x128xf32> to vector<2x128xf32>
    %909 = arith.addf %907, %908 : vector<2x128xf32>
    %910 = arith.mulf %895, %909 : vector<2x128xf32>
    %911 = arith.addf %906, %910 : vector<2x128xf32>
    %912 = math.tanh %911 : vector<2x128xf32>
    %cst_119 = arith.constant 1.000000e+00 : f32
    %913 = vector.broadcast %cst_119 : f32 to vector<2x128xf32>
    %914 = arith.subf %913, %904 : vector<2x128xf32>
    %915 = arith.mulf %914, %912 : vector<2x128xf32>
    %916 = arith.mulf %904, %884 : vector<2x128xf32>
    %917 = arith.addf %915, %916 : vector<2x128xf32>
    %918 = arith.truncf %917 : vector<2x128xf32> to vector<2x128xbf16>
    %cst_120 = arith.constant dense<0.000000e+00> : vector<2x384xf32>
    %919 = tpu.matmul %918, %816, %cst_120 {dimension_numbers = #tpu.dot_dimension_numbers<[1], [0], [0], [1], [0, 0, 1, 1], [], []>} : vector<2x128xbf16>, vector<128x384xbf16>, vector<2x384xf32> -> vector<2x384xf32>
    %920 = vector.extract_strided_slice %813 {offsets = [0, 3, 0], sizes = [2, 1, 128], strides = [1, 1, 1]} : vector<2x8x128xf32> to vector<2x1x128xf32>
    %921 = vector.shape_cast %920 : vector<2x1x128xf32> to vector<2x128xf32>
    %922 = vector.extract_strided_slice %919 {offsets = [0, 0], sizes = [2, 128], strides = [1, 1]} : vector<2x384xf32> to vector<2x128xf32>
    %923 = arith.addf %921, %922 : vector<2x128xf32>
    %924 = arith.negf %923 : vector<2x128xf32>
    %925 = math.exp %924 : vector<2x128xf32>
    %cst_121 = arith.constant 1.000000e+00 : f32
    %926 = vector.broadcast %cst_121 : f32 to vector<2x128xf32>
    %927 = arith.addf %926, %925 : vector<2x128xf32>
    %928 = arith.divf %926, %927 : vector<2x128xf32>
    %929 = vector.extract_strided_slice %814 {offsets = [0, 3, 0], sizes = [2, 1, 128], strides = [1, 1, 1]} : vector<2x8x128xf32> to vector<2x1x128xf32>
    %930 = vector.shape_cast %929 : vector<2x1x128xf32> to vector<2x128xf32>
    %931 = vector.extract_strided_slice %919 {offsets = [0, 128], sizes = [2, 128], strides = [1, 1]} : vector<2x384xf32> to vector<2x128xf32>
    %932 = arith.addf %930, %931 : vector<2x128xf32>
    %933 = arith.negf %932 : vector<2x128xf32>
    %934 = math.exp %933 : vector<2x128xf32>
    %cst_122 = arith.constant 1.000000e+00 : f32
    %935 = vector.broadcast %cst_122 : f32 to vector<2x128xf32>
    %936 = arith.addf %935, %934 : vector<2x128xf32>
    %937 = arith.divf %935, %936 : vector<2x128xf32>
    %938 = vector.extract_strided_slice %815 {offsets = [0, 3, 0], sizes = [2, 1, 128], strides = [1, 1, 1]} : vector<2x8x128xf32> to vector<2x1x128xf32>
    %939 = vector.shape_cast %938 : vector<2x1x128xf32> to vector<2x128xf32>
    %940 = vector.extract_strided_slice %919 {offsets = [0, 256], sizes = [2, 128], strides = [1, 1]} : vector<2x384xf32> to vector<2x128xf32>
    %941 = vector.broadcast %817 : vector<1x128xf32> to vector<2x128xf32>
    %942 = arith.addf %940, %941 : vector<2x128xf32>
    %943 = arith.mulf %928, %942 : vector<2x128xf32>
    %944 = arith.addf %939, %943 : vector<2x128xf32>
    %945 = math.tanh %944 : vector<2x128xf32>
    %cst_123 = arith.constant 1.000000e+00 : f32
    %946 = vector.broadcast %cst_123 : f32 to vector<2x128xf32>
    %947 = arith.subf %946, %937 : vector<2x128xf32>
    %948 = arith.mulf %947, %945 : vector<2x128xf32>
    %949 = arith.mulf %937, %917 : vector<2x128xf32>
    %950 = arith.addf %948, %949 : vector<2x128xf32>
    %951 = arith.truncf %950 : vector<2x128xf32> to vector<2x128xbf16>
    %cst_124 = arith.constant dense<0.000000e+00> : vector<2x384xf32>
    %952 = tpu.matmul %951, %816, %cst_124 {dimension_numbers = #tpu.dot_dimension_numbers<[1], [0], [0], [1], [0, 0, 1, 1], [], []>} : vector<2x128xbf16>, vector<128x384xbf16>, vector<2x384xf32> -> vector<2x384xf32>
    %953 = vector.extract_strided_slice %813 {offsets = [0, 4, 0], sizes = [2, 1, 128], strides = [1, 1, 1]} : vector<2x8x128xf32> to vector<2x1x128xf32>
    %954 = vector.shape_cast %953 : vector<2x1x128xf32> to vector<2x128xf32>
    %955 = vector.extract_strided_slice %952 {offsets = [0, 0], sizes = [2, 128], strides = [1, 1]} : vector<2x384xf32> to vector<2x128xf32>
    %956 = arith.addf %954, %955 : vector<2x128xf32>
    %957 = arith.negf %956 : vector<2x128xf32>
    %958 = math.exp %957 : vector<2x128xf32>
    %cst_125 = arith.constant 1.000000e+00 : f32
    %959 = vector.broadcast %cst_125 : f32 to vector<2x128xf32>
    %960 = arith.addf %959, %958 : vector<2x128xf32>
    %961 = arith.divf %959, %960 : vector<2x128xf32>
    %962 = vector.extract_strided_slice %814 {offsets = [0, 4, 0], sizes = [2, 1, 128], strides = [1, 1, 1]} : vector<2x8x128xf32> to vector<2x1x128xf32>
    %963 = vector.shape_cast %962 : vector<2x1x128xf32> to vector<2x128xf32>
    %964 = vector.extract_strided_slice %952 {offsets = [0, 128], sizes = [2, 128], strides = [1, 1]} : vector<2x384xf32> to vector<2x128xf32>
    %965 = arith.addf %963, %964 : vector<2x128xf32>
    %966 = arith.negf %965 : vector<2x128xf32>
    %967 = math.exp %966 : vector<2x128xf32>
    %cst_126 = arith.constant 1.000000e+00 : f32
    %968 = vector.broadcast %cst_126 : f32 to vector<2x128xf32>
    %969 = arith.addf %968, %967 : vector<2x128xf32>
    %970 = arith.divf %968, %969 : vector<2x128xf32>
    %971 = vector.extract_strided_slice %815 {offsets = [0, 4, 0], sizes = [2, 1, 128], strides = [1, 1, 1]} : vector<2x8x128xf32> to vector<2x1x128xf32>
    %972 = vector.shape_cast %971 : vector<2x1x128xf32> to vector<2x128xf32>
    %973 = vector.extract_strided_slice %952 {offsets = [0, 256], sizes = [2, 128], strides = [1, 1]} : vector<2x384xf32> to vector<2x128xf32>
    %974 = vector.broadcast %817 : vector<1x128xf32> to vector<2x128xf32>
    %975 = arith.addf %973, %974 : vector<2x128xf32>
    %976 = arith.mulf %961, %975 : vector<2x128xf32>
    %977 = arith.addf %972, %976 : vector<2x128xf32>
    %978 = math.tanh %977 : vector<2x128xf32>
    %cst_127 = arith.constant 1.000000e+00 : f32
    %979 = vector.broadcast %cst_127 : f32 to vector<2x128xf32>
    %980 = arith.subf %979, %970 : vector<2x128xf32>
    %981 = arith.mulf %980, %978 : vector<2x128xf32>
    %982 = arith.mulf %970, %950 : vector<2x128xf32>
    %983 = arith.addf %981, %982 : vector<2x128xf32>
    %984 = arith.truncf %983 : vector<2x128xf32> to vector<2x128xbf16>
    %cst_128 = arith.constant dense<0.000000e+00> : vector<2x384xf32>
    %985 = tpu.matmul %984, %816, %cst_128 {dimension_numbers = #tpu.dot_dimension_numbers<[1], [0], [0], [1], [0, 0, 1, 1], [], []>} : vector<2x128xbf16>, vector<128x384xbf16>, vector<2x384xf32> -> vector<2x384xf32>
    %986 = vector.extract_strided_slice %813 {offsets = [0, 5, 0], sizes = [2, 1, 128], strides = [1, 1, 1]} : vector<2x8x128xf32> to vector<2x1x128xf32>
    %987 = vector.shape_cast %986 : vector<2x1x128xf32> to vector<2x128xf32>
    %988 = vector.extract_strided_slice %985 {offsets = [0, 0], sizes = [2, 128], strides = [1, 1]} : vector<2x384xf32> to vector<2x128xf32>
    %989 = arith.addf %987, %988 : vector<2x128xf32>
    %990 = arith.negf %989 : vector<2x128xf32>
    %991 = math.exp %990 : vector<2x128xf32>
    %cst_129 = arith.constant 1.000000e+00 : f32
    %992 = vector.broadcast %cst_129 : f32 to vector<2x128xf32>
    %993 = arith.addf %992, %991 : vector<2x128xf32>
    %994 = arith.divf %992, %993 : vector<2x128xf32>
    %995 = vector.extract_strided_slice %814 {offsets = [0, 5, 0], sizes = [2, 1, 128], strides = [1, 1, 1]} : vector<2x8x128xf32> to vector<2x1x128xf32>
    %996 = vector.shape_cast %995 : vector<2x1x128xf32> to vector<2x128xf32>
    %997 = vector.extract_strided_slice %985 {offsets = [0, 128], sizes = [2, 128], strides = [1, 1]} : vector<2x384xf32> to vector<2x128xf32>
    %998 = arith.addf %996, %997 : vector<2x128xf32>
    %999 = arith.negf %998 : vector<2x128xf32>
    %1000 = math.exp %999 : vector<2x128xf32>
    %cst_130 = arith.constant 1.000000e+00 : f32
    %1001 = vector.broadcast %cst_130 : f32 to vector<2x128xf32>
    %1002 = arith.addf %1001, %1000 : vector<2x128xf32>
    %1003 = arith.divf %1001, %1002 : vector<2x128xf32>
    %1004 = vector.extract_strided_slice %815 {offsets = [0, 5, 0], sizes = [2, 1, 128], strides = [1, 1, 1]} : vector<2x8x128xf32> to vector<2x1x128xf32>
    %1005 = vector.shape_cast %1004 : vector<2x1x128xf32> to vector<2x128xf32>
    %1006 = vector.extract_strided_slice %985 {offsets = [0, 256], sizes = [2, 128], strides = [1, 1]} : vector<2x384xf32> to vector<2x128xf32>
    %1007 = vector.broadcast %817 : vector<1x128xf32> to vector<2x128xf32>
    %1008 = arith.addf %1006, %1007 : vector<2x128xf32>
    %1009 = arith.mulf %994, %1008 : vector<2x128xf32>
    %1010 = arith.addf %1005, %1009 : vector<2x128xf32>
    %1011 = math.tanh %1010 : vector<2x128xf32>
    %cst_131 = arith.constant 1.000000e+00 : f32
    %1012 = vector.broadcast %cst_131 : f32 to vector<2x128xf32>
    %1013 = arith.subf %1012, %1003 : vector<2x128xf32>
    %1014 = arith.mulf %1013, %1011 : vector<2x128xf32>
    %1015 = arith.mulf %1003, %983 : vector<2x128xf32>
    %1016 = arith.addf %1014, %1015 : vector<2x128xf32>
    %1017 = arith.truncf %1016 : vector<2x128xf32> to vector<2x128xbf16>
    %cst_132 = arith.constant dense<0.000000e+00> : vector<2x384xf32>
    %1018 = tpu.matmul %1017, %816, %cst_132 {dimension_numbers = #tpu.dot_dimension_numbers<[1], [0], [0], [1], [0, 0, 1, 1], [], []>} : vector<2x128xbf16>, vector<128x384xbf16>, vector<2x384xf32> -> vector<2x384xf32>
    %1019 = vector.extract_strided_slice %813 {offsets = [0, 6, 0], sizes = [2, 1, 128], strides = [1, 1, 1]} : vector<2x8x128xf32> to vector<2x1x128xf32>
    %1020 = vector.shape_cast %1019 : vector<2x1x128xf32> to vector<2x128xf32>
    %1021 = vector.extract_strided_slice %1018 {offsets = [0, 0], sizes = [2, 128], strides = [1, 1]} : vector<2x384xf32> to vector<2x128xf32>
    %1022 = arith.addf %1020, %1021 : vector<2x128xf32>
    %1023 = arith.negf %1022 : vector<2x128xf32>
    %1024 = math.exp %1023 : vector<2x128xf32>
    %cst_133 = arith.constant 1.000000e+00 : f32
    %1025 = vector.broadcast %cst_133 : f32 to vector<2x128xf32>
    %1026 = arith.addf %1025, %1024 : vector<2x128xf32>
    %1027 = arith.divf %1025, %1026 : vector<2x128xf32>
    %1028 = vector.extract_strided_slice %814 {offsets = [0, 6, 0], sizes = [2, 1, 128], strides = [1, 1, 1]} : vector<2x8x128xf32> to vector<2x1x128xf32>
    %1029 = vector.shape_cast %1028 : vector<2x1x128xf32> to vector<2x128xf32>
    %1030 = vector.extract_strided_slice %1018 {offsets = [0, 128], sizes = [2, 128], strides = [1, 1]} : vector<2x384xf32> to vector<2x128xf32>
    %1031 = arith.addf %1029, %1030 : vector<2x128xf32>
    %1032 = arith.negf %1031 : vector<2x128xf32>
    %1033 = math.exp %1032 : vector<2x128xf32>
    %cst_134 = arith.constant 1.000000e+00 : f32
    %1034 = vector.broadcast %cst_134 : f32 to vector<2x128xf32>
    %1035 = arith.addf %1034, %1033 : vector<2x128xf32>
    %1036 = arith.divf %1034, %1035 : vector<2x128xf32>
    %1037 = vector.extract_strided_slice %815 {offsets = [0, 6, 0], sizes = [2, 1, 128], strides = [1, 1, 1]} : vector<2x8x128xf32> to vector<2x1x128xf32>
    %1038 = vector.shape_cast %1037 : vector<2x1x128xf32> to vector<2x128xf32>
    %1039 = vector.extract_strided_slice %1018 {offsets = [0, 256], sizes = [2, 128], strides = [1, 1]} : vector<2x384xf32> to vector<2x128xf32>
    %1040 = vector.broadcast %817 : vector<1x128xf32> to vector<2x128xf32>
    %1041 = arith.addf %1039, %1040 : vector<2x128xf32>
    %1042 = arith.mulf %1027, %1041 : vector<2x128xf32>
    %1043 = arith.addf %1038, %1042 : vector<2x128xf32>
    %1044 = math.tanh %1043 : vector<2x128xf32>
    %cst_135 = arith.constant 1.000000e+00 : f32
    %1045 = vector.broadcast %cst_135 : f32 to vector<2x128xf32>
    %1046 = arith.subf %1045, %1036 : vector<2x128xf32>
    %1047 = arith.mulf %1046, %1044 : vector<2x128xf32>
    %1048 = arith.mulf %1036, %1016 : vector<2x128xf32>
    %1049 = arith.addf %1047, %1048 : vector<2x128xf32>
    %1050 = arith.truncf %1049 : vector<2x128xf32> to vector<2x128xbf16>
    %cst_136 = arith.constant dense<0.000000e+00> : vector<2x384xf32>
    %1051 = tpu.matmul %1050, %816, %cst_136 {dimension_numbers = #tpu.dot_dimension_numbers<[1], [0], [0], [1], [0, 0, 1, 1], [], []>} : vector<2x128xbf16>, vector<128x384xbf16>, vector<2x384xf32> -> vector<2x384xf32>
    %1052 = vector.extract_strided_slice %813 {offsets = [0, 7, 0], sizes = [2, 1, 128], strides = [1, 1, 1]} : vector<2x8x128xf32> to vector<2x1x128xf32>
    %1053 = vector.shape_cast %1052 : vector<2x1x128xf32> to vector<2x128xf32>
    %1054 = vector.extract_strided_slice %1051 {offsets = [0, 0], sizes = [2, 128], strides = [1, 1]} : vector<2x384xf32> to vector<2x128xf32>
    %1055 = arith.addf %1053, %1054 : vector<2x128xf32>
    %1056 = arith.negf %1055 : vector<2x128xf32>
    %1057 = math.exp %1056 : vector<2x128xf32>
    %cst_137 = arith.constant 1.000000e+00 : f32
    %1058 = vector.broadcast %cst_137 : f32 to vector<2x128xf32>
    %1059 = arith.addf %1058, %1057 : vector<2x128xf32>
    %1060 = arith.divf %1058, %1059 : vector<2x128xf32>
    %1061 = vector.extract_strided_slice %814 {offsets = [0, 7, 0], sizes = [2, 1, 128], strides = [1, 1, 1]} : vector<2x8x128xf32> to vector<2x1x128xf32>
    %1062 = vector.shape_cast %1061 : vector<2x1x128xf32> to vector<2x128xf32>
    %1063 = vector.extract_strided_slice %1051 {offsets = [0, 128], sizes = [2, 128], strides = [1, 1]} : vector<2x384xf32> to vector<2x128xf32>
    %1064 = arith.addf %1062, %1063 : vector<2x128xf32>
    %1065 = arith.negf %1064 : vector<2x128xf32>
    %1066 = math.exp %1065 : vector<2x128xf32>
    %cst_138 = arith.constant 1.000000e+00 : f32
    %1067 = vector.broadcast %cst_138 : f32 to vector<2x128xf32>
    %1068 = arith.addf %1067, %1066 : vector<2x128xf32>
    %1069 = arith.divf %1067, %1068 : vector<2x128xf32>
    %1070 = vector.extract_strided_slice %815 {offsets = [0, 7, 0], sizes = [2, 1, 128], strides = [1, 1, 1]} : vector<2x8x128xf32> to vector<2x1x128xf32>
    %1071 = vector.shape_cast %1070 : vector<2x1x128xf32> to vector<2x128xf32>
    %1072 = vector.extract_strided_slice %1051 {offsets = [0, 256], sizes = [2, 128], strides = [1, 1]} : vector<2x384xf32> to vector<2x128xf32>
    %1073 = vector.broadcast %817 : vector<1x128xf32> to vector<2x128xf32>
    %1074 = arith.addf %1072, %1073 : vector<2x128xf32>
    %1075 = arith.mulf %1060, %1074 : vector<2x128xf32>
    %1076 = arith.addf %1071, %1075 : vector<2x128xf32>
    %1077 = math.tanh %1076 : vector<2x128xf32>
    %cst_139 = arith.constant 1.000000e+00 : f32
    %1078 = vector.broadcast %cst_139 : f32 to vector<2x128xf32>
    %1079 = arith.subf %1078, %1069 : vector<2x128xf32>
    %1080 = arith.mulf %1079, %1077 : vector<2x128xf32>
    %1081 = arith.mulf %1069, %1049 : vector<2x128xf32>
    %1082 = arith.addf %1080, %1081 : vector<2x128xf32>
    %1083 = arith.truncf %1082 : vector<2x128xf32> to vector<2x128xbf16>
    %c0_140 = arith.constant 0 : index
    %c0_141 = arith.constant 0 : index
    %1084 = vector.load %arg9[%c0_140, %c0_141] : memref<128x2xbf16, #tpu.memory_space<vmem>>, vector<128x2xbf16>
    %cst_142 = arith.constant dense<0.000000e+00> : vector<2x2xf32>
    %1085 = tpu.matmul %1083, %1084, %cst_142 {dimension_numbers = #tpu.dot_dimension_numbers<[1], [0], [0], [1], [0, 0, 1, 1], [], []>} : vector<2x128xbf16>, vector<128x2xbf16>, vector<2x2xf32> -> vector<2x2xf32>
    %c0_143 = arith.constant 0 : index
    %c0_144 = arith.constant 0 : index
    %1086 = vector.load %arg10[%c0_143, %c0_144] : memref<1x2xf32, #tpu.memory_space<vmem>>, vector<1x2xf32>
    %1087 = vector.broadcast %1086 : vector<1x2xf32> to vector<2x2xf32>
    %1088 = arith.addf %1085, %1087 : vector<2x2xf32>
    %c0_145 = arith.constant 0 : index
    %c0_146 = arith.constant 0 : index
    %1089 = vector.load %arg11[%c0_145, %c0_146] : memref<2x2xf32, #tpu.memory_space<vmem>>, vector<2x2xf32>
    tpu.vector_store %arg11[%c0_145, %c0_146], %1088 {strides = array<i32>} : memref<2x2xf32, #tpu.memory_space<vmem>>, vector<2x2xf32>,
    return
  }
}

</mosaic_0001>

<bundles_post_ra>
// kernel: gp_rnn_forward.1
= control target key start
LH: loop header
LB: loop body
LE: loop exit
PB: predicated region body
PF: predicated region fallthrough
CT: control target
= control target key end

     0   :  { %16 = vsyncpa [#allocation3], 0  ;;  %s6664_s0 = inlined_call_operand.vmem [shape: f32[2,16,1], index: 0, kind: input, shape index: {}]   ;;  %s6665_s1 = inlined_call_operand.vmem [shape: f32[2,1,16], index: 1, kind: input, shape index: {}]   ;;  %s6666_s2 = inlined_call_operand.vmem [shape: f32[2,8,1], index: 2, kind: input, shape index: {}]   ;;  %s6667_s3 = inlined_call_operand.vmem [shape: f32[2,16,4], index: 3, kind: input, shape index: {}]   ;;  %s6668_s4 = inlined_call_operand.vmem [shape: bf16[4,384], index: 4, kind: input, shape index: {}]   ;;  %s6669_s5 = inlined_call_operand.vmem [shape: f32[1,384], index: 5, kind: input, shape index: {}]   ;;  %s6670_s6 = inlined_call_operand.vmem [shape: f32[1,384], index: 6, kind: input, shape index: {}]   ;;  %s6671_s7 = inlined_call_operand.vmem [shape: f32[1,128], index: 7, kind: input, shape index: {}]   ;;  %s6672_s8 = inlined_call_operand.hbm [shape: bf16[128,384], index: 8, kind: input, shape index: {}]   ;;  %s6673_s9 = inlined_call_operand.vmem [shape: bf16[128,2], index: 9, kind: input, shape index: {}]   ;;  %s6674_s10 = inlined_call_operand.vmem [shape: f32[1,2], index: 10, kind: input, shape index: {}]   ;;  %s6675_s11 = inlined_call_operand.hbm [shape: f32[2,2], index: 11, kind: output, shape index: {}]  }
   0x1   :  { %17 = vsyncpa [#allocation4], 0  ;;  %s4858_s17 = smov [#allocation2]   ;;  %s4810_s21 = scalar_lea.hbm %s6672_s8, 3072 }
   0x2   :  { %s39_s18 = sshll.u32 %s4858_s17, 4  ;;  %p4811_p0 = scmp.ne.s32.totalorder %s6672_s8, %s4810_s21  ;;  %s40_s18 = int_to_ptr.vmem [resolvable:$true] %s39_s18 }
   0x3   :  { %p4814_p1 = scmp.lt.u32.totalorder %s4810_s21, %s6672_s8 }
   0x5   :  { %p4816_p2 = pnand %p4814_p1, %p4811_p0 }
   0x7   :  { %4819 = shalt.err (!%p4816_p2)
}
   0x8   :  { %s4820_s26 = scalar_lea.vmem %s40_s18, 3072  ;;  %p4825_p4 = scmp.lt.s32.totalorder %s40_s18, %s40_s18 }
   0x9   :  { %p4821_p3 = scmp.ne.s32.totalorder %s40_s18, %s4820_s26  ;;  %p4826_p5 = scmp.lt.s32.totalorder %s4820_s26, %s4820_s26 }
   0xb   :  { %p4827_p6 = por %p4826_p5, %p4825_p4 }
   0xd   :  { %p4828_p7 = pnand %p4827_p6, %p4821_p3 }
   0xf   :  { %4831 = shalt.err (!%p4828_p7)
}
  0x10   :  { %s4859_s27 = smov 192   ;;  %s4860_s28 = smov 12  }
  0x11   :  { %45 = dma.hbm_to_vmem [thread:$0]  %s6672_s8, 3072, %s40_s18, [#allocation3], %s4859_s27, %s4859_s27, %s4860_s28  }
  0x12   :  { %4854 = dma.done.wait [#allocation3], 3072  }
  0x13   :  { %4855 = vsyncadd [#allocation3], 4294964224  ;;  %v4861_v0 = vmov 0   ;;  %v54_v1 = vld [vmem:[%s6664_s0] sm:$0xff]  ;;  %v56_v2 = vld [vmem:[%s6664_s0 + $0x10] sm:$0xff]  ;;  %v66_v6 = vlaneseq  ;;  %v4862_v18 = vmov 0.0  }
  0x14   :  { %4404 = vset.pattern.permute.xlu0 %v4861_v0  ;;  %4405 = vset.pattern.permute.xlu1 %v4861_v0  ;;  %v4966_v3 = vld [vmem:[%s6665_s1] ss:$0 sm:$0xff]  ;;  %v4972_v7 = vld [vmem:[%s6665_s1 + $0x1] ss:$0 sm:$0xff]  ;;  %v55_v31 = vld [vmem:[%s6664_s0 + $0x8] sm:$0xff]  ;;  %v4863_v34 = vmov 1  }
  0x15   :  { %2397 = vmatprep.mubr.bf16.mxu0 %v4861_v0  ;;  %73 = vperm.xlu0 %4404, %v54_v1   ;;  %v4975_v12 = vshrl.u32 %v66_v6, 7  ;;  %v4977_v13 = vand.u32 127, %v66_v6  ;;  %v57_v33 = vld [vmem:[%s6664_s0 + $0x18] sm:$0xff]  ;;  %s4881_s12 = smov [#allocation5]  }
  0x17   :  { %vm123_vm0 = vcmp.eq.s32.totalorder %v4975_v12, %v4977_v13  ;;  %v4983_v25 = vsub.s32 0, %v4975_v12  ;;  %v5024_v53 = vadd.s32 8, %v4975_v12  ;;  %v5027_v56 = vsub.s32 1, %v4975_v12 }
  0x18   :  { %v4001_v19 = vsel %vm123_vm0, 1.0, %v4862_v18  ;;  %vm277_vm2 = vcmp.ge.s32.totalorder %v4975_v12, 1  ;;  %vm194_vm3 = vcmp.eq.s32.totalorder %v4975_v12, 0  ;;  %vm295_vm4 = vcmp.ge.s32.totalorder %v4977_v13, 1 }
  0x19   :  { %83 = vperm.xlu0 %4404, %v56_v2   ;;  %v129_v20 = vmul.f32 0.1, %v4001_v19  ;;  %vm124_vm1 = vcmp.eq.s32.totalorder %v5024_v53, %v4977_v13  ;;  %v4864_v19 = vmov 2   ;;  %vm314_vm5 = vcmp.eq.s32.totalorder %v4975_v12, 1 }
  0x1a   :  { %v4002_v61 = vsel %vm124_vm1, 1.0, %v4862_v18  ;;  %vm397_vm6 = vcmp.ge.s32.totalorder %v4975_v12, 2  ;;  %vm415_vm7 = vcmp.ge.s32.totalorder %v4977_v13, 2  ;;  %vm434_vm8 = vcmp.eq.s32.totalorder %v4975_v12, 2 }
  0x1b   :  { %v130_v2 = vmul.f32 0.1, %v4002_v61  ;;  %vm517_vm9 = vcmp.ge.s32.totalorder %v4975_v12, 3  ;;  %vm240_vm10 = vcmp.eq.s32.totalorder %v4977_v13, 0  ;;  %vm535_vm11 = vcmp.ge.s32.totalorder %v4977_v13, 3 }
  0x1c   :  { %vm554_vm12 = vcmp.eq.s32.totalorder %v4975_v12, 3  ;;  %vm360_vm13 = vcmp.eq.s32.totalorder %v4977_v13, 1  ;;  %vm637_vm14 = vcmp.ge.s32.totalorder %v4975_v12, 4  ;;  %vm655_vm15 = vcmp.ge.s32.totalorder %v4977_v13, 4 }
  0x1d   :  { %vm480_vm0 = vcmp.eq.s32.totalorder %v4977_v13, 2  ;;  %vm674_vm1 = vcmp.eq.s32.totalorder %v4975_v12, 4 }
  0x94   :  { %v74_v4 = vpop.permute.xlu0 %73 }
  0x95   :  { %v103_v5 = vsub.f32 %v74_v4, %v4966_v3 }
  0x97   :  { %v107_v8 = vmul.f32 %v103_v5, %v103_v5 }
  0x98   :  { %v84_v9 = vpop.permute.xlu0 %83 }
  0x99   :  { %v111_v10 = vmul.f32 -2.0, %v107_v8  ;;  %v105_v11 = vsub.f32 %v84_v9, %v4972_v7 }
  0x9b   :  { %v115_v14 = vmul.f32 1.442695, %v111_v10  ;;  %v109_v15 = vmul.f32 %v105_v11, %v105_v11 }
  0x9d   :  { %4549 = vpow2.f32 %v115_v14  ;;  %v113_v16 = vmul.f32 -2.0, %v109_v15 }
  0x9f   :  { %v119_v17 = vmul.f32 1.442695, %v113_v16  ;;  %v60_v16 = vld [vmem:[%s6666_s2] sm:$0xff] }
  0xa1   :  { %4551 = vpow2.f32 %v119_v17  ;;  %v61_v17 = vld [vmem:[%s6666_s2 + $0x8] sm:$0xff] }
  0xa7   :  { %v4550_v21 = vpop.eup %4549 }
  0xa8   :  { %v131_v22 = vadd.f32 %v4550_v21, %v129_v20 }
  0xaa   :  { %4553 = vrsqrt.f32 %v131_v22 }
  0xab   :  { %v4552_v23 = vpop.eup %4551 }
  0xac   :  { %v133_v24 = vadd.f32 %v4552_v23, %v129_v20  ;;  %v62_v20 = vld [vmem:[%s6667_s3] sm:$0xff] }
  0xae   :  { %4555 = vrsqrt.f32 %v133_v24 }
  0xb4   :  { %v4554_v26 = vpop.eup %4553 }
  0xb5   :  { %178 = vperm.xlu1 %4405, %v4554_v26   ;;  %v4986_v27 = vrot.slane %v4554_v26, %v4983_v25 }
  0xb7   :  { %v167_v28 = vmul.f32 %v4986_v27, %v131_v22 }
  0xb8   :  { %v4556_v29 = vpop.eup %4555 }
  0xb9   :  { %198 = vperm.xlu0 %4404, %v167_v28   ;;  %183 = vperm.xlu1 %4405, %v4556_v29   ;;  %v4990_v30 = vrot.slane %v4556_v29, %v4983_v25 }
  0xbb   :  { %v169_v32 = vmul.f32 %v4990_v30, %v133_v24 }
  0xbd   :  { %78 = vperm.xlu0 %4404, %v55_v31   ;;  %208 = vperm.xlu1 %4405, %v169_v32  }
  0xc1   :  { %88 = vperm.xlu1 %4405, %v57_v33   ;;  %4406 = vset.pattern.permute.xlu0 %v4863_v34 }
  0xc5   :  { %4407 = vset.pattern.permute.xlu1 %v4863_v34 }
 0x134   :  { %v179_v35 = vpop.permute.xlu1 %178 }
 0x135   :  { %v186_v36 = vmul.f32 %v179_v35, %v131_v22  ;;  %v190_v21 = vmul.f32 %v179_v35, %v62_v20 }
 0x137   :  { %v5002_v37 = vrot.slane %v186_v36, %v4983_v25 }
 0x138   :  { %v5004_v38 = vpop.permute.xlu1 %183  ;;  %v199_v39 = vpop.permute.xlu0 %198 }
 0x139   :  { %v187_v40 = vmul.f32 %v5004_v38, %v133_v24  ;;  %v267_v41 = vmul.f32 %v5002_v37, %v199_v39 }
 0x13b   :  { %v5009_v42 = vrot.slane %v187_v40, %v4983_v25  ;;  %v5011_v43 = vsub.f32 %v131_v22, %v267_v41  ;;  %v5059_v22 = vrot.slane %v190_v21, %v4983_v25 }
 0x13c   :  { %v5013_v44 = vpop.permute.xlu1 %208  ;;  %v79_v45 = vpop.permute.xlu0 %78 }
 0x13d   :  { %4557 = vrsqrt.f32 %v5011_v43  ;;  %v269_v46 = vmul.f32 %v5009_v42, %v5013_v44  ;;  %v104_v47 = vsub.f32 %v79_v45, %v4966_v3  ;;  %v224_v23 = vmul.f32 %v5059_v22, %v199_v39 }
 0x13f   :  { %v5019_v48 = vsub.f32 %v133_v24, %v269_v46  ;;  %v108_v49 = vmul.f32 %v104_v47, %v104_v47  ;;  %v228_v24 = vsub.f32 %v62_v20, %v224_v23 }
 0x140   :  { %v89_v50 = vpop.permute.xlu1 %88 }
 0x141   :  { %4559 = vrsqrt.f32 %v5019_v48  ;;  %v112_v51 = vmul.f32 -2.0, %v108_v49  ;;  %v106_v52 = vsub.f32 %v89_v50, %v4972_v7  ;;  %v236_v26 = vsel %vm194_vm3, %v5059_v22, %v228_v24 }
 0x143   :  { %v117_v54 = vmul.f32 1.442695, %v112_v51  ;;  %v110_v55 = vmul.f32 %v106_v52, %v106_v52 }
 0x145   :  { %4561 = vpow2.f32 %v117_v54  ;;  %v114_v57 = vmul.f32 -2.0, %v110_v55 }
 0x147   :  { %v4558_v58 = vpop.eup %4557  ;;  %v121_v59 = vmul.f32 1.442695, %v114_v57 }
 0x148   :  { %298 = vperm.xlu0 %4406, %v4558_v58   ;;  %v5032_v60 = vrot.slane %v4558_v58, %v5027_v56 }
 0x149   :  { %4563 = vpow2.f32 %v121_v59 }
 0x14a   :  { %v287_v63 = vmul.f32 %v5032_v60, %v5011_v43 }
 0x14b   :  { %v4560_v62 = vpop.eup %4559 }
 0x14c   :  { %303 = vperm.xlu1 %4407, %v4560_v62   ;;  %v5039_v1 = vrot.slane %v4560_v62, %v5027_v56  ;;  %v291_v6 = vsel %vm277_vm2, %v287_v63, 0.0 }
 0x14e   :  { %v289_v4 = vmul.f32 %v5039_v1, %v5019_v48 }
 0x14f   :  { %v4562_v5 = vpop.eup %4561 }
 0x150   :  { %318 = vperm.xlu1 %4407, %v291_v6   ;;  %v293_v8 = vsel %vm277_vm2, %v289_v4, 0.0  ;;  %v132_v9 = vadd.f32 %v4562_v5, %v130_v2  ;;  %v5112_v4 = vsub.s32 2, %v4975_v12  ;;  %vm757_vm2 = vcmp.ge.s32.totalorder %v4975_v12, 5 }
 0x151   :  { %328 = vperm.xlu0 %4406, %v293_v8  }
 0x152   :  { %v168_v10 = vmul.f32 %v4986_v27, %v132_v9 }
 0x153   :  { %v4564_v11 = vpop.eup %4563 }
 0x154   :  { %4408 = vset.pattern.permute.xlu1 %v4861_v0  ;;  %v134_v14 = vadd.f32 %v4564_v11, %v130_v2 }
 0x155   :  { %203 = vperm.xlu1 %4408, %v168_v10   ;;  %4409 = vset.pattern.permute.xlu0 %v4861_v0 }
 0x156   :  { %v170_v15 = vmul.f32 %v4990_v30, %v134_v14 }
 0x158   :  { %213 = vperm.xlu0 %4409, %v170_v15  }
 0x159   :  { %137 = vperm.xlu1 %4408, %v60_v16  }
 0x15c   :  { %4410 = vset.pattern.permute.xlu0 %v4864_v19 }
 0x15d   :  { %142 = vperm.xlu1 %4408, %v61_v17  }
 0x161   :  { %4411 = vset.pattern.permute.xlu1 %v4863_v34 }
 0x1c7   :  { %v299_v28 = vpop.permute.xlu0 %298 }
 0x1c8   :  { %v306_v29 = vmul.f32 %v299_v28, %v5011_v43  ;;  %v310_v31 = vmul.f32 %v299_v28, %v236_v26 }
 0x1ca   :  { %v308_v32 = vsel %vm295_vm4, %v306_v29, 0.0  ;;  %v5073_v36 = vrot.slane %v310_v31, %v5027_v56 }
 0x1cb   :  { %v5068_v33 = vpop.permute.xlu1 %303  ;;  %v5076_v39 = vrot.slane %v308_v32, %v5027_v56 }
 0x1cc   :  { %v307_v35 = vmul.f32 %v5068_v33, %v5019_v48 }
 0x1ce   :  { %v309_v40 = vsel %vm295_vm4, %v307_v35, 0.0  ;;  %v4865_v35 = vmov 3   ;;  %vm775_vm4 = vcmp.ge.s32.totalorder %v4977_v13, 5 }
 0x1cf   :  { %v319_v41 = vpop.permute.xlu1 %318  ;;  %v5079_v45 = vrot.slane %v309_v40, %v5027_v56  ;;  %v64_v40 = vld [vmem:[%s6667_s3 + $0x10] sm:$0xff] }
 0x1d0   :  { %v344_v46 = vmul.f32 %v5073_v36, %v319_v41  ;;  %v387_v47 = vmul.f32 %v5076_v39, %v319_v41  ;;  %v5083_v49 = vpop.permute.xlu0 %328 }
 0x1d1   :  { %v389_v50 = vmul.f32 %v5079_v45, %v5083_v49 }
 0x1d2   :  { %v348_v51 = vsub.f32 %v236_v26, %v344_v46  ;;  %v5089_v52 = vsub.f32 %v5011_v43, %v387_v47 }
 0x1d3   :  { %v5092_v54 = vsub.f32 %v5019_v48, %v389_v50 }
 0x1d4   :  { %4565 = vrsqrt.f32 %v5089_v52  ;;  %v5095_v55 = vpop.permute.xlu1 %203  ;;  %v5100_v57 = vsel %vm314_vm5, %v5073_v36, %v348_v51 }
 0x1d5   :  { %4567 = vrsqrt.f32 %v5092_v54  ;;  %v268_v58 = vmul.f32 %v5002_v37, %v5095_v55 }
 0x1d7   :  { %v272_v59 = vsub.f32 %v132_v9, %v268_v58  ;;  %v5105_v43 = vpop.permute.xlu0 %213 }
 0x1d8   :  { %v138_v61 = vpop.permute.xlu1 %137  ;;  %v270_v63 = vmul.f32 %v5009_v42, %v5105_v43 }
 0x1d9   :  { %v145_v48 = vsub.f32 %v138_v61, %v4966_v3  ;;  %v288_v62 = vmul.f32 %v5032_v60, %v272_v59 }
 0x1da   :  { %v5115_v11 = vsub.f32 %v134_v14, %v270_v63 }
 0x1db   :  { %v147_v2 = vmul.f32 %v145_v48, %v145_v48  ;;  %323 = vperm.xlu1 %4411, %v288_v62  }
 0x1dc   :  { %v143_v5 = vpop.permute.xlu1 %142  ;;  %v290_v23 = vmul.f32 %v5039_v1, %v5115_v11 }
 0x1dd   :  { %v149_v6 = vmul.f32 -2.0, %v147_v2  ;;  %v146_v8 = vsub.f32 %v143_v5, %v4972_v7 }
 0x1de   :  { %v4566_v9 = vpop.eup %4565 }
 0x1df   :  { %v4568_v10 = vpop.eup %4567  ;;  %v151_v15 = vmul.f32 1.442695, %v149_v6  ;;  %v148_v3 = vmul.f32 %v146_v8, %v146_v8  ;;  %4412 = vset.pattern.permute.xlu1 %v4864_v19  ;;  %418 = vperm.xlu0 %4410, %v4566_v9   ;;  %v5119_v16 = vrot.slane %v4566_v9, %v5112_v4 }
 0x1e0   :  { %423 = vperm.xlu1 %4412, %v4568_v10   ;;  %v5123_v17 = vrot.slane %v4568_v10, %v5112_v4 }
 0x1e1   :  { %4569 = vpow2.f32 %v151_v15  ;;  %v150_v7 = vmul.f32 -2.0, %v148_v3  ;;  %v407_v14 = vmul.f32 %v5119_v16, %v5089_v52 }
 0x1e2   :  { %v409_v24 = vmul.f32 %v5123_v17, %v5092_v54 }
 0x1e3   :  { %v153_v20 = vmul.f32 1.442695, %v150_v7  ;;  %v411_v21 = vsel %vm397_vm6, %v407_v14, 0.0 }
 0x1e4   :  { %438 = vperm.xlu0 %4410, %v411_v21   ;;  %4413 = vset.pattern.permute.xlu1 %v4863_v34  ;;  %v413_v26 = vsel %vm397_vm6, %v409_v24, 0.0  ;;  %vm720_vm6 = vcmp.eq.s32.totalorder %v4977_v13, 4 }
 0x1e5   :  { %4571 = vpow2.f32 %v153_v20  ;;  %333 = vperm.xlu1 %4413, %v290_v23  }
 0x1e8   :  { %448 = vperm.xlu0 %4410, %v413_v26  }
 0x1e9   :  { %4414 = vset.pattern.permute.xlu1 %v4861_v0 }
 0x1eb   :  { %v5133_v28 = vpop.eup %4569 }
 0x1ec   :  { %v192_v29 = vmul.f32 %v5133_v28, %v4986_v27  ;;  %4415 = vset.pattern.permute.xlu0 %v4861_v0  ;;  %v191_v27 = vmul.f32 %v5004_v38, %v64_v40 }
 0x1ee   :  { %251 = vperm.xlu1 %4414, %v192_v29   ;;  %v5149_v41 = vrot.slane %v191_v27, %v4983_v25 }
 0x1ef   :  { %v5138_v31 = vpop.eup %4571 }
 0x1f0   :  { %v193_v32 = vmul.f32 %v5138_v31, %v4990_v30  ;;  %v226_v46 = vmul.f32 %v5149_v41, %v5013_v44 }
 0x1f2   :  { %256 = vperm.xlu0 %4415, %v193_v32   ;;  %4416 = vset.pattern.permute.xlu1 %v4864_v19  ;;  %v230_v47 = vsub.f32 %v64_v40, %v226_v46 }
 0x1f4   :  { %v238_v30 = vsel %vm194_vm3, %v5149_v41, %v230_v47  ;;  %vm600_vm3 = vcmp.eq.s32.totalorder %v4977_v13, 3 }
 0x1f5   :  { %v311_v50 = vmul.f32 %v5068_v33, %v238_v30 }
 0x1f6   :  { %4417 = vset.pattern.permute.xlu0 %v4865_v35 }
 0x1f7   :  { %v5158_v51 = vrot.slane %v311_v50, %v5027_v56  ;;  %v5221_v50 = vsub.s32 3, %v4975_v12 }
 0x1f9   :  { %v346_v58 = vmul.f32 %v5158_v51, %v5083_v49 }
 0x1fb   :  { %v350_v48 = vsub.f32 %v238_v30, %v346_v58 }
 0x25a   :  { %v5162_v38 = vpop.permute.xlu1 %323 }
 0x25b   :  { %v388_v61 = vmul.f32 %v5076_v39, %v5162_v38 }
 0x25d   :  { %v5166_v44 = vsub.f32 %v272_v59, %v388_v61  ;;  %v358_v59 = vsel %vm314_vm5, %v5158_v51, %v350_v48  ;;  %vm877_vm5 = vcmp.ge.s32.totalorder %v4975_v12, 6 }
 0x25e   :  { %v419_v62 = vpop.permute.xlu0 %418 }
 0x25f   :  { %v426_v63 = vmul.f32 %v419_v62, %v5089_v52  ;;  %v430_v33 = vmul.f32 %v419_v62, %v5100_v57  ;;  %v424_v2 = vpop.permute.xlu1 %423  ;;  %v408_v5 = vmul.f32 %v5119_v16, %v5166_v44 }
 0x260   :  { %v427_v49 = vmul.f32 %v424_v2, %v5092_v54  ;;  %v431_v10 = vmul.f32 %v424_v2, %v358_v59 }
 0x261   :  { %v428_v6 = vsel %vm415_vm7, %v426_v63, 0.0  ;;  %v5175_v8 = vrot.slane %v430_v33, %v5112_v4  ;;  %443 = vperm.xlu1 %4416, %v408_v5  }
 0x262   :  { %v5181_v9 = vrot.slane %v428_v6, %v5112_v4  ;;  %v429_v15 = vsel %vm415_vm7, %v427_v49, 0.0  ;;  %v5191_v23 = vrot.slane %v431_v10, %v5112_v4  ;;  %vm794_vm7 = vcmp.eq.s32.totalorder %v4975_v12, 5 }
 0x263   :  { %v439_v3 = vpop.permute.xlu0 %438  ;;  %v5198_v29 = vrot.slane %v429_v15, %v5112_v4 }
 0x264   :  { %v464_v7 = vmul.f32 %v5175_v8, %v439_v3  ;;  %v507_v14 = vmul.f32 %v5181_v9, %v439_v3  ;;  %v5185_v20 = vpop.permute.xlu1 %333 }
 0x265   :  { %v390_v21 = vmul.f32 %v5079_v45, %v5185_v20 }
 0x266   :  { %v468_v24 = vsub.f32 %v5100_v57, %v464_v7  ;;  %v5195_v26 = vsub.f32 %v5089_v52, %v507_v14  ;;  %v225_v7 = vmul.f32 %v5059_v22, %v5095_v55 }
 0x267   :  { %v394_v32 = vsub.f32 %v5115_v11, %v390_v21  ;;  %v449_v40 = vpop.permute.xlu0 %448 }
 0x268   :  { %4573 = vrsqrt.f32 %v5195_v26  ;;  %v466_v27 = vmul.f32 %v5191_v23, %v449_v40  ;;  %v509_v46 = vmul.f32 %v5198_v29, %v449_v40  ;;  %v5207_v47 = vsel %vm434_vm8, %v5175_v8, %v468_v24 }
 0x269   :  { %v410_v52 = vmul.f32 %v5123_v17, %v394_v32 }
 0x26a   :  { %v470_v57 = vsub.f32 %v358_v59, %v466_v27  ;;  %v5211_v30 = vsub.f32 %v5092_v54, %v509_v46 }
 0x26b   :  { %453 = vperm.xlu1 %4416, %v410_v52  }
 0x26c   :  { %4575 = vrsqrt.f32 %v5211_v30  ;;  %v5217_v11 = vsel %vm434_vm8, %v5191_v23, %v470_v57  ;;  %vm895_vm8 = vcmp.ge.s32.totalorder %v4977_v13, 6 }
 0x26d   :  { %v252_v58 = vpop.permute.xlu1 %251 }
 0x26e   :  { %v259_v62 = vmul.f32 %v252_v58, %v5002_v37 }
 0x26f   :  { %4418 = vset.pattern.permute.xlu1 %v4865_v35 }
 0x270   :  { %v261_v5 = vsub.f32 %v5133_v28, %v259_v62 }
 0x271   :  { %v257_v61 = vpop.permute.xlu0 %256 }
 0x272   :  { %v4574_v48 = vpop.eup %4573  ;;  %v260_v63 = vmul.f32 %v257_v61, %v5009_v42  ;;  %v5239_v59 = vsel %vm240_vm10, %v252_v58, %v261_v5 }
 0x273   :  { %538 = vperm.xlu0 %4417, %v4574_v48   ;;  %v5225_v54 = vrot.slane %v4574_v48, %v5221_v50  ;;  %v312_v28 = vmul.f32 %v5032_v60, %v5239_v59  ;;  %v63_v60 = vld [vmem:[%s6667_s3 + $0x8] sm:$0xff] }
 0x274   :  { %v262_v37 = vsub.f32 %v5138_v31, %v260_v63  ;;  %v4866_v31 = vmov 4   ;;  %v229_v14 = vsub.f32 %v63_v60, %v225_v7 }
 0x275   :  { %v527_v2 = vmul.f32 %v5225_v54, %v5195_v26 }
 0x276   :  { %v4576_v33 = vpop.eup %4575  ;;  %v5241_v15 = vsel %vm240_vm10, %v257_v61, %v262_v37  ;;  %vm840_vm10 = vcmp.eq.s32.totalorder %v4977_v13, 5 }
 0x277   :  { %543 = vperm.xlu1 %4418, %v4576_v33   ;;  %v5233_v49 = vrot.slane %v4576_v33, %v5221_v50  ;;  %v531_v42 = vsel %vm517_vm9, %v527_v2, 0.0  ;;  %v313_v3 = vmul.f32 %v5039_v1, %v5241_v15  ;;  %v345_v1 = vmul.f32 %v5073_v36, %v5162_v38 }
 0x279   :  { %v529_v6 = vmul.f32 %v5233_v49, %v5211_v30  ;;  %v5258_v24 = vsub.f32 %v229_v14, %v345_v1 }
 0x27b   :  { %558 = vperm.xlu1 %4418, %v531_v42   ;;  %v533_v10 = vsel %vm517_vm9, %v529_v6, 0.0  ;;  %vm914_vm9 = vcmp.eq.s32.totalorder %v4975_v12, 6 }
 0x27c   :  { %568 = vperm.xlu0 %4417, %v533_v10  }
 0x27f   :  { %4419 = vset.pattern.permute.xlu1 %v4863_v34 }
 0x280   :  { %371 = vperm.xlu1 %4419, %v312_v28   ;;  %4420 = vset.pattern.permute.xlu0 %v4863_v34 }
 0x281   :  { %376 = vperm.xlu0 %4420, %v313_v3  }
 0x284   :  { %4421 = vset.pattern.permute.xlu1 %v4865_v35 }
 0x285   :  { %4422 = vset.pattern.permute.xlu0 %v4866_v31 }
 0x2e0   :  { %v444_v21 = vpop.permute.xlu1 %443 }
 0x2e1   :  { %v5261_v34 = vmul.f32 %v5175_v8, %v444_v21  ;;  %v508_v40 = vmul.f32 %v5181_v9, %v444_v21 }
 0x2e3   :  { %v469_v27 = vsub.f32 %v5258_v24, %v5261_v34  ;;  %v5267_v22 = vsub.f32 %v5166_v44, %v508_v40 }
 0x2e5   :  { %v528_v55 = vmul.f32 %v5225_v54, %v5267_v22 }
 0x2e7   :  { %563 = vperm.xlu1 %4421, %v528_v55  }
 0x2ea   :  { %v5271_v36 = vpop.permute.xlu1 %453 }
 0x2eb   :  { %v510_v38 = vmul.f32 %v5198_v29, %v5271_v36 }
 0x2ed   :  { %v5275_v46 = vsub.f32 %v394_v32, %v510_v38  ;;  %v5317_v38 = vsub.s32 4, %v4975_v12 }
 0x2ef   :  { %v530_v8 = vmul.f32 %v5233_v49, %v5275_v46 }
 0x2f1   :  { %573 = vperm.xlu1 %4421, %v530_v8  }
 0x2f2   :  { %v539_v52 = vpop.permute.xlu0 %538 }
 0x2f3   :  { %v546_v44 = vmul.f32 %v539_v52, %v5195_v26  ;;  %v550_v57 = vmul.f32 %v539_v52, %v5207_v47 }
 0x2f5   :  { %4424 = vset.pattern.permute.xlu1 %v4866_v31  ;;  %v548_v58 = vsel %vm535_vm11, %v546_v44, 0.0  ;;  %v579_v62 = vrot.slane %v550_v57, %v5221_v50 }
 0x2f6   :  { %v544_v61 = vpop.permute.xlu1 %543  ;;  %v5287_v63 = vrot.slane %v548_v58, %v5221_v50 }
 0x2f7   :  { %v547_v48 = vmul.f32 %v544_v61, %v5211_v30  ;;  %v551_v32 = vmul.f32 %v544_v61, %v5217_v11 }
 0x2f9   :  { %v549_v33 = vsel %vm535_vm11, %v547_v48, 0.0  ;;  %v5290_v2 = vrot.slane %v551_v32, %v5221_v50  ;;  %vm1015_vm11 = vcmp.ge.s32.totalorder %v4977_v13, 7 }
 0x2fa   :  { %v559_v5 = vpop.permute.xlu1 %558  ;;  %v5293_v37 = vrot.slane %v549_v33, %v5221_v50 }
 0x2fb   :  { %v584_v6 = vmul.f32 %v579_v62, %v559_v5  ;;  %v627_v42 = vmul.f32 %v5287_v63, %v559_v5  ;;  %v569_v10 = vpop.permute.xlu0 %568 }
 0x2fc   :  { %v586_v28 = vmul.f32 %v5290_v2, %v569_v10  ;;  %v629_v3 = vmul.f32 %v5293_v37, %v569_v10 }
 0x2fd   :  { %v588_v7 = vsub.f32 %v5207_v47, %v584_v6  ;;  %v5301_v60 = vsub.f32 %v5195_v26, %v627_v42  ;;  %v227_v42 = vmul.f32 %v5149_v41, %v5105_v43  ;;  %v467_v43 = vmul.f32 %v5191_v23, %v5271_v36 }
 0x2fe   :  { %v590_v1 = vsub.f32 %v5217_v11, %v586_v28  ;;  %v5305_v14 = vsub.f32 %v5211_v30, %v629_v3 }
 0x2ff   :  { %4577 = vrsqrt.f32 %v5301_v60  ;;  %v372_v21 = vpop.permute.xlu1 %371  ;;  %v5308_v40 = vsel %vm554_vm12, %v579_v62, %v588_v7 }
 0x300   :  { %4579 = vrsqrt.f32 %v5305_v14  ;;  %v5312_v55 = vsel %vm554_vm12, %v5290_v2, %v590_v1  ;;  %v379_v47 = vmul.f32 %v372_v21, %v5076_v39  ;;  %v377_v30 = vpop.permute.xlu0 %376  ;;  %vm960_vm12 = vcmp.eq.s32.totalorder %v4977_v13, 6 }
 0x301   :  { %v380_v39 = vmul.f32 %v377_v30, %v5079_v45 }
 0x302   :  { %v381_v26 = vsub.f32 %v5239_v59, %v379_v47 }
 0x303   :  { %v382_v45 = vsub.f32 %v5241_v15, %v380_v39 }
 0x304   :  { %v5322_v52 = vsel %vm360_vm13, %v372_v21, %v381_v26 }
 0x305   :  { %v432_v58 = vmul.f32 %v5119_v16, %v5322_v52  ;;  %v5342_v33 = vsel %vm360_vm13, %v377_v30, %v382_v45  ;;  %vm1135_vm13 = vcmp.ge.s32.totalorder %v4977_v13, 8 }
 0x306   :  { %v433_v16 = vmul.f32 %v5123_v17, %v5342_v33  ;;  %v347_v17 = vmul.f32 %v5158_v51, %v5185_v20 }
 0x309   :  { %v4578_v11 = vpop.eup %4577 }
 0x30a   :  { %v4580_v8 = vpop.eup %4579  ;;  %658 = vperm.xlu0 %4422, %v4578_v11   ;;  %v5325_v44 = vrot.slane %v4578_v11, %v5317_v38 }
 0x30b   :  { %663 = vperm.xlu1 %4424, %v4580_v8   ;;  %v5330_v59 = vrot.slane %v4580_v8, %v5317_v38 }
 0x30c   :  { %v647_v57 = vmul.f32 %v5325_v44, %v5301_v60 }
 0x30d   :  { %v649_v48 = vmul.f32 %v5330_v59, %v5305_v14 }
 0x30e   :  { %4423 = vset.pattern.permute.xlu0 %v4864_v19  ;;  %v651_v61 = vsel %vm637_vm14, %v647_v57, 0.0 }
 0x30f   :  { %491 = vperm.xlu0 %4423, %v432_v58   ;;  %678 = vperm.xlu1 %4424, %v651_v61   ;;  %v653_v32 = vsel %vm637_vm14, %v649_v48, 0.0  ;;  %vm1155_vm14 = vcmp.eq.s32.totalorder %v5024_v53, 8 }
 0x313   :  { %688 = vperm.xlu1 %4424, %v653_v32   ;;  %4426 = vset.pattern.permute.xlu0 %v4866_v31 }
 0x317   :  { %4425 = vset.pattern.permute.xlu1 %v4864_v19  ;;  %v65_v19 = vld [vmem:[%s6667_s3 + $0x18] sm:$0xff]  ;;  %s3990_s3 = sshll.u32 %s4881_s12, 4  ;;  %s3991_s3 = int_to_ptr.vmem [resolvable:$true] %s3990_s3 }
 0x318   :  { %496 = vperm.xlu1 %4425, %v433_v16   ;;  %v231_v3 = vsub.f32 %v65_v19, %v227_v42  ;;  %v4867_v42 = vmov 5   ;;  %s4832_s13 = scalar_lea.vmem %s3991_s3, 32  ;;  %p4837_p9 = scmp.lt.s32.totalorder %s3991_s3, %s3991_s3 }
 0x319   :  { %p4833_p8 = scmp.ne.s32.totalorder %s3991_s3, %s4832_s13  ;;  %p4838_p10 = scmp.lt.s32.totalorder %s4832_s13, %s4832_s13 }
 0x31a   :  { %v351_v41 = vsub.f32 %v231_v3, %v347_v17 }
 0x31b   :  { %p4839_p11 = por %p4838_p10, %p4837_p9 }
 0x31c   :  { %4427 = vset.pattern.permute.xlu1 %v4866_v31  ;;  %v471_v34 = vsub.f32 %v351_v41, %v467_v43 }
 0x31d   :  { %p4840_p12 = pnand %p4839_p11, %p4833_p8 }
 0x366   :  { %v564_v5 = vpop.permute.xlu1 %563 }
 0x367   :  { %v585_v15 = vmul.f32 %v579_v62, %v564_v5  ;;  %v628_v6 = vmul.f32 %v5287_v63, %v564_v5 }
 0x369   :  { %v5355_v10 = vsub.f32 %v469_v27, %v585_v15  ;;  %v5358_v28 = vsub.f32 %v5267_v22, %v628_v6 }
 0x36b   :  { %v648_v62 = vmul.f32 %v5325_v44, %v5358_v28 }
 0x36d   :  { %683 = vperm.xlu0 %4426, %v648_v62  }
 0x370   :  { %v574_v24 = vpop.permute.xlu1 %573 }
 0x371   :  { %v587_v27 = vmul.f32 %v5290_v2, %v574_v24  ;;  %v630_v22 = vmul.f32 %v5293_v37, %v574_v24  ;;  %4429 = vset.pattern.permute.xlu0 %v4865_v35 }
 0x373   :  { %v5372_v7 = vsub.f32 %v471_v34, %v587_v27  ;;  %v5375_v51 = vsub.f32 %v5275_v46, %v630_v22 }
 0x375   :  { %v650_v20 = vmul.f32 %v5330_v59, %v5375_v51 }
 0x377   :  { %693 = vperm.xlu1 %4427, %v650_v20  }
 0x37b   :  { %4428 = vset.pattern.permute.xlu1 %v4865_v35 }
 0x389   :  { %v659_v23 = vpop.permute.xlu0 %658 }
 0x38a   :  { %v666_v36 = vmul.f32 %v659_v23, %v5301_v60  ;;  %v670_v2 = vmul.f32 %v659_v23, %v5308_v40  ;;  %v664_v1 = vpop.permute.xlu1 %663 }
 0x38b   :  { %v667_v21 = vmul.f32 %v664_v1, %v5305_v14  ;;  %v671_v23 = vmul.f32 %v664_v1, %v5312_v55 }
 0x38c   :  { %v668_v47 = vsel %vm655_vm15, %v666_v36, 0.0  ;;  %v699_v46 = vrot.slane %v670_v2, %v5317_v38 }
 0x38d   :  { %v5386_v26 = vrot.slane %v668_v47, %v5317_v38  ;;  %v669_v30 = vsel %vm655_vm15, %v667_v21, 0.0  ;;  %v5449_v2 = vrot.slane %v671_v23, %v5317_v38  ;;  %vm1238_vm15 = vcmp.ge.s32.totalorder %v5024_v53, 9 }
 0x38e   :  { %v679_v11 = vpop.permute.xlu1 %678  ;;  %v492_v8 = vpop.permute.xlu0 %491  ;;  %v5393_v58 = vrot.slane %v669_v30, %v5317_v38 }
 0x38f   :  { %v704_v35 = vmul.f32 %v699_v46, %v679_v11  ;;  %v747_v39 = vmul.f32 %v5386_v26, %v679_v11  ;;  %v499_v57 = vmul.f32 %v492_v8, %v5181_v9 }
 0x391   :  { %v708_v61 = vsub.f32 %v5308_v40, %v704_v35  ;;  %v5397_v48 = vsub.f32 %v5301_v60, %v747_v39  ;;  %v501_v45 = vsub.f32 %v5322_v52, %v499_v57 }
 0x392   :  { %v5400_v32 = vpop.permute.xlu1 %688 }
 0x393   :  { %4581 = vrsqrt.f32 %v5397_v48  ;;  %v505_v9 = vsel %vm480_vm0, %v492_v8, %v501_v45  ;;  %v749_v16 = vmul.f32 %v5393_v58, %v5400_v32  ;;  %v5410_v40 = vsel %vm674_vm1, %v699_v46, %v708_v61 }
 0x394   :  { %v552_v5 = vmul.f32 %v5225_v54, %v505_v9  ;;  %v5420_v54 = vsub.s32 5, %v4975_v12 }
 0x395   :  { %v5413_v60 = vsub.f32 %v5305_v14, %v749_v16 }
 0x396   :  { %611 = vperm.xlu1 %4428, %v552_v5  }
 0x397   :  { %4583 = vrsqrt.f32 %v5413_v60  ;;  %v497_v52 = vpop.permute.xlu1 %496 }
 0x398   :  { %v500_v15 = vmul.f32 %v497_v52, %v5198_v29 }
 0x39a   :  { %v502_v6 = vsub.f32 %v5342_v33, %v500_v15  ;;  %4430 = vset.pattern.permute.xlu1 %v4867_v42 }
 0x39c   :  { %v506_v19 = vsel %vm480_vm0, %v497_v52, %v502_v6  ;;  %v4868_v52 = vmov 6   ;;  %vm1080_vm0 = vcmp.eq.s32.totalorder %v4977_v13, 7 }
 0x39d   :  { %v4582_v17 = vpop.eup %4581  ;;  %v553_v14 = vmul.f32 %v5233_v49, %v506_v19 }
 0x39e   :  { %778 = vperm.xlu1 %4430, %v4582_v17   ;;  %v5426_v62 = vrot.slane %v4582_v17, %v5420_v54 }
 0x39f   :  { %616 = vperm.xlu0 %4429, %v553_v14  }
 0x3a0   :  { %v767_v29 = vmul.f32 %v5426_v62, %v5397_v48 }
 0x3a1   :  { %v4584_v33 = vpop.eup %4583 }
 0x3a2   :  { %783 = vperm.xlu1 %4430, %v4584_v33   ;;  %v771_v3 = vsel %vm757_vm2, %v767_v29, 0.0  ;;  %v5432_v43 = vrot.slane %v4584_v33, %v5420_v54 }
 0x3a3   :  { %4431 = vset.pattern.permute.xlu0 %v4867_v42 }
 0x3a4   :  { %798 = vperm.xlu0 %4431, %v771_v3   ;;  %v769_v49 = vmul.f32 %v5432_v43, %v5413_v60 }
 0x3a6   :  { %v773_v41 = vsel %vm757_vm2, %v769_v49, 0.0  ;;  %v5508_v49 = vsub.s32 6, %v4975_v12  ;;  %vm1275_vm2 = vcmp.eq.s32.totalorder %v5024_v53, 9 }
 0x3a7   :  { %808 = vperm.xlu1 %4430, %v773_v41  }
 0x3ec   :  { %v684_v24 = vpop.permute.xlu0 %683 }
 0x3ed   :  { %v5437_v34 = vmul.f32 %v699_v46, %v684_v24  ;;  %v748_v27 = vmul.f32 %v5386_v26, %v684_v24 }
 0x3ef   :  { %v709_v22 = vsub.f32 %v5355_v10, %v5437_v34  ;;  %v5443_v20 = vsub.f32 %v5358_v28, %v748_v27 }
 0x3f1   :  { %v768_v36 = vmul.f32 %v5426_v62, %v5443_v20 }
 0x3f3   :  { %803 = vperm.xlu1 %4430, %v768_v36  }
 0x3f6   :  { %v694_v21 = vpop.permute.xlu1 %693 }
 0x3f7   :  { %v5452_v47 = vmul.f32 %v5449_v2, %v694_v21  ;;  %v750_v46 = vmul.f32 %v5393_v58, %v694_v21  ;;  %4432 = vset.pattern.permute.xlu1 %v4866_v31 }
 0x3f9   :  { %v711_v28 = vsub.f32 %v5372_v7, %v5452_v47  ;;  %v5459_v1 = vsub.f32 %v5375_v51, %v750_v46 }
 0x3fb   :  { %v770_v30 = vmul.f32 %v5432_v43, %v5459_v1 }
 0x3fd   :  { %813 = vperm.xlu0 %4431, %v770_v30   ;;  %v706_v30 = vmul.f32 %v5449_v2, %v5400_v32 }
 0x401   :  { %4433 = vset.pattern.permute.xlu0 %v4866_v31 }
 0x415   :  { %v612_v11 = vpop.permute.xlu1 %611 }
 0x416   :  { %v619_v8 = vmul.f32 %v612_v11, %v5287_v63 }
 0x418   :  { %v621_v35 = vsub.f32 %v505_v9, %v619_v8  ;;  %v710_v8 = vsub.f32 %v5312_v55, %v706_v30 }
 0x41a   :  { %v5468_v39 = vsel %vm600_vm3, %v612_v11, %v621_v35  ;;  %v718_v32 = vsel %vm674_vm1, %v5449_v2, %v710_v8  ;;  %vm1255_vm1 = vcmp.ge.s32.totalorder %v4977_v13, 9 }
 0x41b   :  { %v672_v51 = vmul.f32 %v5325_v44, %v5468_v39 }
 0x41d   :  { %v779_v57 = vpop.permute.xlu1 %778  ;;  %731 = vperm.xlu1 %4432, %v672_v51  }
 0x41e   :  { %v786_v61 = vmul.f32 %v779_v57, %v5397_v48  ;;  %v617_v31 = vpop.permute.xlu0 %616  ;;  %v790_v46 = vmul.f32 %v779_v57, %v5410_v40 }
 0x41f   :  { %v620_v45 = vmul.f32 %v617_v31, %v5293_v37 }
 0x420   :  { %v788_v63 = vsel %vm775_vm4, %v786_v61, 0.0  ;;  %v819_v11 = vrot.slane %v790_v46, %v5420_v54 }
 0x421   :  { %v622_v9 = vsub.f32 %v506_v19, %v620_v45  ;;  %v784_v16 = vpop.permute.xlu1 %783  ;;  %v5478_v5 = vrot.slane %v788_v63, %v5420_v54  ;;  %4434 = vset.pattern.permute.xlu1 %v4868_v52 }
 0x422   :  { %v787_v44 = vmul.f32 %v784_v16, %v5413_v60  ;;  %v791_v57 = vmul.f32 %v784_v16, %v718_v32 }
 0x423   :  { %v5484_v15 = vsel %vm600_vm3, %v617_v31, %v622_v9  ;;  %v5486_v6 = vpop.permute.xlu0 %798  ;;  %vm1200_vm3 = vcmp.eq.s32.totalorder %v4977_v13, 8 }
 0x424   :  { %v673_v37 = vmul.f32 %v5330_v59, %v5484_v15  ;;  %v789_v19 = vsel %vm775_vm4, %v787_v44, 0.0  ;;  %v867_v14 = vmul.f32 %v5478_v5, %v5486_v6  ;;  %v823_v63 = vrot.slane %v791_v57, %v5420_v54 }
 0x425   :  { %v5493_v17 = vrot.slane %v789_v19, %v5420_v54  ;;  %vm1358_vm4 = vcmp.ge.s32.totalorder %v5024_v53, 10 }
 0x426   :  { %v809_v29 = vpop.permute.xlu1 %808  ;;  %736 = vperm.xlu0 %4433, %v673_v37   ;;  %v5498_v33 = vsub.f32 %v5397_v48, %v867_v14  ;;  %v4869_v14 = vmov 7  }
 0x427   :  { %v869_v3 = vmul.f32 %v5493_v17, %v809_v29 }
 0x428   :  { %4585 = vrsqrt.f32 %v5498_v33 }
 0x429   :  { %v5503_v59 = vsub.f32 %v5413_v60, %v869_v3 }
 0x42a   :  { %4435 = vset.pattern.permute.xlu0 %v4868_v52 }
 0x42b   :  { %4587 = vrsqrt.f32 %v5503_v59 }
 0x432   :  { %v4586_v41 = vpop.eup %4585 }
 0x433   :  { %898 = vperm.xlu1 %4434, %v4586_v41   ;;  %v5511_v24 = vrot.slane %v4586_v41, %v5508_v49 }
 0x435   :  { %v4588_v48 = vpop.eup %4587  ;;  %v887_v27 = vmul.f32 %v5511_v24, %v5498_v33 }
 0x436   :  { %v5517_v60 = vrot.slane %v4588_v48, %v5508_v49 }
 0x437   :  { %903 = vperm.xlu1 %4434, %v4588_v48   ;;  %v891_v23 = vsel %vm877_vm5, %v887_v27, 0.0 }
 0x438   :  { %v889_v36 = vmul.f32 %v5517_v60, %v5503_v59  ;;  %918 = vperm.xlu0 %4435, %v891_v23  }
 0x43a   :  { %v893_v21 = vsel %vm877_vm5, %v889_v36, 0.0  ;;  %vm1375_vm5 = vcmp.ge.s32.totalorder %v4977_v13, 10 }
 0x43b   :  { %928 = vperm.xlu1 %4434, %v893_v21  }
 0x472   :  { %v804_v35 = vpop.permute.xlu1 %803 }
 0x473   :  { %v825_v51 = vmul.f32 %v819_v11, %v804_v35  ;;  %v868_v61 = vmul.f32 %v5478_v5, %v804_v35 }
 0x475   :  { %v5530_v31 = vsub.f32 %v709_v22, %v825_v51  ;;  %v5533_v45 = vsub.f32 %v5443_v20, %v868_v61 }
 0x477   :  { %v888_v55 = vmul.f32 %v5511_v24, %v5533_v45 }
 0x479   :  { %923 = vperm.xlu1 %4434, %v888_v55  }
 0x47c   :  { %v814_v9 = vpop.permute.xlu0 %813 }
 0x47d   :  { %v827_v44 = vmul.f32 %v823_v63, %v814_v9  ;;  %v870_v10 = vmul.f32 %v5493_v17, %v814_v9  ;;  %4436 = vset.pattern.permute.xlu1 %v4867_v42 }
 0x47f   :  { %v5546_v34 = vsub.f32 %v711_v28, %v827_v44  ;;  %v5549_v22 = vsub.f32 %v5459_v1, %v870_v10 }
 0x481   :  { %v890_v20 = vmul.f32 %v5517_v60, %v5549_v22 }
 0x483   :  { %933 = vperm.xlu0 %4435, %v890_v20  }
 0x487   :  { %4437 = vset.pattern.permute.xlu0 %v4867_v42 }
 0x49c   :  { %v732_v2 = vpop.permute.xlu1 %731 }
 0x49d   :  { %v739_v16 = vmul.f32 %v732_v2, %v5386_v26  ;;  %v824_v26 = vmul.f32 %v819_v11, %v5486_v6 }
 0x49f   :  { %v741_v37 = vsub.f32 %v5468_v39, %v739_v16  ;;  %v828_v3 = vsub.f32 %v5410_v40, %v824_v26  ;;  %v5599_v16 = vsub.s32 7, %v4975_v12 }
 0x4a1   :  { %v5557_v19 = vsel %vm720_vm6, %v732_v2, %v741_v37  ;;  %v836_v41 = vsel %vm794_vm7, %v819_v11, %v828_v3 }
 0x4a2   :  { %v792_v7 = vmul.f32 %v5426_v62, %v5557_v19  ;;  %v826_v62 = vmul.f32 %v823_v63, %v809_v29 }
 0x4a4   :  { %851 = vperm.xlu1 %4436, %v792_v7  }
 0x4a5   :  { %v737_v47 = vpop.permute.xlu0 %736 }
 0x4a6   :  { %v740_v28 = vmul.f32 %v737_v47, %v5393_v58  ;;  %v830_v58 = vsub.f32 %v718_v32, %v826_v62 }
 0x4a8   :  { %v742_v1 = vsub.f32 %v5484_v15, %v740_v28  ;;  %4438 = vset.pattern.permute.xlu1 %v4869_v14  ;;  %v838_v40 = vsel %vm794_vm7, %v823_v63, %v830_v58  ;;  %vm1395_vm7 = vcmp.eq.s32.totalorder %v5024_v53, 10 }
 0x4aa   :  { %v5564_v42 = vsel %vm720_vm6, %v737_v47, %v742_v1  ;;  %vm1320_vm6 = vcmp.eq.s32.totalorder %v4977_v13, 9 }
 0x4ab   :  { %v793_v39 = vmul.f32 %v5432_v43, %v5564_v42 }
 0x4ad   :  { %856 = vperm.xlu0 %4437, %v793_v39  }
 0x4b1   :  { %4439 = vset.pattern.permute.xlu0 %v4869_v14 }
 0x4b2   :  { %v899_v15 = vpop.permute.xlu1 %898 }
 0x4b3   :  { %v906_v48 = vmul.f32 %v899_v15, %v5498_v33  ;;  %v910_v27 = vmul.f32 %v899_v15, %v836_v41 }
 0x4b5   :  { %v908_v6 = vsel %vm895_vm8, %v906_v48, 0.0  ;;  %v939_v23 = vrot.slane %v910_v27, %v5508_v49 }
 0x4b6   :  { %v5576_v43 = vrot.slane %v908_v6, %v5508_v49  ;;  %v904_v29 = vpop.permute.xlu1 %903 }
 0x4b7   :  { %v907_v36 = vmul.f32 %v904_v29, %v5503_v59  ;;  %v911_v21 = vmul.f32 %v904_v29, %v838_v40  ;;  %v919_v46 = vpop.permute.xlu0 %918  ;;  %v4870_v29 = vmov 8  }
 0x4b8   :  { %v944_v30 = vmul.f32 %v939_v23, %v919_v46  ;;  %v987_v8 = vmul.f32 %v5576_v43, %v919_v46 }
 0x4b9   :  { %v909_v35 = vsel %vm895_vm8, %v907_v36, 0.0  ;;  %v943_v11 = vrot.slane %v911_v21, %v5508_v49  ;;  %vm1478_vm8 = vcmp.ge.s32.totalorder %v5024_v53, 11 }
 0x4ba   :  { %v5583_v51 = vrot.slane %v909_v35, %v5508_v49  ;;  %v948_v61 = vsub.f32 %v836_v41, %v944_v30  ;;  %v5586_v32 = vsub.f32 %v5498_v33, %v987_v8  ;;  %v929_v57 = vpop.permute.xlu1 %928 }
 0x4bb   :  { %v946_v55 = vmul.f32 %v943_v11, %v929_v57 }
 0x4bc   :  { %4589 = vrsqrt.f32 %v5586_v32  ;;  %v989_v63 = vmul.f32 %v5583_v51, %v929_v57  ;;  %v5590_v9 = vsel %vm914_vm9, %v939_v23, %v948_v61 }
 0x4bd   :  { %v950_v44 = vsub.f32 %v838_v40, %v946_v55 }
 0x4be   :  { %v5593_v10 = vsub.f32 %v5503_v59, %v989_v63 }
 0x4bf   :  { %v5595_v20 = vsel %vm914_vm9, %v943_v11, %v950_v44  ;;  %vm1440_vm9 = vcmp.eq.s32.totalorder %v4977_v13, 10 }
 0x4c0   :  { %4591 = vrsqrt.f32 %v5593_v10 }
 0x4c6   :  { %v4590_v2 = vpop.eup %4589 }
 0x4c7   :  { %1018 = vperm.xlu1 %4438, %v4590_v2   ;;  %v5605_v1 = vrot.slane %v4590_v2, %v5599_v16 }
 0x4ca   :  { %v4592_v33 = vpop.eup %4591 }
 0x4cb   :  { %1023 = vperm.xlu1 %4438, %v4592_v33  }
 0x4f8   :  { %v924_v37 = vpop.permute.xlu1 %923 }
 0x4f9   :  { %v945_v7 = vmul.f32 %v939_v23, %v924_v37  ;;  %v988_v47 = vmul.f32 %v5576_v43, %v924_v37 }
 0x4fb   :  { %v949_v28 = vsub.f32 %v5530_v31, %v945_v7  ;;  %v992_v59 = vsub.f32 %v5533_v45, %v988_v47  ;;  %v5613_v31 = vrot.slane %v4592_v33, %v5599_v16 }
 0x4fd   :  { %v1008_v26 = vmul.f32 %v5605_v1, %v992_v59 }
 0x4ff   :  { %1043 = vperm.xlu0 %4439, %v1008_v26  }
 0x502   :  { %v934_v39 = vpop.permute.xlu0 %933 }
 0x503   :  { %v947_v3 = vmul.f32 %v943_v11, %v934_v39  ;;  %v990_v62 = vmul.f32 %v5583_v51, %v934_v39  ;;  %4441 = vset.pattern.permute.xlu0 %v4868_v52 }
 0x505   :  { %v951_v58 = vsub.f32 %v5546_v34, %v947_v3  ;;  %v994_v15 = vsub.f32 %v5549_v22, %v990_v62 }
 0x507   :  { %v1010_v45 = vmul.f32 %v5613_v31, %v994_v15 }
 0x509   :  { %1053 = vperm.xlu1 %4438, %v1010_v45  }
 0x50d   :  { %4440 = vset.pattern.permute.xlu1 %v4868_v52 }
 0x523   :  { %v852_v41 = vpop.permute.xlu1 %851 }
 0x524   :  { %v859_v48 = vmul.f32 %v852_v41, %v5478_v5 }
 0x526   :  { %v861_v27 = vsub.f32 %v5557_v19, %v859_v48 }
 0x528   :  { %v865_v6 = vsel %vm840_vm10, %v852_v41, %v861_v27 }
 0x529   :  { %v912_v34 = vmul.f32 %v5511_v24, %v865_v6 }
 0x52b   :  { %971 = vperm.xlu1 %4440, %v912_v34  }
 0x52c   :  { %v857_v22 = vpop.permute.xlu0 %856 }
 0x52d   :  { %v860_v23 = vmul.f32 %v857_v22, %v5493_v17 }
 0x52f   :  { %v862_v40 = vsub.f32 %v5564_v42, %v860_v23  ;;  %4442 = vset.pattern.permute.xlu1 %v4870_v29  ;;  %v4871_v23 = vmov 9  }
 0x531   :  { %v866_v52 = vsel %vm840_vm10, %v857_v22, %v862_v40  ;;  %vm1495_vm10 = vcmp.ge.s32.totalorder %v4977_v13, 11 }
 0x532   :  { %v913_v36 = vmul.f32 %v5517_v60, %v866_v52 }
 0x534   :  { %976 = vperm.xlu0 %4441, %v913_v36  }
 0x538   :  { %4443 = vset.pattern.permute.xlu0 %v4870_v29 }
 0x546   :  { %v1019_v5 = vpop.permute.xlu1 %1018 }
 0x547   :  { %v1030_v19 = vmul.f32 %v1019_v5, %v5590_v9  ;;  %v1026_v46 = vmul.f32 %v1019_v5, %v5586_v32 }
 0x549   :  { %v1028_v17 = vsel %vm1015_vm11, %v1026_v46, 0.0  ;;  %v5631_v42 = vrot.slane %v1030_v19, %v5599_v16 }
 0x54a   :  { %v1024_v21 = vpop.permute.xlu1 %1023  ;;  %v5634_v30 = vrot.slane %v1028_v17, %v5599_v16 }
 0x54b   :  { %v1031_v24 = vmul.f32 %v1024_v21, %v5595_v20  ;;  %v1027_v11 = vmul.f32 %v1024_v21, %v5593_v10 }
 0x54d   :  { %v1029_v55 = vsel %vm1015_vm11, %v1027_v11, 0.0  ;;  %v5640_v63 = vrot.slane %v1031_v24, %v5599_v16  ;;  %vm1515_vm11 = vcmp.eq.s32.totalorder %v5024_v53, 11 }
 0x54e   :  { %v5643_v44 = vrot.slane %v1029_v55, %v5599_v16 }
 0x57e   :  { %v1044_v60 = vpop.permute.xlu0 %1043 }
 0x57f   :  { %v1065_v8 = vmul.f32 %v5631_v42, %v1044_v60  ;;  %v1108_v35 = vmul.f32 %v5634_v30, %v1044_v60 }
 0x581   :  { %v1112_v61 = vsub.f32 %v992_v59, %v1108_v35  ;;  %v1069_v57 = vsub.f32 %v949_v28, %v1065_v8 }
 0x583   :  { %4593 = vrsqrt.f32 %v1112_v61 }
 0x588   :  { %v1054_v2 = vpop.permute.xlu1 %1053 }
 0x589   :  { %v1067_v33 = vmul.f32 %v5640_v63, %v1054_v2  ;;  %v1110_v37 = vmul.f32 %v5643_v44, %v1054_v2 }
 0x58b   :  { %v1114_v7 = vsub.f32 %v994_v15, %v1110_v37  ;;  %v1071_v47 = vsub.f32 %v951_v58, %v1067_v33 }
 0x58d   :  { %v4594_v26 = vpop.eup %4593  ;;  %4595 = vrsqrt.f32 %v1114_v7 }
 0x58e   :  { %1138 = vperm.xlu1 %4442, %v4594_v26   ;;  %v5648_v28 = vrot.slane %v4594_v26, %v4983_v25 }
 0x590   :  { %v1128_v59 = vmul.f32 %v5648_v28, %v1112_v61 }
 0x592   :  { %1163 = vperm.xlu0 %4443, %v1128_v59  }
 0x596   :  { %4445 = vset.pattern.permute.xlu0 %v4869_v14 }
 0x597   :  { %v4596_v39 = vpop.eup %4595 }
 0x598   :  { %1143 = vperm.xlu1 %4442, %v4596_v39   ;;  %v5653_v3 = vrot.slane %v4596_v39, %v4983_v25 }
 0x59a   :  { %v1130_v62 = vmul.f32 %v5653_v3, %v1114_v7 }
 0x59c   :  { %1173 = vperm.xlu1 %4442, %v1130_v62  }
 0x5a0   :  { %4444 = vset.pattern.permute.xlu1 %v4869_v14 }
 0x5aa   :  { %v972_v58 = vpop.permute.xlu1 %971 }
 0x5ab   :  { %v979_v15 = vmul.f32 %v972_v58, %v5576_v43 }
 0x5ad   :  { %v981_v45 = vsub.f32 %v865_v6, %v979_v15 }
 0x5af   :  { %v985_v41 = vsel %vm960_vm12, %v972_v58, %v981_v45 }
 0x5b0   :  { %v1032_v48 = vmul.f32 %v5605_v1, %v985_v41 }
 0x5b2   :  { %1091 = vperm.xlu1 %4444, %v1032_v48  }
 0x5b3   :  { %v977_v27 = vpop.permute.xlu0 %976 }
 0x5b4   :  { %v980_v34 = vmul.f32 %v977_v27, %v5583_v51 }
 0x5b6   :  { %v982_v22 = vsub.f32 %v866_v52, %v980_v34  ;;  %4446 = vset.pattern.permute.xlu1 %v4871_v23 }
 0x5b8   :  { %v986_v40 = vsel %vm960_vm12, %v977_v27, %v982_v22  ;;  %vm1598_vm12 = vcmp.ge.s32.totalorder %v5024_v53, 12 }
 0x5b9   :  { %v1033_v36 = vmul.f32 %v5613_v31, %v986_v40 }
 0x5bb   :  { %1096 = vperm.xlu0 %4445, %v1033_v36  }
 0x5bf   :  { %4447 = vset.pattern.permute.xlu0 %v4871_v23 }
 0x60d   :  { %v1139_v43 = vpop.permute.xlu1 %1138 }
 0x60e   :  { %v1146_v6 = vmul.f32 %v1139_v43, %v1112_v61  ;;  %v1150_v5 = vmul.f32 %v1139_v43, %v1069_v57 }
 0x610   :  { %v1148_v19 = vsel %vm1135_vm13, %v1146_v6, 0.0  ;;  %v5668_v51 = vrot.slane %v1150_v5, %v4983_v25 }
 0x611   :  { %v5671_v52 = vrot.slane %v1148_v19, %v4983_v25  ;;  %v1164_v21 = vpop.permute.xlu0 %1163 }
 0x612   :  { %v1185_v24 = vmul.f32 %v5668_v51, %v1164_v21 }
 0x613   :  { %v1228_v46 = vmul.f32 %v5671_v52, %v1164_v21 }
 0x614   :  { %v1189_v17 = vsub.f32 %v1069_v57, %v1185_v24 }
 0x615   :  { %v5676_v60 = vsub.f32 %v1112_v61, %v1228_v46 }
 0x616   :  { %v1197_v8 = vsel %vm1155_vm14, %v5668_v51, %v1189_v17 }
 0x617   :  { %4597 = vrsqrt.f32 %v5676_v60  ;;  %v1144_v35 = vpop.permute.xlu1 %1143 }
 0x618   :  { %v1147_v11 = vmul.f32 %v1144_v35, %v1114_v7  ;;  %v1151_v55 = vmul.f32 %v1144_v35, %v1071_v47 }
 0x61a   :  { %v1149_v2 = vsel %vm1135_vm13, %v1147_v11, 0.0  ;;  %v5685_v33 = vrot.slane %v1151_v55, %v4983_v25  ;;  %vm1560_vm13 = vcmp.eq.s32.totalorder %v4977_v13, 11 }
 0x61b   :  { %v5688_v37 = vrot.slane %v1149_v2, %v4983_v25  ;;  %v1174_v61 = vpop.permute.xlu1 %1173 }
 0x61c   :  { %v1187_v57 = vmul.f32 %v5685_v33, %v1174_v61 }
 0x61d   :  { %v1230_v26 = vmul.f32 %v5688_v37, %v1174_v61 }
 0x61e   :  { %v1191_v59 = vsub.f32 %v1071_v47, %v1187_v57 }
 0x61f   :  { %v1234_v39 = vsub.f32 %v1114_v7, %v1230_v26 }
 0x620   :  { %v1199_v62 = vsel %vm1155_vm14, %v5685_v33, %v1191_v59  ;;  %vm1615_vm14 = vcmp.ge.s32.totalorder %v4977_v13, 12 }
 0x621   :  { %v4598_v58 = vpop.eup %4597  ;;  %4599 = vrsqrt.f32 %v1234_v39 }
 0x622   :  { %1258 = vperm.xlu1 %4446, %v4598_v58   ;;  %v5696_v15 = vrot.slane %v4598_v58, %v5027_v56 }
 0x624   :  { %v1248_v45 = vmul.f32 %v5696_v15, %v5676_v60 }
 0x626   :  { %v1252_v48 = vsel %vm1238_vm15, %v1248_v45, 0.0 }
 0x627   :  { %1283 = vperm.xlu0 %4447, %v1252_v48  }
 0x62b   :  { %v4600_v27 = vpop.eup %4599  ;;  %4449 = vset.pattern.permute.xlu0 %v4870_v29 }
 0x62c   :  { %1263 = vperm.xlu1 %4446, %v4600_v27   ;;  %v5703_v7 = vrot.slane %v4600_v27, %v5027_v56 }
 0x62e   :  { %v1250_v47 = vmul.f32 %v5703_v7, %v1234_v39 }
 0x630   :  { %v1254_v34 = vsel %vm1238_vm15, %v1250_v47, 0.0  ;;  %vm1635_vm15 = vcmp.eq.s32.totalorder %v5024_v53, 12 }
 0x631   :  { %v1092_v22 = vpop.permute.xlu1 %1091  ;;  %1293 = vperm.xlu1 %4446, %v1254_v34  }
 0x632   :  { %v1099_v36 = vmul.f32 %v1092_v22, %v5634_v30  ;;  %v4872_v30 = vmov 10  }
 0x634   :  { %v1101_v43 = vsub.f32 %v985_v41, %v1099_v36 }
 0x635   :  { %4448 = vset.pattern.permute.xlu1 %v4870_v29 }
 0x636   :  { %v1105_v6 = vsel %vm1080_vm0, %v1092_v22, %v1101_v43 }
 0x637   :  { %v1152_v5 = vmul.f32 %v5648_v28, %v1105_v6 }
 0x639   :  { %1211 = vperm.xlu1 %4448, %v1152_v5  }
 0x63a   :  { %v1097_v19 = vpop.permute.xlu0 %1096 }
 0x63b   :  { %v1100_v21 = vmul.f32 %v1097_v19, %v5643_v44 }
 0x63d   :  { %v1102_v24 = vsub.f32 %v986_v40, %v1100_v21  ;;  %4450 = vset.pattern.permute.xlu1 %v4871_v23 }
 0x63f   :  { %v1106_v46 = vsel %vm1080_vm0, %v1097_v19, %v1102_v24  ;;  %vm1718_vm0 = vcmp.ge.s32.totalorder %v5024_v53, 13 }
 0x640   :  { %v1153_v17 = vmul.f32 %v5653_v3, %v1106_v46 }
 0x642   :  { %1216 = vperm.xlu0 %4449, %v1153_v17  }
 0x646   :  { %4452 = vset.pattern.permute.xlu0 %v4872_v30 }
 0x6a1   :  { %v1259_v41 = vpop.permute.xlu1 %1258 }
 0x6a2   :  { %v1266_v35 = vmul.f32 %v1259_v41, %v5676_v60  ;;  %v1270_v28 = vmul.f32 %v1259_v41, %v1197_v8 }
 0x6a4   :  { %v1268_v11 = vsel %vm1255_vm1, %v1266_v35, 0.0  ;;  %v5719_v44 = vrot.slane %v1270_v28, %v5027_v56 }
 0x6a5   :  { %v1324_v55 = vrot.slane %v1268_v11, %v5027_v56 }
 0x6a6   :  { %v1284_v40 = vpop.permute.xlu0 %1283 }
 0x6a7   :  { %v1305_v3 = vmul.f32 %v5719_v44, %v1284_v40  ;;  %v1348_v61 = vmul.f32 %v1324_v55, %v1284_v40 }
 0x6a9   :  { %v1309_v2 = vsub.f32 %v1197_v8, %v1305_v3  ;;  %v5735_v27 = vsub.f32 %v5676_v60, %v1348_v61 }
 0x6ab   :  { %v1264_v57 = vpop.permute.xlu1 %1263  ;;  %v5727_v26 = vsel %vm1275_vm2, %v5719_v44, %v1309_v2  ;;  %4601 = vrsqrt.f32 %v5735_v27 }
 0x6ac   :  { %v1267_v59 = vmul.f32 %v1264_v57, %v1234_v39  ;;  %v1271_v58 = vmul.f32 %v1264_v57, %v1199_v62 }
 0x6ae   :  { %v1269_v45 = vsel %vm1255_vm1, %v1267_v59, 0.0  ;;  %v5732_v48 = vrot.slane %v1271_v58, %v5027_v56  ;;  %vm1680_vm1 = vcmp.eq.s32.totalorder %v4977_v13, 12 }
 0x6af   :  { %v5738_v8 = vrot.slane %v1269_v45, %v5027_v56 }
 0x6b0   :  { %v1294_v47 = vpop.permute.xlu1 %1293 }
 0x6b1   :  { %v1307_v34 = vmul.f32 %v5732_v48, %v1294_v47  ;;  %v1350_v22 = vmul.f32 %v5738_v8, %v1294_v47 }
 0x6b3   :  { %v1311_v36 = vsub.f32 %v1199_v62, %v1307_v34  ;;  %v1354_v43 = vsub.f32 %v1234_v39, %v1350_v22 }
 0x6b5   :  { %4603 = vrsqrt.f32 %v1354_v43  ;;  %v1319_v5 = vsel %vm1275_vm2, %v5732_v48, %v1311_v36  ;;  %v4602_v24 = vpop.eup %4601  ;;  %vm1735_vm2 = vcmp.ge.s32.totalorder %v4977_v13, 13 }
 0x6b6   :  { %v1362_v62 = vrot.slane %v4602_v24, %v5112_v4 }
 0x6b8   :  { %v1212_v19 = vpop.permute.xlu1 %1211  ;;  %v1368_v40 = vmul.f32 %v1362_v62, %v5735_v27 }
 0x6b9   :  { %v1219_v60 = vmul.f32 %v1212_v19, %v5671_v52 }
 0x6bb   :  { %v1221_v21 = vsub.f32 %v1105_v6, %v1219_v60 }
 0x6bd   :  { %v1225_v17 = vsel %vm1200_vm3, %v1212_v19, %v1221_v21 }
 0x6be   :  { %v1272_v41 = vmul.f32 %v5696_v15, %v1225_v17  ;;  %v1372_v15 = vsel %vm1358_vm4, %v1368_v40, 0.0 }
 0x6bf   :  { %v4604_v35 = vpop.eup %4603 }
 0x6c0   :  { %1331 = vperm.xlu1 %4450, %v1272_v41   ;;  %1383 = vperm.xlu0 %4452, %v4604_v35   ;;  %v1366_v39 = vrot.slane %v4604_v35, %v5112_v4 }
 0x6c1   :  { %v1217_v28 = vpop.permute.xlu0 %1216 }
 0x6c2   :  { %v1220_v11 = vmul.f32 %v1217_v28, %v5688_v37  ;;  %v1370_v52 = vmul.f32 %v1366_v39, %v1354_v43 }
 0x6c4   :  { %4451 = vset.pattern.permute.xlu1 %v4872_v30  ;;  %v1374_v6 = vsel %vm1358_vm4, %v1370_v52, 0.0  ;;  %v1222_v3 = vsub.f32 %v1106_v46, %v1220_v11  ;;  %vm1838_vm4 = vcmp.ge.s32.totalorder %v5024_v53, 14 }
 0x6c5   :  { %1413 = vperm.xlu0 %4452, %v1374_v6   ;;  %1378 = vperm.xlu1 %4451, %v4602_v24  }
 0x6c6   :  { %v1226_v2 = vsel %vm1200_vm3, %v1217_v28, %v1222_v3  ;;  %vm1755_vm3 = vcmp.eq.s32.totalorder %v5024_v53, 13 }
 0x6c7   :  { %v1273_v61 = vmul.f32 %v5703_v7, %v1226_v2 }
 0x6c9   :  { %1403 = vperm.xlu1 %4451, %v1372_v15  }
 0x6cd   :  { %4453 = vset.pattern.permute.xlu1 %v4871_v23 }
 0x6ce   :  { %1336 = vperm.xlu1 %4453, %v1273_v61   ;;  %v4873_v61 = vmov 11  }
 0x6d2   :  { %4454 = vset.pattern.permute.xlu1 %v4872_v30 }
 0x73f   :  { %v1332_v37 = vpop.permute.xlu1 %1331  ;;  %v1384_v57 = vpop.permute.xlu0 %1383 }
 0x740   :  { %v1339_v59 = vmul.f32 %v1332_v37, %v1324_v55  ;;  %v1387_v46 = vmul.f32 %v1384_v57, %v1354_v43  ;;  %v1391_v58 = vmul.f32 %v1384_v57, %v1319_v5 }
 0x742   :  { %v1341_v45 = vsub.f32 %v1225_v17, %v1339_v59  ;;  %v1389_v47 = vsel %vm1375_vm5, %v1387_v46, 0.0  ;;  %v5767_v7 = vrot.slane %v1391_v58, %v5112_v4 }
 0x743   :  { %v1448_v34 = vrot.slane %v1389_v47, %v5112_v4 }
 0x744   :  { %v1345_v22 = vsel %vm1320_vm6, %v1332_v37, %v1341_v45  ;;  %v1379_v36 = vpop.permute.xlu1 %1378  ;;  %v1414_v19 = vpop.permute.xlu0 %1413 }
 0x745   :  { %v1392_v60 = vmul.f32 %v1362_v62, %v1345_v22  ;;  %v1386_v55 = vmul.f32 %v1379_v36, %v5735_v27  ;;  %v1390_v21 = vmul.f32 %v1379_v36, %v5727_v26  ;;  %v1427_v24 = vmul.f32 %v5767_v7, %v1414_v19 }
 0x746   :  { %v1470_v17 = vmul.f32 %v1448_v34, %v1414_v19 }
 0x747   :  { %v1388_v41 = vsel %vm1375_vm5, %v1386_v55, 0.0  ;;  %v5779_v35 = vrot.slane %v1390_v21, %v5112_v4  ;;  %v1431_v28 = vsub.f32 %v1319_v5, %v1427_v24  ;;  %1451 = vperm.xlu1 %4454, %v1392_v60   ;;  %vm1800_vm5 = vcmp.eq.s32.totalorder %v4977_v13, 13 }
 0x748   :  { %v5781_v11 = vsub.f32 %v1354_v43, %v1470_v17  ;;  %v1444_v62 = vrot.slane %v1388_v41, %v5112_v4  ;;  %v1404_v52 = vpop.permute.xlu1 %1403  ;;  %v4874_v17 = vmov 12  }
 0x749   :  { %v1425_v6 = vmul.f32 %v5779_v35, %v1404_v52  ;;  %v5788_v40 = vsel %vm1395_vm7, %v5767_v7, %v1431_v28 }
 0x74a   :  { %v1468_v3 = vmul.f32 %v1444_v62, %v1404_v52  ;;  %4605 = vrsqrt.f32 %v5781_v11 }
 0x74b   :  { %v1429_v15 = vsub.f32 %v5727_v26, %v1425_v6  ;;  %4455 = vset.pattern.permute.xlu1 %v4873_v61 }
 0x74c   :  { %v1472_v43 = vsub.f32 %v5735_v27, %v1468_v3 }
 0x74d   :  { %v1337_v5 = vpop.permute.xlu1 %1336  ;;  %v1437_v37 = vsel %vm1395_vm7, %v5779_v35, %v1429_v15  ;;  %vm1855_vm7 = vcmp.ge.s32.totalorder %v4977_v13, 14 }
 0x74e   :  { %4607 = vrsqrt.f32 %v1472_v43  ;;  %v1340_v57 = vmul.f32 %v1337_v5, %v5738_v8 }
 0x750   :  { %v1342_v59 = vsub.f32 %v1226_v2, %v1340_v57 }
 0x752   :  { %v1346_v46 = vsel %vm1320_vm6, %v1337_v5, %v1342_v59  ;;  %vm997_vm6 = vcmp.ge.s32.totalorder %v4975_v12, 7 }
 0x753   :  { %v1393_v26 = vmul.f32 %v1366_v39, %v1346_v46 }
 0x754   :  { %v4606_v58 = vpop.eup %4605 }
 0x755   :  { %1456 = vperm.xlu0 %4452, %v1393_v26   ;;  %v1486_v47 = vrot.slane %v4606_v58, %v5221_v50 }
 0x757   :  { %v1490_v2 = vmul.f32 %v1486_v47, %v5781_v11 }
 0x758   :  { %v4608_v45 = vpop.eup %4607 }
 0x759   :  { %1498 = vperm.xlu1 %4455, %v4608_v45   ;;  %4456 = vset.pattern.permute.xlu0 %v4873_v61  ;;  %v1482_v27 = vrot.slane %v4608_v45, %v5221_v50  ;;  %v1494_v19 = vsel %vm1478_vm8, %v1490_v2, 0.0 }
 0x75a   :  { %1503 = vperm.xlu0 %4456, %v4606_v58  }
 0x75b   :  { %v1488_v36 = vmul.f32 %v1482_v27, %v1472_v43 }
 0x75d   :  { %v1492_v8 = vsel %vm1478_vm8, %v1488_v36, 0.0  ;;  %vm1875_vm8 = vcmp.eq.s32.totalorder %v5024_v53, 14 }
 0x75e   :  { %1523 = vperm.xlu1 %4455, %v1492_v8  }
 0x762   :  { %1533 = vperm.xlu1 %4455, %v1494_v19  }
 0x7c6   :  { %v1452_v39 = vpop.permute.xlu1 %1451 }
 0x7c7   :  { %v1459_v60 = vmul.f32 %v1452_v39, %v1444_v62 }
 0x7c9   :  { %v1461_v55 = vsub.f32 %v1345_v22, %v1459_v60 }
 0x7cb   :  { %v1465_v21 = vsel %vm1440_vm9, %v1452_v39, %v1461_v55 }
 0x7cc   :  { %v1512_v24 = vmul.f32 %v1482_v27, %v1465_v21 }
 0x7ce   :  { %1571 = vperm.xlu0 %4456, %v1512_v24  }
 0x7d2   :  { %4457 = vset.pattern.permute.xlu0 %v4874_v17 }
 0x7d4   :  { %v1457_v41 = vpop.permute.xlu0 %1456 }
 0x7d5   :  { %v1460_v28 = vmul.f32 %v1457_v41, %v1448_v34 }
 0x7d7   :  { %v1462_v52 = vsub.f32 %v1346_v46, %v1460_v28 }
 0x7d8   :  { %v1499_v6 = vpop.permute.xlu1 %1498 }
 0x7d9   :  { %v1466_v3 = vsel %vm1440_vm9, %v1457_v41, %v1462_v52  ;;  %v1506_v15 = vmul.f32 %v1499_v6, %v1472_v43  ;;  %v1510_v5 = vmul.f32 %v1499_v6, %v1437_v37  ;;  %v1504_v57 = vpop.permute.xlu0 %1503  ;;  %vm1958_vm9 = vcmp.ge.s32.totalorder %v5024_v53, 15 }
 0x7da   :  { %v1513_v62 = vmul.f32 %v1486_v47, %v1466_v3  ;;  %v1507_v59 = vmul.f32 %v1504_v57, %v5781_v11 }
 0x7db   :  { %v1508_v22 = vsel %vm1495_vm10, %v1506_v15, 0.0  ;;  %v5810_v26 = vrot.slane %v1510_v5, %v5221_v50 }
 0x7dc   :  { %1576 = vperm.xlu1 %4455, %v1513_v62   ;;  %v1564_v58 = vrot.slane %v1508_v22, %v5221_v50  ;;  %v1509_v45 = vsel %vm1495_vm10, %v1507_v59, 0.0  ;;  %v4875_v22 = vmov 13   ;;  %vm1920_vm10 = vcmp.eq.s32.totalorder %v4977_v13, 14 }
 0x7dd   :  { %v1524_v34 = vpop.permute.xlu1 %1523  ;;  %v1568_v47 = vrot.slane %v1509_v45, %v5221_v50 }
 0x7de   :  { %v1545_v46 = vmul.f32 %v5810_v26, %v1524_v34  ;;  %v1588_v27 = vmul.f32 %v1564_v58, %v1524_v34 }
 0x7e0   :  { %v1549_v36 = vsub.f32 %v1437_v37, %v1545_v46  ;;  %v5815_v8 = vsub.f32 %v1472_v43, %v1588_v27  ;;  %4458 = vset.pattern.permute.xlu1 %v4874_v17 }
 0x7e1   :  { %v1534_v2 = vpop.permute.xlu1 %1533 }
 0x7e2   :  { %4609 = vrsqrt.f32 %v5815_v8  ;;  %v1590_v19 = vmul.f32 %v1568_v47, %v1534_v2  ;;  %v5823_v39 = vsel %vm1515_vm11, %v5810_v26, %v1549_v36 }
 0x7e4   :  { %v1594_v60 = vsub.f32 %v5781_v11, %v1590_v19 }
 0x7e6   :  { %4611 = vrsqrt.f32 %v1594_v60 }
 0x7ec   :  { %v4610_v55 = vpop.eup %4609 }
 0x7ed   :  { %1618 = vperm.xlu0 %4457, %v4610_v55   ;;  %v1602_v43 = vrot.slane %v4610_v55, %v5317_v38 }
 0x7ef   :  { %v1608_v24 = vmul.f32 %v1602_v43, %v5815_v8 }
 0x7f0   :  { %v4612_v37 = vpop.eup %4611 }
 0x7f1   :  { %1623 = vperm.xlu1 %4458, %v4612_v37   ;;  %v1606_v41 = vrot.slane %v4612_v37, %v5317_v38  ;;  %v1612_v52 = vsel %vm1598_vm12, %v1608_v24, 0.0 }
 0x7f3   :  { %v1610_v28 = vmul.f32 %v1606_v41, %v1594_v60 }
 0x7f5   :  { %1643 = vperm.xlu1 %4458, %v1612_v52   ;;  %v1614_v6 = vsel %vm1598_vm12, %v1610_v28, 0.0  ;;  %vm4879_vm12 = vmmov 0  }
 0x7f6   :  { %1653 = vperm.xlu0 %4457, %v1614_v6   ;;  %4172 = vmatprep.mubr.msk.f32.mxu1 %vm4879_vm12, %v4862_v18 }
 0x84d   :  { %v1572_v15 = vpop.permute.xlu0 %1571 }
 0x84e   :  { %v1579_v11 = vmul.f32 %v1572_v15, %v1564_v58  ;;  %v1511_v58 = vmul.f32 %v1504_v57, %v5788_v40 }
 0x850   :  { %v1581_v5 = vsub.f32 %v1465_v21, %v1579_v11  ;;  %v5840_v21 = vrot.slane %v1511_v58, %v5221_v50 }
 0x852   :  { %v5831_v62 = vsel %vm1560_vm13, %v1572_v15, %v1581_v5  ;;  %v1547_v19 = vmul.f32 %v5840_v21, %v1534_v2 }
 0x853   :  { %v1632_v59 = vmul.f32 %v1602_v43, %v5831_v62 }
 0x854   :  { %v1551_v55 = vsub.f32 %v5788_v40, %v1547_v19 }
 0x855   :  { %1691 = vperm.xlu1 %4458, %v1632_v59  }
 0x856   :  { %v1559_v57 = vsel %vm1515_vm11, %v5840_v21, %v1551_v55  ;;  %vm1034_vm11 = vcmp.eq.s32.totalorder %v4975_v12, 7 }
 0x859   :  { %4459 = vset.pattern.permute.xlu1 %v4875_v22 }
 0x85b   :  { %v1577_v45 = vpop.permute.xlu1 %1576 }
 0x85c   :  { %v1580_v34 = vmul.f32 %v1577_v45, %v1568_v47 }
 0x85e   :  { %v1582_v46 = vsub.f32 %v1466_v3, %v1580_v34 }
 0x860   :  { %v5835_v27 = vsel %vm1560_vm13, %v1577_v45, %v1582_v46  ;;  %vm1995_vm13 = vcmp.eq.s32.totalorder %v5024_v53, 15 }
 0x861   :  { %v1633_v36 = vmul.f32 %v1606_v41, %v5835_v27 }
 0x863   :  { %1696 = vperm.xlu0 %4457, %v1633_v36  }
 0x867   :  { %4460 = vset.pattern.permute.xlu0 %v4875_v22 }
 0x86c   :  { %v1619_v43 = vpop.permute.xlu0 %1618 }
 0x86d   :  { %v1626_v3 = vmul.f32 %v1619_v43, %v5815_v8  ;;  %v1630_v47 = vmul.f32 %v1619_v43, %v5823_v39 }
 0x86f   :  { %v1628_v37 = vsel %vm1615_vm14, %v1626_v3, 0.0  ;;  %v5852_v28 = vrot.slane %v1630_v47, %v5317_v38 }
 0x870   :  { %v1624_v50 = vpop.permute.xlu1 %1623  ;;  %v1684_v52 = vrot.slane %v1628_v37, %v5317_v38 }
 0x871   :  { %v1627_v24 = vmul.f32 %v1624_v50, %v1594_v60  ;;  %v1631_v41 = vmul.f32 %v1624_v50, %v1559_v57 }
 0x873   :  { %v1629_v2 = vsel %vm1615_vm14, %v1627_v24, 0.0  ;;  %v5855_v40 = vrot.slane %v1631_v41, %v5317_v38  ;;  %vm1975_vm14 = vcmp.ge.s32.totalorder %v4977_v13, 15 }
 0x874   :  { %v1644_v6 = vpop.permute.xlu1 %1643  ;;  %v1688_v15 = vrot.slane %v1629_v2, %v5317_v38 }
 0x875   :  { %v1665_v11 = vmul.f32 %v5852_v28, %v1644_v6  ;;  %v1708_v5 = vmul.f32 %v1684_v52, %v1644_v6  ;;  %v1654_v59 = vpop.permute.xlu0 %1653 }
 0x876   :  { %v1667_v45 = vmul.f32 %v5855_v40, %v1654_v59  ;;  %v1710_v34 = vmul.f32 %v1688_v15, %v1654_v59 }
 0x877   :  { %v1669_v46 = vsub.f32 %v5823_v39, %v1665_v11  ;;  %v1712_v36 = vsub.f32 %v5815_v8, %v1708_v5  ;;  %v4876_v11 = vmov 14  }
 0x878   :  { %v1671_v58 = vsub.f32 %v1559_v57, %v1667_v45  ;;  %v1714_v19 = vsub.f32 %v1594_v60, %v1710_v34 }
 0x879   :  { %4613 = vrsqrt.f32 %v1712_v36  ;;  %v1677_v55 = vsel %vm1635_vm15, %v5852_v28, %v1669_v46 }
 0x87a   :  { %4615 = vrsqrt.f32 %v1714_v19  ;;  %v5866_v38 = vsel %vm1635_vm15, %v5855_v40, %v1671_v58  ;;  %vm2040_vm15 = vcmp.eq.s32.totalorder %v4977_v13, 15 }
 0x883   :  { %v4614_v43 = vpop.eup %4613 }
 0x884   :  { %v4616_v3 = vpop.eup %4615  ;;  %1738 = vperm.xlu1 %4459, %v4614_v43   ;;  %v1722_v47 = vrot.slane %v4614_v43, %v5420_v54 }
 0x885   :  { %1743 = vperm.xlu0 %4460, %v4616_v3   ;;  %v1726_v39 = vrot.slane %v4616_v3, %v5420_v54 }
 0x886   :  { %v1728_v8 = vmul.f32 %v1722_v47, %v1712_v36 }
 0x887   :  { %v1730_v60 = vmul.f32 %v1726_v39, %v1714_v19 }
 0x888   :  { %v1732_v37 = vsel %vm1718_vm0, %v1728_v8, 0.0 }
 0x889   :  { %1763 = vperm.xlu1 %4459, %v1732_v37   ;;  %v1734_v57 = vsel %vm1718_vm0, %v1730_v60, 0.0  ;;  %vm2067_vm0 = vcmask 130048  }
 0x88d   :  { %1773 = vperm.xlu1 %4459, %v1734_v57  }
 0x8d4   :  { %v1692_v50 = vpop.permute.xlu1 %1691 }
 0x8d5   :  { %v1699_v24 = vmul.f32 %v1692_v50, %v1684_v52 }
 0x8d7   :  { %v1701_v41 = vsub.f32 %v5831_v62, %v1699_v24 }
 0x8d9   :  { %v1705_v2 = vsel %vm1680_vm1, %v1692_v50, %v1701_v41 }
 0x8da   :  { %v1752_v6 = vmul.f32 %v1722_v47, %v1705_v2 }
 0x8dc   :  { %1811 = vperm.xlu0 %4460, %v1752_v6  }
 0x8e0   :  { %4461 = vset.pattern.permute.xlu0 %v4876_v11 }
 0x8e2   :  { %v1697_v5 = vpop.permute.xlu0 %1696 }
 0x8e3   :  { %v1700_v59 = vmul.f32 %v1697_v5, %v1688_v15 }
 0x8e5   :  { %v1702_v45 = vsub.f32 %v5835_v27, %v1700_v59 }
 0x8e7   :  { %v1706_v34 = vsel %vm1680_vm1, %v1697_v5, %v1702_v45  ;;  %vm2271_vm1 = vcmask 1041408  }
 0x8e8   :  { %v1753_v46 = vmul.f32 %v1726_v39, %v1706_v34 }
 0x8ea   :  { %1816 = vperm.xlu1 %4459, %v1753_v46  }
 0x8ee   :  { %4462 = vset.pattern.permute.xlu1 %v4876_v11 }
 0x903   :  { %v1739_v52 = vpop.permute.xlu1 %1738 }
 0x904   :  { %v1746_v58 = vmul.f32 %v1739_v52, %v1712_v36  ;;  %v1750_v62 = vmul.f32 %v1739_v52, %v1677_v55  ;;  %v5877_v43 = vpop.permute.xlu0 %1743 }
 0x905   :  { %v1747_v3 = vmul.f32 %v5877_v43, %v1714_v19 }
 0x906   :  { %v1748_v47 = vsel %vm1735_vm2, %v1746_v58, 0.0  ;;  %v5881_v8 = vrot.slane %v1750_v62, %v5420_v54 }
 0x907   :  { %v1804_v27 = vrot.slane %v1748_v47, %v5420_v54  ;;  %v1749_v15 = vsel %vm1735_vm2, %v1747_v3, 0.0  ;;  %vm2267_vm2 = vcmask 31744  }
 0x908   :  { %v1764_v39 = vpop.permute.xlu1 %1763  ;;  %v1808_v24 = vrot.slane %v1749_v15, %v5420_v54 }
 0x909   :  { %v1785_v37 = vmul.f32 %v5881_v8, %v1764_v39  ;;  %v1828_v60 = vmul.f32 %v1804_v27, %v1764_v39 }
 0x90b   :  { %v1789_v57 = vsub.f32 %v1677_v55, %v1785_v37  ;;  %v5886_v50 = vsub.f32 %v1712_v36, %v1828_v60  ;;  %v1007_v60 = vmul.f32 %v5605_v1, %v5586_v32 }
 0x90c   :  { %v1774_v41 = vpop.permute.xlu1 %1773 }
 0x90d   :  { %4617 = vrsqrt.f32 %v5886_v50  ;;  %v1830_v6 = vmul.f32 %v1808_v24, %v1774_v41  ;;  %v5893_v5 = vsel %vm1755_vm3, %v5881_v8, %v1789_v57  ;;  %v1011_v57 = vsel %vm997_vm6, %v1007_v60, 0.0 }
 0x90f   :  { %v5895_v59 = vsub.f32 %v1714_v19, %v1830_v6 }
 0x911   :  { %4619 = vrsqrt.f32 %v5895_v59 }
 0x917   :  { %v4618_v45 = vpop.eup %4617 }
 0x918   :  { %1858 = vperm.xlu0 %4461, %v4618_v45   ;;  %v1842_v36 = vrot.slane %v4618_v45, %v5508_v49 }
 0x91a   :  { %v1848_v46 = vmul.f32 %v1842_v36, %v5886_v50 }
 0x91b   :  { %v4620_v55 = vpop.eup %4619 }
 0x91c   :  { %1863 = vperm.xlu1 %4462, %v4620_v55   ;;  %v1846_v52 = vrot.slane %v4620_v55, %v5508_v49  ;;  %v1852_v62 = vsel %vm1838_vm4, %v1848_v46, 0.0 }
 0x91e   :  { %v1850_v58 = vmul.f32 %v1846_v52, %v5895_v59 }
 0x920   :  { %1883 = vperm.xlu1 %4462, %v1852_v62   ;;  %v1854_v19 = vsel %vm1838_vm4, %v1850_v58, 0.0  ;;  %vm3982_vm4 = vcmask 9216  }
 0x921   :  { %1893 = vperm.xlu0 %4461, %v1854_v19  }
 0x95b   :  { %v1812_v3 = vpop.permute.xlu0 %1811 }
 0x95c   :  { %v1819_v47 = vmul.f32 %v1812_v3, %v1804_v27  ;;  %v1009_v27 = vmul.f32 %v5613_v31, %v5593_v10  ;;  %v1751_v10 = vmul.f32 %v5877_v43, %v5866_v38 }
 0x95e   :  { %v1821_v15 = vsub.f32 %v1705_v2, %v1819_v47  ;;  %v1013_v45 = vsel %vm997_vm6, %v1009_v27, 0.0  ;;  %v5937_v1 = vrot.slane %v1751_v10, %v5420_v54 }
 0x960   :  { %v5906_v39 = vsel %vm1800_vm5, %v1812_v3, %v1821_v15  ;;  %v1787_v31 = vmul.f32 %v5937_v1, %v1774_v41 }
 0x961   :  { %v1872_v37 = vmul.f32 %v1842_v36, %v5906_v39 }
 0x963   :  { %1931 = vperm.xlu1 %4462, %v1872_v37  }
 0x967   :  { %4463 = vset.pattern.permute.xlu1 %v4869_v14  ;;  %v4877_v14 = vmov 15  }
 0x968   :  { %1038 = vperm.xlu1 %4463, %v1011_v57  }
 0x969   :  { %v1817_v2 = vpop.permute.xlu1 %1816 }
 0x96a   :  { %v1820_v6 = vmul.f32 %v1817_v2, %v1808_v24 }
 0x96c   :  { %v1822_v55 = vsub.f32 %v1706_v34, %v1820_v6  ;;  %1048 = vperm.xlu1 %4463, %v1013_v45  }
 0x96e   :  { %v5917_v36 = vsel %vm1800_vm5, %v1817_v2, %v1822_v55 }
 0x96f   :  { %v1873_v32 = vmul.f32 %v1846_v52, %v5917_v36 }
 0x970   :  { %4470 = vset.pattern.permute.xlu1 %v4871_v23 }
 0x971   :  { %1936 = vperm.xlu0 %4461, %v1873_v32   ;;  %4472 = vperm.xlu1 %4470, %v4862_v18  }
 0x975   :  { %4464 = vset.pattern.permute.xlu0 %v4870_v29  ;;  %4482 = vset.pattern.permute.xlu1 %v4873_v61  ;;  %v1791_v29 = vsub.f32 %v5866_v38, %v1787_v31 }
 0x976   :  { %4466 = vperm.xlu0 %4464, %v4862_v18   ;;  %4484 = vperm.xlu1 %4482, %v4862_v18  }
 0x97a   :  { %4476 = vset.pattern.permute.xlu0 %v4872_v30  ;;  %4488 = vset.pattern.permute.xlu1 %v4874_v17 }
 0x97b   :  { %4478 = vperm.xlu0 %4476, %v4862_v18   ;;  %4490 = vperm.xlu1 %4488, %v4862_v18  }
 0x97f   :  { %4494 = vset.pattern.permute.xlu1 %v4875_v22  ;;  %4506 = vset.pattern.permute.xlu0 %v4877_v14  ;;  %v1799_v22 = vsel %vm1755_vm3, %v5937_v1, %v1791_v29  ;;  %vm2779_vm3 = vcmask 1041409  }
 0x980   :  { %4496 = vperm.xlu1 %4494, %v4862_v18  }
 0x984   :  { %4500 = vset.pattern.permute.xlu1 %v4876_v11 }
 0x985   :  { %4502 = vperm.xlu1 %4500, %v4862_v18  }
 0x989   :  { %4507 = vset.pattern.permute.xlu1 %v4877_v14  ;;  %v4878_v14 = vmov 0.0|0.0  }
 0x98a   :  { %4374 = vmatprep.subr.bf16.mxu1 %v4878_v14 }
 0x997   :  { %v1859_v23 = vpop.permute.xlu0 %1858 }
 0x998   :  { %v1866_v30 = vmul.f32 %v1859_v23, %v5886_v50  ;;  %v1870_v61 = vmul.f32 %v1859_v23, %v5893_v5 }
 0x99a   :  { %v1868_v17 = vsel %vm1855_vm7, %v1866_v30, 0.0  ;;  %v5949_v43 = vrot.slane %v1870_v61, %v5508_v49 }
 0x99b   :  { %v1864_v11 = vpop.permute.xlu1 %1863  ;;  %v1924_v41 = vrot.slane %v1868_v17, %v5508_v49 }
 0x99c   :  { %v1867_v54 = vmul.f32 %v1864_v11, %v5895_v59  ;;  %v1871_v34 = vmul.f32 %v1864_v11, %v1799_v22 }
 0x99e   :  { %v1869_v38 = vsel %vm1855_vm7, %v1867_v54, 0.0  ;;  %v5952_v24 = vrot.slane %v1871_v34, %v5508_v49 }
 0x99f   :  { %v1884_v46 = vpop.permute.xlu1 %1883  ;;  %v1928_v52 = vrot.slane %v1869_v38, %v5508_v49 }
 0x9a0   :  { %v1905_v58 = vmul.f32 %v5949_v43, %v1884_v46  ;;  %v1948_v62 = vmul.f32 %v1924_v41, %v1884_v46  ;;  %v1894_v19 = vpop.permute.xlu0 %1893 }
 0x9a1   :  { %v1907_v3 = vmul.f32 %v5952_v24, %v1894_v19  ;;  %v1950_v47 = vmul.f32 %v1928_v52, %v1894_v19 }
 0x9a2   :  { %v1909_v15 = vsub.f32 %v5893_v5, %v1905_v58  ;;  %v5961_v37 = vsub.f32 %v5886_v50, %v1948_v62 }
 0x9a3   :  { %v1911_v60 = vsub.f32 %v1799_v22, %v1907_v3  ;;  %v5964_v57 = vsub.f32 %v5895_v59, %v1950_v47 }
 0x9a4   :  { %4621 = vrsqrt.f32 %v5961_v37  ;;  %v5968_v49 = vsel %vm1875_vm8, %v5949_v43, %v1909_v15 }
 0x9a5   :  { %4623 = vrsqrt.f32 %v5964_v57  ;;  %v5972_v27 = vsel %vm1875_vm8, %v5952_v24, %v1911_v60 }
 0x9ae   :  { %v4622_v2 = vpop.eup %4621 }
 0x9af   :  { %v4624_v6 = vpop.eup %4623  ;;  %1978 = vperm.xlu0 %4506, %v4622_v2   ;;  %v1962_v50 = vrot.slane %v4622_v2, %v5599_v16 }
 0x9b0   :  { %v1966_v5 = vrot.slane %v4624_v6, %v5599_v16 }
 0x9b1   :  { %v1968_v59 = vmul.f32 %v1962_v50, %v5961_v37 }
 0x9b2   :  { %v1970_v55 = vmul.f32 %v1966_v5, %v5964_v57 }
 0x9b3   :  { %1983 = vperm.xlu0 %4506, %v4624_v6   ;;  %v1972_v45 = vsel %vm1958_vm9, %v1968_v59, 0.0 }
 0x9b4   :  { %2003 = vperm.xlu1 %4507, %v1972_v45   ;;  %v1974_v32 = vsel %vm1958_vm9, %v1970_v55, 0.0 }
 0x9b7   :  { %1998 = vperm.xlu0 %4506, %v4862_v18  }
 0x9b8   :  { %2013 = vperm.xlu1 %4507, %v1974_v32  }
 0x9bb   :  { %2008 = vperm.xlu0 %4506, %v4862_v18  }
 0x9e2   :  { %v1932_v10 = vpop.permute.xlu1 %1931 }
 0x9e3   :  { %v1939_v31 = vmul.f32 %v1932_v10, %v1924_v41 }
 0x9e5   :  { %v1941_v29 = vsub.f32 %v5906_v39, %v1939_v31 }
 0x9e7   :  { %v5986_v23 = vsel %vm1920_vm10, %v1932_v10, %v1941_v29  ;;  %v1039_v30 = vpop.permute.xlu1 %1038 }
 0x9e8   :  { %v1992_v61 = vmul.f32 %v1962_v50, %v5986_v23  ;;  %v1064_v17 = vmul.f32 %v5631_v42, %v1039_v30 }
 0x9ea   :  { %v1068_v22 = vsub.f32 %v5590_v9, %v1064_v17  ;;  %2051 = vperm.xlu1 %4507, %v1992_v61  }
 0x9eb   :  { %v1049_v11 = vpop.permute.xlu1 %1048 }
 0x9ec   :  { %v1066_v54 = vmul.f32 %v5640_v63, %v1049_v11  ;;  %v1076_v34 = vsel %vm1034_vm11, %v5631_v42, %v1068_v22 }
 0x9ee   :  { %v1070_v39 = vsub.f32 %v5595_v20, %v1066_v54 }
 0x9f0   :  { %v4473_v38 = vpop.permute.xlu1 %4472  ;;  %v1937_v41 = vpop.permute.xlu0 %1936  ;;  %v1078_v46 = vsel %vm1034_vm11, %v5640_v63, %v1070_v39 }
 0x9f1   :  { %v1940_v58 = vmul.f32 %v1937_v41, %v1928_v52  ;;  %v4475_v42 = vunpack.i.h.bf16 %v4473_v38  ;;  %v4474_v15 = vunpack.i.l.bf16 %v4473_v38 }
 0x9f3   :  { %v1942_v62 = vsub.f32 %v5917_v36, %v1940_v58  ;;  %v1306_v52 = vmul.f32 %v4475_v42, %v5732_v48  ;;  %v1304_v59 = vmul.f32 %v4474_v15, %v5719_v44 }
 0x9f5   :  { %v6001_v9 = vsel %vm1920_vm10, %v1937_v41, %v1942_v62  ;;  %v4485_v19 = vpop.permute.xlu1 %4484  ;;  %v4467_v3 = vpop.permute.xlu0 %4466 }
 0x9f6   :  { %v1993_v20 = vmul.f32 %v1966_v5, %v6001_v9  ;;  %v4469_v47 = vunpack.i.h.bf16 %v4467_v3  ;;  %v4468_v60 = vunpack.i.l.bf16 %v4467_v3  ;;  %v4487_v45 = vunpack.i.h.bf16 %v4485_v19 }
 0x9f7   :  { %v4486_v10 = vunpack.i.l.bf16 %v4485_v19 }
 0x9f8   :  { %v1186_v2 = vmul.f32 %v4469_v47, %v5685_v33  ;;  %2056 = vperm.xlu0 %4506, %v1993_v20   ;;  %v1184_v63 = vmul.f32 %v4468_v60, %v5668_v51  ;;  %v1546_v48 = vmul.f32 %v4487_v45, %v5840_v21 }
 0x9f9   :  { %v1544_v11 = vmul.f32 %v4486_v10, %v5810_v26 }
 0x9fa   :  { %v1190_v36 = vsub.f32 %v1078_v46, %v1186_v2  ;;  %v4491_v6 = vpop.permute.xlu1 %4490  ;;  %v4479_v50 = vpop.permute.xlu0 %4478  ;;  %v1188_v55 = vsub.f32 %v1076_v34, %v1184_v63 }
 0x9fb   :  { %v4481_v32 = vunpack.i.h.bf16 %v4479_v50  ;;  %v4480_v5 = vunpack.i.l.bf16 %v4479_v50  ;;  %v4493_v29 = vunpack.i.h.bf16 %v4491_v6  ;;  %v4492_v61 = vunpack.i.l.bf16 %v4491_v6 }
 0x9fc   :  { %v1310_v31 = vsub.f32 %v1190_v36, %v1306_v52  ;;  %v1308_v33 = vsub.f32 %v1188_v55, %v1304_v59 }
 0x9fd   :  { %v1426_v30 = vmul.f32 %v4481_v32, %v5767_v7  ;;  %v1424_v51 = vmul.f32 %v4480_v5, %v5779_v35  ;;  %v1666_v39 = vmul.f32 %v4493_v29, %v5855_v40  ;;  %v1664_v41 = vmul.f32 %v4492_v61, %v5852_v28 }
 0x9ff   :  { %v1430_v17 = vsub.f32 %v1310_v31, %v1426_v30  ;;  %v4497_v22 = vpop.permute.xlu1 %4496  ;;  %v1428_v44 = vsub.f32 %v1308_v33, %v1424_v51 }
 0xa00   :  { %v4499_v54 = vunpack.i.h.bf16 %v4497_v22  ;;  %v4498_v34 = vunpack.i.l.bf16 %v4497_v22 }
 0xa01   :  { %v1550_v38 = vsub.f32 %v1430_v17, %v1546_v48  ;;  %v1548_v46 = vsub.f32 %v1428_v44, %v1544_v11 }
 0xa02   :  { %v1786_v7 = vmul.f32 %v4499_v54, %v5937_v1  ;;  %v1784_v58 = vmul.f32 %v4498_v34, %v5881_v8 }
 0xa03   :  { %v1670_v35 = vsub.f32 %v1550_v38, %v1666_v39  ;;  %v1668_v62 = vsub.f32 %v1548_v46, %v1664_v41  ;;  %v4880_v41 = vmov 1983009808  }
 0xa04   :  { %v4503_v21 = vpop.permute.xlu1 %4502  ;;  %v2253_v46 = vunpack.c.l.s4 %v4880_v41 }
 0xa05   :  { %v1790_v19 = vsub.f32 %v1670_v35, %v1786_v7  ;;  %v4505_v3 = vunpack.i.h.bf16 %v4503_v21  ;;  %v4504_v42 = vunpack.i.l.bf16 %v4503_v21  ;;  %v1788_v26 = vsub.f32 %v1668_v62, %v1784_v58 }
 0xa06   :  { %v2254_v7 = vunpack.c.0.s8 %v2253_v46 }
 0xa07   :  { %v1906_v20 = vmul.f32 %v4505_v3, %v5952_v24  ;;  %v1904_v47 = vmul.f32 %v4504_v42, %v5949_v43  ;;  %v6054_v3 = vld [vmem:[#allocation2 + $0x4] ss:$12 sps:$4 sm:$0xff]  }
 0xa09   :  { %v1908_v40 = vsub.f32 %v1788_v26, %v1904_v47  ;;  %v1910_v15 = vsub.f32 %v1790_v19, %v1906_v20  ;;  %v6065_v47 = vld [vmem:[#allocation2] ss:$12 sps:$4 sm:$0xff]  }
 0xa2e   :  { %v1979_v60 = vpop.permute.xlu0 %1978 }
 0xa2f   :  { %v1990_v28 = vmul.f32 %v1979_v60, %v5968_v49 }
 0xa31   :  { %v2019_v1 = vrot.slane %v1990_v28, %v5599_v16  ;;  %v6069_v28 = vld [vmem:[#allocation2 + $0x8] ss:$12 sps:$4 sm:$0xff]  }
 0xa32   :  { %v1984_v2 = vpop.permute.xlu0 %1983 }
 0xa33   :  { %v1991_v8 = vmul.f32 %v1984_v2, %v5972_v27  ;;  %v2004_v63 = vpop.permute.xlu1 %2003  ;;  %v1987_v17 = vmul.f32 %v1984_v2, %v5964_v57  ;;  %v6078_v2 = vld [vmem:[#allocation2 + $0x34] ss:$12 sps:$4 sm:$0xff]  }
 0xa34   :  { %v2025_v52 = vmul.f32 %v2019_v1, %v2004_v63  ;;  %v6087_v63 = vld [vmem:[#allocation2 + $0x30] ss:$12 sps:$4 sm:$0xff]  }
 0xa35   :  { %v2023_v36 = vrot.slane %v1991_v8, %v5599_v16  ;;  %v1989_v11 = vsel %vm1975_vm14, %v1987_v17, 0.0  ;;  %v6081_v8 = vld [vmem:[#allocation2 + $0x20] ss:$12 sps:$4 sm:$0xff]  }
 0xa36   :  { %v2029_v6 = vsub.f32 %v5968_v49, %v2025_v52  ;;  %v1999_v50 = vpop.permute.xlu0 %1998  ;;  %v1986_v49 = vmul.f32 %v1979_v60, %v5961_v37  ;;  %v6067_v60 = vld [vmem:[#allocation2 + $0x1c] ss:$12 sps:$4 sm:$0xff]   ;;  %v6090_v52 = vld [vmem:[#allocation2 + $0x4c] ss:$12 sps:$4 sm:$0xff]  }
 0xa37   :  { %v2024_v24 = vmul.f32 %v2019_v1, %v1999_v50  ;;  %v2014_v59 = vpop.permute.xlu1 %2013  ;;  %v6100_v50 = vld [vmem:[#allocation2 + $0x64] ss:$12 sps:$4 sm:$0xff]  }
 0xa38   :  { %v2027_v43 = vmul.f32 %v2023_v36, %v2014_v59  ;;  %v2037_v10 = vsel %vm1995_vm13, %v2019_v1, %v2029_v6  ;;  %v1988_v53 = vsel %vm1975_vm14, %v1986_v49, 0.0  ;;  %v6073_v1 = vld [vmem:[#allocation2 + $0x18] ss:$12 sps:$4 sm:$0xff]   ;;  %v6097_v6 = vld [vmem:[#allocation2 + $0x48] ss:$12 sps:$4 sm:$0xff]  }
 0xa39   :  { %v2028_v45 = vsub.f32 %v1908_v40, %v2024_v24  ;;  %v2044_v61 = vrot.slane %v1988_v53, %v5599_v16  ;;  %v6103_v24 = vld [vmem:[#allocation2 + $0x50] ss:$12 sps:$4 sm:$0xff]   ;;  %v6107_v59 = vld [vmem:[#allocation2 + $0x60] ss:$12 sps:$4 sm:$0xff]  }
 0xa3a   :  { %v2031_v55 = vsub.f32 %v5972_v27, %v2027_v43  ;;  %v2009_v32 = vpop.permute.xlu0 %2008  ;;  %v6110_v43 = vld [vmem:[#allocation2 + $0x7c] ss:$12 sps:$4 sm:$0xff]  }
 0xa3b   :  { %v2026_v5 = vmul.f32 %v2023_v36, %v2009_v32  ;;  %v4375_v31 = vpack.c.bf16 %v2037_v10, %v2028_v45  ;;  %v6113_v45 = vld [vmem:[#allocation2 + $0x68] ss:$12 sps:$4 sm:$0xff]   ;;  %v6123_v10 = vld [vmem:[#allocation2 + $0x80] ss:$12 sps:$4 sm:$0xff]  }
 0xa3c   :  { %v2039_v30 = vsel %vm1995_vm13, %v2023_v36, %v2031_v55  ;;  %v6093_v36 = vld [vmem:[#allocation2 + $0x38] ss:$12 sps:$4 sm:$0xff]   ;;  %v6120_v32 = vld [vmem:[#allocation2 + $0x94] ss:$12 sps:$4 sm:$0xff]  }
 0xa3d   :  { %v2030_v29 = vsub.f32 %v1910_v15, %v2026_v5  ;;  %4376 = vmatpush3.bf16.msra.mxu1 %v4375_v31  ;;  %v6117_v55 = vld [vmem:[#allocation2 + $0x78] ss:$12 sps:$4 sm:$0xff]   ;;  %v6127_v5 = vld [vmem:[#allocation2 + $0x90] ss:$12 sps:$4 sm:$0xff]  }
 0xa3e   :  { %4377 = vmatprep.subr.bf16.mxu1 %v4878_v14  ;;  %v6130_v31 = vld [vmem:[#allocation2 + $0xac] ss:$12 sps:$4 sm:$0xff]  }
 0xa3f   :  { %v4378_v33 = vpack.c.bf16 %v2039_v30, %v2030_v29  ;;  %v6133_v29 = vld [vmem:[#allocation2 + $0x98] ss:$12 sps:$4 sm:$0xff]   ;;  %v6137_v30 = vld [vmem:[#allocation2 + $0xa8] ss:$12 sps:$4 sm:$0xff]  }
 0xa69   :  { %v2052_v27 = vpop.permute.xlu1 %2051 }
 0xa6a   :  { %v2059_v51 = vmul.f32 %v2052_v27, %v2044_v61 }
 0xa6c   :  { %v2061_v48 = vsub.f32 %v5986_v23, %v2059_v51  ;;  %v2048_v23 = vrot.slane %v1989_v11, %v5599_v16  ;;  %v2224_v16 = vld [vmem:[%s6668_s4] sm:$0x3f] }
 0xa6d   :  { %v2251_v62 = vcombine.high %v2224_v16, %v2224_v16 }
 0xa6e   :  { %v2065_v14 = vsel %vm2040_vm15, %v2052_v27, %v2061_v48 }
 0xa6f   :  { %v2214_v37 = vmul.f32 %v2065_v14, %v2065_v14  ;;  %4173 = vmatmul.mubr.msk.f32.vlgmr.msra.gmra.mrb[0].mxu1 %vm2067_vm0, %v2065_v14 }
 0xa70   :  { %4379 = vmatpush3.bf16.msra.mxu1 %v4378_v33  ;;  %4179 = vmatprep.mubr.msk.f32.mxu1 %vm4879_vm12, %v4862_v18  ;;  %v6141_v33 = vld [vmem:[#allocation2 + $0xb0] ss:$12 sps:$4 sm:$0xff]  }
 0xa71   :  { %v2216_v22 = vsel %vm2067_vm0, %v2214_v37, 0.0 }
 0xa72   :  { %2217 = vadd.xlane.f32.xlu0 %v2216_v22 }
 0xa77   :  { %v2057_v44 = vpop.permute.xlu0 %2056 }
 0xa78   :  { %v2060_v54 = vmul.f32 %v2057_v44, %v2048_v23 }
 0xa7a   :  { %v2062_v34 = vsub.f32 %v6001_v9, %v2060_v54  ;;  %v2257_v9 = vsub.s32 %v2254_v7, %v4975_v12 }
 0xa7c   :  { %v2066_v57 = vsel %vm2040_vm15, %v2057_v44, %v2062_v34  ;;  %v2258_v58 = vrot.slane %v2224_v16, %v2257_v9  ;;  %v2265_v21 = vrot.slane %v2251_v62, %v2257_v9  ;;  %v2446_v9 = vld [vmem:[%s6670_s6] sm:$0x7] }
 0xa7d   :  { %v2215_v39 = vmul.f32 %v2066_v57, %v2066_v57  ;;  %4180 = vmatmul.mubr.msk.f32.vlgmr.msra.gmra.mrb[2].mxu1 %vm2067_vm0, %v2066_v57  ;;  %v2451_v62 = vrot.slane %v2446_v9, %v4983_v25 }
 0xa7e   :  { %2313 = vmatprep.mubr.bf16.mxu1 %v4861_v0  ;;  %v2266_v13 = vcombine.high %v2258_v58, %v2258_v58  ;;  %v2273_v35 = vsel %vm2271_vm1, %v2258_v58, 0  ;;  %v2279_v19 = vsel %vm2271_vm1, %v2265_v21, 0 }
 0xa7f   :  { %v2219_v38 = vsel %vm2067_vm0, %v2215_v39, 0.0 }
 0xa80   :  { %2220 = vadd.xlane.f32.xlu1 %v2219_v38  ;;  %4005 = vmatprep.subr.msk.bf16.mxu1 %vm2271_vm1, %v2266_v13  ;;  %v2227_v38 = vld [vmem:[%s6669_s5] sm:$0x7] }
 0xa81   :  { %4008 = vmatprep.subr.msk.bf16.mxu0 %vm2271_vm1, %v2266_v13  ;;  %2282 = vmatpush1.bf16.msra.mxu1 %v2273_v35  ;;  %v2232_v7 = vrot.slane %v2227_v38, %v4983_v25  ;;  %v2236_v58 = vrot.slane %v2227_v38, %v5027_v56 }
 0xa82   :  { %2366 = vmatpush1.bf16.msra.mxu0 %v2273_v35  ;;  %4182 = vmatprep.subr.bf16.mxu1 %v4862_v18 }
 0xa83   :  { %2630 = vmatprep.subr.bf16.mxu0 %v6054_v3 }
 0xaff   :  { %v2218_v39 = vpop.xlane.xlu0 %2217 }
 0xb00   :  { %v2222_v46 = vsub.f32 1.1, %v2218_v39 }
 0xb02   :  { %v2244_v13 = vmul.f32 %v2232_v7, %v2222_v46 }
 0xb0d   :  { %v2221_v41 = vpop.xlane.xlu1 %2220 }
 0xb0e   :  { %v2223_v16 = vsub.f32 1.1, %v2221_v41 }
 0xb10   :  { %v2247_v21 = vmul.f32 %v2232_v7, %v2223_v16 }
 0xb42   :  { %v2137_v42 = vpop.f32.mrb[0].mxu1 }
 0xb43   :  { %v2225_v12 = vpack.c.bf16 %v2137_v42, %v2137_v42  ;;  %v4174_v26 = vpop.f32.mrb[1].mxu1 }
 0xb44   :  { %v2455_v26 = vrot.slane %v2446_v9, %v5027_v56 }
 0xb45   :  { %4006 = vmatmul.mubr.msk.bf16.vlgmr.msra.gmra.mrb[4].mxu1 %vm2267_vm2, %v2225_v12 }
 0xb46   :  { %4183 = vmatpush3.bf16.msra.mxu1 %v2279_v19  ;;  %4184 = vmatprep.mubr.msk.bf16.mxu1 %vm4879_vm12, %v4862_v18 }
 0xb47   :  { %4188 = vmatprep.subr.bf16.mxu1 %v4862_v18 }
 0xb4d   :  { %4185 = vmatmul.mubr.msk.bf16.vlgmr.msra.gmra.mrb[8].mxu1 %vm2267_vm2, %v2225_v12 }
 0xb4e   :  { %4189 = vmatpush3.bf16.msra.mxu1 %v2279_v19  ;;  %4190 = vmatprep.mubr.msk.bf16.mxu1 %vm4879_vm12, %v4862_v18  ;;  %v2245_v19 = vmul.f32 %v2236_v58, %v2222_v46 }
 0xb4f   :  { %4194 = vmatprep.subr.bf16.mxu1 %v4862_v18 }
 0xb50   :  { %v2210_v20 = vpop.f32.mrb[2].mxu1 }
 0xb51   :  { %v2226_v40 = vpack.c.bf16 %v2210_v20, %v2210_v20  ;;  %v4181_v15 = vpop.f32.mrb[3].mxu1  ;;  %v2248_v20 = vmul.f32 %v2236_v58, %v2223_v16 }
 0xb53   :  { %4009 = vmatmul.mubr.msk.bf16.vlgmr.msra.gmra.mrb[0].mxu0 %vm2267_vm2, %v2226_v40 }
 0xb54   :  { %2631 = vmatpush1.bf16.msra.mxu0 %v6065_v47  ;;  %2662 = vmatprep.mubr.bf16.mxu0 %v4861_v0 }
 0xb55   :  { %4191 = vmatmul.mubr.msk.bf16.vlgmr.msra.gmra.mrb[12].mxu1 %vm2267_vm2, %v2226_v40  ;;  %2632 = vmatprep.subr.bf16.mxu0 %v6067_v60 }
 0xb56   :  { %4195 = vmatpush3.bf16.msra.mxu1 %v6069_v28  ;;  %4210 = vmatprep.mubr.msk.bf16.mxu1 %vm4879_vm12, %v4862_v18 }
 0xb57   :  { %4196 = vmatprep.subr.bf16.mxu1 %v4862_v18 }
 0xb58   :  { %2633 = vmatpush1.bf16.msra.mxu0 %v6073_v1 }
 0xb59   :  { %2634 = vmatprep.subr.bf16.mxu0 %v6078_v2 }
 0xb5a   :  { %4197 = vmatpush3.bf16.msra.mxu1 %v6081_v8 }
 0xb5b   :  { %4198 = vmatprep.subr.bf16.mxu1 %v4862_v18 }
 0xb5c   :  { %2635 = vmatpush1.bf16.msra.mxu0 %v6087_v63 }
 0xb5d   :  { %2636 = vmatprep.subr.bf16.mxu0 %v6090_v52 }
 0xb5e   :  { %4199 = vmatpush3.bf16.msra.mxu1 %v6093_v36 }
 0xb5f   :  { %4200 = vmatprep.subr.bf16.mxu1 %v4862_v18 }
 0xb60   :  { %2637 = vmatpush1.bf16.msra.mxu0 %v6097_v6 }
 0xb61   :  { %2638 = vmatprep.subr.bf16.mxu0 %v6100_v50 }
 0xb62   :  { %4201 = vmatpush3.bf16.msra.mxu1 %v6103_v24 }
 0xb63   :  { %4202 = vmatprep.subr.bf16.mxu1 %v4862_v18 }
 0xb64   :  { %2639 = vmatpush1.bf16.msra.mxu0 %v6107_v59 }
 0xb65   :  { %2640 = vmatprep.subr.bf16.mxu0 %v6110_v43 }
 0xb66   :  { %4203 = vmatpush3.bf16.msra.mxu1 %v6113_v45 }
 0xb67   :  { %4204 = vmatprep.subr.bf16.mxu1 %v4862_v18 }
 0xb68   :  { %2641 = vmatpush1.bf16.msra.mxu0 %v6117_v55 }
 0xb69   :  { %2642 = vmatprep.subr.bf16.mxu0 %v6120_v32 }
 0xb6a   :  { %4205 = vmatpush3.bf16.msra.mxu1 %v6123_v10 }
 0xb6b   :  { %4206 = vmatprep.subr.bf16.mxu1 %v4862_v18 }
 0xb6c   :  { %2643 = vmatpush1.bf16.msra.mxu0 %v6127_v5 }
 0xb6d   :  { %2644 = vmatprep.subr.bf16.mxu0 %v6130_v31 }
 0xb6e   :  { %4207 = vmatpush3.bf16.msra.mxu1 %v6133_v29 }
 0xb6f   :  { %4208 = vmatprep.subr.bf16.mxu1 %v4862_v18 }
 0xb70   :  { %2645 = vmatpush1.bf16.msra.mxu0 %v6137_v30 }
 0xb71   :  { %2783 = vmatprep.subr.bf16.mxu0 %v6054_v3 }
 0xb72   :  { %4209 = vmatpush3.bf16.msra.mxu1 %v6141_v33 }
 0xb73   :  { %2663 = vmatmul.mubr.bf16.vlgmr.msra.gmra.mrb[4].mxu0 %v4861_v0  ;;  %4214 = vmatprep.subr.bf16.mxu1 %v4862_v18 }
 0xb74   :  { %2784 = vmatpush1.bf16.msra.mxu0 %v6065_v47  ;;  %2815 = vmatprep.mubr.bf16.mxu0 %v4861_v0 }
 0xb75   :  { %4211 = vmatmul.mubr.bf16.vlgmr.msra.gmra.mrb[16].mxu1 %v4861_v0  ;;  %2785 = vmatprep.subr.bf16.mxu0 %v6067_v60 }
 0xb76   :  { %4215 = vmatpush3.bf16.msra.mxu1 %v6069_v28  ;;  %4230 = vmatprep.mubr.msk.bf16.mxu1 %vm4879_vm12, %v4862_v18 }
 0xb77   :  { %4216 = vmatprep.subr.bf16.mxu1 %v4862_v18 }
 0xb78   :  { %2786 = vmatpush1.bf16.msra.mxu0 %v6073_v1 }
 0xb79   :  { %2787 = vmatprep.subr.bf16.mxu0 %v6078_v2 }
 0xb7a   :  { %4217 = vmatpush3.bf16.msra.mxu1 %v6081_v8 }
 0xb7b   :  { %4218 = vmatprep.subr.bf16.mxu1 %v4862_v18 }
 0xb7c   :  { %2788 = vmatpush1.bf16.msra.mxu0 %v6087_v63 }
 0xb7d   :  { %2789 = vmatprep.subr.bf16.mxu0 %v6090_v52 }
 0xb7e   :  { %4219 = vmatpush3.bf16.msra.mxu1 %v6093_v36 }
 0xb7f   :  { %4220 = vmatprep.subr.bf16.mxu1 %v4862_v18 }
 0xb80   :  { %2790 = vmatpush1.bf16.msra.mxu0 %v6097_v6 }
 0xb81   :  { %2791 = vmatprep.subr.bf16.mxu0 %v6100_v50 }
 0xb82   :  { %4221 = vmatpush3.bf16.msra.mxu1 %v6103_v24 }
 0xb83   :  { %4222 = vmatprep.subr.bf16.mxu1 %v4862_v18 }
 0xb84   :  { %2792 = vmatpush1.bf16.msra.mxu0 %v6107_v59 }
 0xb85   :  { %2793 = vmatprep.subr.bf16.mxu0 %v6110_v43 }
 0xb86   :  { %4223 = vmatpush3.bf16.msra.mxu1 %v6113_v45 }
 0xb87   :  { %4224 = vmatprep.subr.bf16.mxu1 %v4862_v18 }
 0xb88   :  { %2794 = vmatpush1.bf16.msra.mxu0 %v6117_v55 }
 0xb89   :  { %2795 = vmatprep.subr.bf16.mxu0 %v6120_v32 }
 0xb8a   :  { %4225 = vmatpush3.bf16.msra.mxu1 %v6123_v10 }
 0xb8b   :  { %4226 = vmatprep.subr.bf16.mxu1 %v4862_v18 }
 0xb8c   :  { %2796 = vmatpush1.bf16.msra.mxu0 %v6127_v5 }
 0xb8d   :  { %2797 = vmatprep.subr.bf16.mxu0 %v6130_v31 }
 0xb8e   :  { %4227 = vmatpush3.bf16.msra.mxu1 %v6133_v29 }
 0xb8f   :  { %4228 = vmatprep.subr.bf16.mxu1 %v4862_v18 }
 0xb90   :  { %2798 = vmatpush1.bf16.msra.mxu0 %v6137_v30 }
 0xb91   :  { %2935 = vmatprep.subr.bf16.mxu0 %v6054_v3 }
 0xb92   :  { %4229 = vmatpush3.bf16.msra.mxu1 %v6141_v33 }
 0xb93   :  { %4234 = vmatprep.subr.bf16.mxu1 %v4862_v18 }
 0xc18   :  { %v2315_v49 = vpop.f32.mrb[4].mxu1 }
 0xc19   :  { %v2317_v53 = vpop.f32.mrb[5].mxu1  ;;  %v2316_v35 = vadd.f32 %v2315_v49, %v2244_v13 }
 0xc1a   :  { %v2319_v61 = vpop.f32.mrb[6].mxu1  ;;  %v2318_v12 = vadd.f32 %v2317_v53, %v2245_v19 }
 0xc1b   :  { %v2320_v27 = vpop.f32.mrb[7].mxu1  ;;  %v6199_v40 = vadd.f32 %v2451_v62, %v2316_v35 }
 0xc1c   :  { %v6204_v49 = vadd.f32 %v2455_v26, %v2318_v12  ;;  %v6215_v12 = vld [vmem:[%s6671_s7] ss:$0 sm:$0xff] }
 0xc20   :  { %v6185_v51 = vpop.f32.mrb[8].mxu1 }
 0xc21   :  { %v4186_v48 = vpop.f32.mrb[9].mxu1 }
 0xc22   :  { %v2359_v14 = vpop.f32.mrb[10].mxu1 }
 0xc23   :  { %v4187_v17 = vpop.f32.mrb[11].mxu1 }
 0xc26   :  { %v2399_v37 = vpop.f32.mrb[0].mxu0 }
 0xc27   :  { %v2401_v22 = vpop.f32.mrb[1].mxu0  ;;  %v2400_v42 = vadd.f32 %v2399_v37, %v2247_v21 }
 0xc28   :  { %v2403_v11 = vpop.f32.mrb[2].mxu0  ;;  %v6187_v23 = vpop.f32.mrb[12].mxu1  ;;  %v2402_v15 = vadd.f32 %v2401_v22, %v2248_v20 }
 0xc29   :  { %v2404_v44 = vpop.f32.mrb[3].mxu0  ;;  %v4192_v54 = vpop.f32.mrb[13].mxu1  ;;  %v6201_v27 = vadd.f32 %v2451_v62, %v2400_v42  ;;  %v2240_v42 = vrot.slane %v2227_v38, %v5112_v4 }
 0xc2a   :  { %v2443_v34 = vpop.f32.mrb[14].mxu1 }
 0xc2b   :  { %v4193_v57 = vpop.f32.mrb[15].mxu1  ;;  %v6207_v34 = vadd.f32 %v2455_v26, %v2402_v15  ;;  %v2246_v20 = vmul.f32 %v2240_v42, %v2222_v46 }
 0xc46   :  { %v2664_v61 = vpop.f32.mrb[4].mxu0 }
 0xc47   :  { %v2712_v48 = vrot.slane %v2664_v61, 1  ;;  %v2715_v14 = vadd.f32 %v2664_v61, %v6199_v40  ;;  %v2666_v17 = vpop.f32.mrb[5].mxu0 }
 0xc48   :  { %v2730_v25 = vrot.slane %v2666_v17, 1  ;;  %v2668_v11 = vpop.f32.mrb[6].mxu0  ;;  %v2705_v44 = vpop.f32.mrb[16].mxu1  ;;  %v2733_v22 = vadd.f32 %v2666_v17, %v6204_v49  ;;  %v2249_v17 = vmul.f32 %v2240_v42, %v2223_v16 }
 0xc49   :  { %v2716_v53 = vadd.f32 %v2712_v48, %v6201_v27  ;;  %v4035_v37 = vmul.f32 -1.442695, %v2715_v14  ;;  %v2669_v56 = vpop.f32.mrb[7].mxu0  ;;  %v4212_v54 = vpop.f32.mrb[17].mxu1  ;;  %v2753_v15 = vadd.f32 %v6215_v12, %v2705_v44  ;;  %v2357_v48 = vadd.f32 %v6185_v51, %v2246_v20 }
 0xc4a   :  { %v2708_v57 = vpop.f32.mrb[18].mxu1  ;;  %v2734_v7 = vadd.f32 %v2730_v25, %v6207_v34  ;;  %v4037_v58 = vmul.f32 -1.442695, %v2733_v22  ;;  %v2459_v14 = vrot.slane %v2446_v9, %v5112_v4  ;;  %v2441_v11 = vadd.f32 %v6187_v23, %v2249_v17 }
 0xc4b   :  { %4625 = vpow2.f32 %v4035_v37  ;;  %v4036_v39 = vmul.f32 -1.442695, %v2716_v53  ;;  %v4213_v41 = vpop.f32.mrb[19].mxu1  ;;  %v2755_v53 = vrot.slane %v2753_v15, 1 }
 0xc4c   :  { %v4038_v13 = vmul.f32 -1.442695, %v2734_v7  ;;  %v6221_v56 = vadd.f32 %v2459_v14, %v2357_v48  ;;  %v6223_v46 = vadd.f32 %v2459_v14, %v2441_v11 }
 0xc4d   :  { %4627 = vpow2.f32 %v4036_v39 }
 0xc4e   :  { %4629 = vpow2.f32 %v4037_v58 }
 0xc4f   :  { %4631 = vpow2.f32 %v4038_v13 }
 0xc55   :  { %v4626_v35 = vpop.eup %4625 }
 0xc56   :  { %v2723_v62 = vadd.f32 1.0, %v4626_v35 }
 0xc57   :  { %v4628_v21 = vpop.eup %4627 }
 0xc58   :  { %v2724_v19 = vadd.f32 1.0, %v4628_v21  ;;  %4633 = vrcp.f32 %v2723_v62  ;;  %v4630_v26 = vpop.eup %4629 }
 0xc59   :  { %v4632_v61 = vpop.eup %4631  ;;  %v2741_v25 = vadd.f32 1.0, %v4630_v26 }
 0xc5a   :  { %4635 = vrcp.f32 %v2724_v19  ;;  %v2742_v38 = vadd.f32 1.0, %v4632_v61 }
 0xc5b   :  { %4637 = vrcp.f32 %v2741_v25 }
 0xc5c   :  { %4639 = vrcp.f32 %v2742_v38 }
 0xc62   :  { %v4634_v37 = vpop.eup %4633 }
 0xc63   :  { %v2758_v54 = vmul.f32 %v4634_v37, %v2753_v15 }
 0xc64   :  { %v4636_v22 = vpop.eup %4635 }
 0xc65   :  { %v2759_v44 = vmul.f32 %v4636_v22, %v2755_v53  ;;  %v2760_v51 = vadd.f32 %v2758_v54, %v6221_v56  ;;  %v4638_v16 = vpop.eup %4637 }
 0xc66   :  { %v4640_v23 = vpop.eup %4639  ;;  %v2764_v9 = vsub.f32 1.0, %v4638_v16  ;;  %v2768_v7 = vmul.f32 0.0, %v4638_v16 }
 0xc67   :  { %v2761_v4 = vadd.f32 %v2759_v44, %v6223_v46  ;;  %4641 = vtanh.f32 %v2760_v51  ;;  %v2765_v39 = vsub.f32 1.0, %v4640_v23  ;;  %v2769_v35 = vmul.f32 0.0, %v4640_v23 }
 0xc69   :  { %4643 = vtanh.f32 %v2761_v4 }
 0xc71   :  { %v4642_v57 = vpop.eup %4641 }
 0xc72   :  { %v2766_v41 = vmul.f32 %v4642_v57, %v2764_v9 }
 0xc73   :  { %v4644_v58 = vpop.eup %4643 }
 0xc74   :  { %v2767_v13 = vmul.f32 %v4644_v58, %v2765_v39  ;;  %v6227_v62 = vadd.f32 %v2768_v7, %v2766_v41 }
 0xc76   :  { %v6229_v21 = vadd.f32 %v2769_v35, %v2767_v13  ;;  %v2772_v19 = vpack.c.bf16 %v6227_v62, %v6227_v62 }
 0xc78   :  { %v2773_v42 = vpack.c.bf16 %v6229_v21, %v6229_v21  ;;  %v2776_v20 = vunpack.c.l.b16 %v2772_v19 }
 0xc7a   :  { %v2777_v26 = vunpack.c.l.b16 %v2773_v42 }
 0xc7c   :  { %v2778_v15 = vrot.slane %v2777_v26, 7 }
 0xc7e   :  { %v2780_v61 = vsel %vm2779_vm3, %v2778_v15, %v2776_v20 }
 0xc7f   :  { %v2781_v48 = vpack.c.b16 %v2780_v61, %v2780_v61 }
 0xc81   :  { %2816 = vmatmul.mubr.bf16.vlgmr.msra.gmra.mrb[8].mxu0 %v2781_v48  ;;  %4231 = vmatmul.mubr.bf16.vlgmr.msra.gmra.mrb[20].mxu1 %v2781_v48  ;;  %v2918_v48 = vrot.slane %v6229_v21, 7 }
 0xc82   :  { %2936 = vmatpush1.bf16.msra.mxu0 %v6065_v47  ;;  %4235 = vmatpush3.bf16.msra.mxu1 %v6069_v28 }
 0xc83   :  { %2937 = vmatprep.subr.bf16.mxu0 %v6067_v60  ;;  %4236 = vmatprep.subr.bf16.mxu1 %v4862_v18 }
 0xc84   :  { %2967 = vmatprep.mubr.bf16.mxu0 %v4861_v0  ;;  %4250 = vmatprep.mubr.msk.bf16.mxu1 %vm4879_vm12, %v4862_v18 }
 0xc86   :  { %2938 = vmatpush1.bf16.msra.mxu0 %v6073_v1  ;;  %4237 = vmatpush3.bf16.msra.mxu1 %v6081_v8 }
 0xc87   :  { %2939 = vmatprep.subr.bf16.mxu0 %v6078_v2  ;;  %4238 = vmatprep.subr.bf16.mxu1 %v4862_v18 }
 0xc8a   :  { %2940 = vmatpush1.bf16.msra.mxu0 %v6087_v63  ;;  %4239 = vmatpush3.bf16.msra.mxu1 %v6093_v36 }
 0xc8b   :  { %2941 = vmatprep.subr.bf16.mxu0 %v6090_v52  ;;  %4240 = vmatprep.subr.bf16.mxu1 %v4862_v18 }
 0xc8e   :  { %2942 = vmatpush1.bf16.msra.mxu0 %v6097_v6  ;;  %4241 = vmatpush3.bf16.msra.mxu1 %v6103_v24 }
 0xc8f   :  { %2943 = vmatprep.subr.bf16.mxu0 %v6100_v50  ;;  %4242 = vmatprep.subr.bf16.mxu1 %v4862_v18 }
 0xc92   :  { %2944 = vmatpush1.bf16.msra.mxu0 %v6107_v59  ;;  %4243 = vmatpush3.bf16.msra.mxu1 %v6113_v45 }
 0xc93   :  { %2945 = vmatprep.subr.bf16.mxu0 %v6110_v43  ;;  %4244 = vmatprep.subr.bf16.mxu1 %v4862_v18 }
 0xc96   :  { %2946 = vmatpush1.bf16.msra.mxu0 %v6117_v55  ;;  %4245 = vmatpush3.bf16.msra.mxu1 %v6123_v10 }
 0xc97   :  { %2947 = vmatprep.subr.bf16.mxu0 %v6120_v32  ;;  %4246 = vmatprep.subr.bf16.mxu1 %v4862_v18 }
 0xc9a   :  { %2948 = vmatpush1.bf16.msra.mxu0 %v6127_v5  ;;  %4247 = vmatpush3.bf16.msra.mxu1 %v6133_v29 }
 0xc9b   :  { %2949 = vmatprep.subr.bf16.mxu0 %v6130_v31  ;;  %4248 = vmatprep.subr.bf16.mxu1 %v4862_v18 }
 0xc9e   :  { %2950 = vmatpush1.bf16.msra.mxu0 %v6137_v30  ;;  %4249 = vmatpush3.bf16.msra.mxu1 %v6141_v33 }
 0xc9f   :  { %3091 = vmatprep.subr.bf16.mxu0 %v6054_v3  ;;  %4254 = vmatprep.subr.bf16.mxu1 %v4862_v18 }
 0xd54   :  { %v2817_v14 = vpop.f32.mrb[8].mxu0  ;;  %v2858_v17 = vpop.f32.mrb[20].mxu1 }
 0xd55   :  { %v2865_v25 = vrot.slane %v2817_v14, 7  ;;  %v2869_v11 = vadd.f32 %v2817_v14, %v6201_v27  ;;  %v2819_v38 = vpop.f32.mrb[9].mxu0  ;;  %v4232_v53 = vpop.f32.mrb[21].mxu1  ;;  %v2900_v15 = vadd.f32 %v6215_v12, %v2858_v17 }
 0xd56   :  { %v2883_v37 = vrot.slane %v2819_v38, 7  ;;  %v2887_v54 = vadd.f32 %v2819_v38, %v6207_v34  ;;  %v2821_v22 = vpop.f32.mrb[10].mxu0  ;;  %v2861_v44 = vpop.f32.mrb[22].mxu1  ;;  %v2917_v53 = vrot.slane %v6227_v62, 7 }
 0xd57   :  { %v2868_v51 = vadd.f32 %v2865_v25, %v6199_v40  ;;  %v4041_v4 = vmul.f32 -1.442695, %v2869_v11  ;;  %v2822_v16 = vpop.f32.mrb[11].mxu0  ;;  %v4233_v23 = vpop.f32.mrb[23].mxu1  ;;  %v2902_v25 = vrot.slane %v2900_v15, 7 }
 0xd58   :  { %v2886_v9 = vadd.f32 %v2883_v37, %v6204_v49  ;;  %v4043_v57 = vmul.f32 -1.442695, %v2887_v54 }
 0xd59   :  { %v4040_v39 = vmul.f32 -1.442695, %v2868_v51  ;;  %4645 = vpow2.f32 %v4041_v4 }
 0xd5a   :  { %v4042_v41 = vmul.f32 -1.442695, %v2886_v9  ;;  %4647 = vpow2.f32 %v4043_v57 }
 0xd5b   :  { %4649 = vpow2.f32 %v4040_v39 }
 0xd5c   :  { %4651 = vpow2.f32 %v4042_v41 }
 0xd63   :  { %v4646_v7 = vpop.eup %4645 }
 0xd64   :  { %v4648_v58 = vpop.eup %4647  ;;  %v2877_v13 = vadd.f32 1.0, %v4646_v7 }
 0xd65   :  { %v4650_v35 = vpop.eup %4649  ;;  %v2895_v19 = vadd.f32 1.0, %v4648_v58 }
 0xd66   :  { %v4652_v42 = vpop.eup %4651  ;;  %v2876_v26 = vadd.f32 1.0, %v4650_v35  ;;  %4653 = vrcp.f32 %v2877_v13 }
 0xd67   :  { %v2894_v20 = vadd.f32 1.0, %v4652_v42  ;;  %4655 = vrcp.f32 %v2895_v19 }
 0xd68   :  { %4657 = vrcp.f32 %v2876_v26 }
 0xd69   :  { %4659 = vrcp.f32 %v2894_v20 }
 0xd70   :  { %v4654_v61 = vpop.eup %4653 }
 0xd71   :  { %v4656_v14 = vpop.eup %4655  ;;  %v2906_v11 = vmul.f32 %v4654_v61, %v2900_v15 }
 0xd72   :  { %v4658_v38 = vpop.eup %4657  ;;  %v2922_v37 = vmul.f32 %v4656_v14, %v2918_v48  ;;  %v2912_v17 = vsub.f32 1.0, %v4656_v14 }
 0xd73   :  { %v4660_v54 = vpop.eup %4659  ;;  %v2905_v22 = vmul.f32 %v4658_v38, %v2902_v25  ;;  %v2908_v44 = vadd.f32 %v2906_v11, %v6223_v46 }
 0xd74   :  { %v2921_v51 = vmul.f32 %v4660_v54, %v2917_v53  ;;  %v2911_v23 = vsub.f32 1.0, %v4660_v54 }
 0xd75   :  { %v2907_v4 = vadd.f32 %v2905_v22, %v6221_v56  ;;  %4661 = vtanh.f32 %v2908_v44 }
 0xd77   :  { %4663 = vtanh.f32 %v2907_v4 }
 0xd7f   :  { %v4662_v16 = vpop.eup %4661 }
 0xd80   :  { %v2914_v21 = vmul.f32 %v4662_v16, %v2912_v17 }
 0xd81   :  { %v4664_v9 = vpop.eup %4663 }
 0xd82   :  { %v2913_v57 = vmul.f32 %v4664_v9, %v2911_v23  ;;  %v6280_v39 = vadd.f32 %v2922_v37, %v2914_v21 }
 0xd84   :  { %v6282_v41 = vadd.f32 %v2921_v51, %v2913_v57  ;;  %v2926_v7 = vpack.c.bf16 %v6280_v39, %v6280_v39 }
 0xd86   :  { %v2925_v62 = vpack.c.bf16 %v6282_v41, %v6282_v41  ;;  %v2930_v13 = vunpack.c.l.b16 %v2926_v7 }
 0xd88   :  { %v2929_v58 = vunpack.c.l.b16 %v2925_v62 }
 0xd8a   :  { %v2931_v35 = vrot.slane %v2929_v58, 1 }
 0xd8c   :  { %v2932_v19 = vsel %vm2779_vm3, %v2930_v13, %v2931_v35 }
 0xd8d   :  { %v2933_v42 = vpack.c.b16 %v2932_v19, %v2932_v19 }
 0xd8f   :  { %2968 = vmatmul.mubr.bf16.vlgmr.msra.gmra.mrb[12].mxu0 %v2933_v42  ;;  %4251 = vmatmul.mubr.bf16.vlgmr.msra.gmra.mrb[24].mxu1 %v2933_v42 }
 0xd90   :  { %3092 = vmatpush1.bf16.msra.mxu0 %v6065_v47  ;;  %4255 = vmatpush3.bf16.msra.mxu1 %v6069_v28 }
 0xd91   :  { %3093 = vmatprep.subr.bf16.mxu0 %v6067_v60  ;;  %4256 = vmatprep.subr.bf16.mxu1 %v4862_v18 }
 0xd92   :  { %3123 = vmatprep.mubr.bf16.mxu0 %v4861_v0  ;;  %4270 = vmatprep.mubr.msk.bf16.mxu1 %vm4879_vm12, %v4862_v18 }
 0xd94   :  { %3094 = vmatpush1.bf16.msra.mxu0 %v6073_v1  ;;  %4257 = vmatpush3.bf16.msra.mxu1 %v6081_v8 }
 0xd95   :  { %3095 = vmatprep.subr.bf16.mxu0 %v6078_v2  ;;  %4258 = vmatprep.subr.bf16.mxu1 %v4862_v18 }
 0xd98   :  { %3096 = vmatpush1.bf16.msra.mxu0 %v6087_v63  ;;  %4259 = vmatpush3.bf16.msra.mxu1 %v6093_v36 }
 0xd99   :  { %3097 = vmatprep.subr.bf16.mxu0 %v6090_v52  ;;  %4260 = vmatprep.subr.bf16.mxu1 %v4862_v18 }
 0xd9c   :  { %3098 = vmatpush1.bf16.msra.mxu0 %v6097_v6  ;;  %4261 = vmatpush3.bf16.msra.mxu1 %v6103_v24 }
 0xd9d   :  { %3099 = vmatprep.subr.bf16.mxu0 %v6100_v50  ;;  %4262 = vmatprep.subr.bf16.mxu1 %v4862_v18 }
 0xda0   :  { %3100 = vmatpush1.bf16.msra.mxu0 %v6107_v59  ;;  %4263 = vmatpush3.bf16.msra.mxu1 %v6113_v45 }
 0xda1   :  { %3101 = vmatprep.subr.bf16.mxu0 %v6110_v43  ;;  %4264 = vmatprep.subr.bf16.mxu1 %v4862_v18 }
 0xda4   :  { %3102 = vmatpush1.bf16.msra.mxu0 %v6117_v55  ;;  %4265 = vmatpush3.bf16.msra.mxu1 %v6123_v10 }
 0xda5   :  { %3103 = vmatprep.subr.bf16.mxu0 %v6120_v32  ;;  %4266 = vmatprep.subr.bf16.mxu1 %v4862_v18 }
 0xda8   :  { %3104 = vmatpush1.bf16.msra.mxu0 %v6127_v5  ;;  %4267 = vmatpush3.bf16.msra.mxu1 %v6133_v29 }
 0xda9   :  { %3105 = vmatprep.subr.bf16.mxu0 %v6130_v31  ;;  %4268 = vmatprep.subr.bf16.mxu1 %v4862_v18 }
 0xdac   :  { %3106 = vmatpush1.bf16.msra.mxu0 %v6137_v30  ;;  %4269 = vmatpush3.bf16.msra.mxu1 %v6141_v33 }
 0xdad   :  { %3247 = vmatprep.subr.bf16.mxu0 %v6054_v3  ;;  %4274 = vmatprep.subr.bf16.mxu1 %v4862_v18 }
 0xe62   :  { %v2969_v26 = vpop.f32.mrb[12].mxu0  ;;  %v3010_v20 = vpop.f32.mrb[24].mxu1 }
 0xe63   :  { %v3017_v15 = vrot.slane %v2969_v26, 6  ;;  %v3018_v61 = vrot.slane %v2969_v26, 7  ;;  %v2971_v48 = vpop.f32.mrb[13].mxu0  ;;  %v4252_v14 = vpop.f32.mrb[25].mxu1  ;;  %v3054_v42 = vadd.f32 %v6215_v12, %v3010_v20 }
 0xe64   :  { %v3036_v25 = vrot.slane %v2971_v48, 6  ;;  %v3037_v11 = vrot.slane %v2971_v48, 7  ;;  %v2973_v38 = vpop.f32.mrb[14].mxu0  ;;  %v3013_v53 = vpop.f32.mrb[26].mxu1  ;;  %v3072_v14 = vrot.slane %v6282_v41, 7 }
 0xe65   :  { %v3021_v37 = vadd.f32 %v3017_v15, %v6199_v40  ;;  %v3022_v54 = vadd.f32 %v3018_v61, %v6201_v27  ;;  %v2974_v22 = vpop.f32.mrb[15].mxu0  ;;  %v4253_v44 = vpop.f32.mrb[27].mxu1  ;;  %v3056_v26 = vrot.slane %v3054_v42, 6  ;;  %v3057_v61 = vrot.slane %v3054_v42, 7 }
 0xe66   :  { %v3040_v51 = vadd.f32 %v3036_v25, %v6204_v49  ;;  %v3041_v4 = vadd.f32 %v3037_v11, %v6207_v34  ;;  %v3073_v38 = vrot.slane %v6280_v39, 7 }
 0xe67   :  { %v4044_v17 = vmul.f32 -1.442695, %v3021_v37  ;;  %v4045_v16 = vmul.f32 -1.442695, %v3022_v54 }
 0xe68   :  { %v4046_v23 = vmul.f32 -1.442695, %v3040_v51  ;;  %v4047_v21 = vmul.f32 -1.442695, %v3041_v4 }
 0xe69   :  { %4665 = vpow2.f32 %v4044_v17 }
 0xe6a   :  { %4667 = vpow2.f32 %v4045_v16 }
 0xe6b   :  { %4669 = vpow2.f32 %v4046_v23 }
 0xe6c   :  { %4671 = vpow2.f32 %v4047_v21 }
 0xe73   :  { %v4666_v9 = vpop.eup %4665 }
 0xe74   :  { %v4668_v57 = vpop.eup %4667  ;;  %v3029_v62 = vadd.f32 1.0, %v4666_v9 }
 0xe75   :  { %v4670_v7 = vpop.eup %4669  ;;  %v3030_v58 = vadd.f32 1.0, %v4668_v57 }
 0xe76   :  { %v4672_v13 = vpop.eup %4671  ;;  %4673 = vrcp.f32 %v3029_v62  ;;  %v3048_v35 = vadd.f32 1.0, %v4670_v7 }
 0xe77   :  { %4675 = vrcp.f32 %v3030_v58  ;;  %v3049_v19 = vadd.f32 1.0, %v4672_v13 }
 0xe78   :  { %4677 = vrcp.f32 %v3048_v35 }
 0xe79   :  { %4679 = vrcp.f32 %v3049_v19 }
 0xe80   :  { %v4674_v15 = vpop.eup %4673 }
 0xe81   :  { %v4676_v48 = vpop.eup %4675  ;;  %v3060_v25 = vmul.f32 %v4674_v15, %v3056_v26 }
 0xe82   :  { %v4678_v11 = vpop.eup %4677  ;;  %v3061_v53 = vmul.f32 %v4676_v48, %v3057_v61 }
 0xe83   :  { %v4680_v37 = vpop.eup %4679  ;;  %v3062_v54 = vadd.f32 %v3060_v25, %v6221_v56  ;;  %v3076_v22 = vmul.f32 %v4678_v11, %v3072_v14  ;;  %v3066_v20 = vsub.f32 1.0, %v4678_v11 }
 0xe84   :  { %v3063_v44 = vadd.f32 %v3061_v53, %v6223_v46  ;;  %v3077_v51 = vmul.f32 %v4680_v37, %v3073_v38  ;;  %v3067_v17 = vsub.f32 1.0, %v4680_v37 }
 0xe85   :  { %4681 = vtanh.f32 %v3062_v54 }
 0xe86   :  { %4683 = vtanh.f32 %v3063_v44 }
 0xe8f   :  { %v4682_v4 = vpop.eup %4681 }
 0xe90   :  { %v4684_v16 = vpop.eup %4683  ;;  %v3068_v23 = vmul.f32 %v4682_v4, %v3066_v20 }
 0xe91   :  { %v3069_v41 = vmul.f32 %v4684_v16, %v3067_v17 }
 0xe92   :  { %v6333_v21 = vadd.f32 %v3076_v22, %v3068_v23 }
 0xe93   :  { %v6335_v9 = vadd.f32 %v3077_v51, %v3069_v41 }
 0xe94   :  { %v3080_v39 = vpack.c.bf16 %v6333_v21, %v6333_v21 }
 0xe95   :  { %v3081_v57 = vpack.c.bf16 %v6335_v9, %v6335_v9 }
 0xe96   :  { %v3084_v62 = vunpack.c.l.b16 %v3080_v39 }
 0xe97   :  { %v3085_v7 = vunpack.c.l.b16 %v3081_v57 }
 0xe98   :  { %v3086_v58 = vrot.slane %v3084_v62, 2 }
 0xe99   :  { %v3087_v13 = vrot.slane %v3085_v7, 1  ;;  %v3228_v7 = vrot.slane %v6333_v21, 7 }
 0xe9b   :  { %v3088_v35 = vsel %vm2779_vm3, %v3087_v13, %v3086_v58 }
 0xe9c   :  { %v3089_v19 = vpack.c.b16 %v3088_v35, %v3088_v35  ;;  %v3229_v35 = vrot.slane %v6335_v9, 7 }
 0xe9e   :  { %3124 = vmatmul.mubr.bf16.vlgmr.msra.gmra.mrb[16].mxu0 %v3089_v19  ;;  %4271 = vmatmul.mubr.bf16.vlgmr.msra.gmra.mrb[28].mxu1 %v3089_v19 }
 0xe9f   :  { %3248 = vmatpush1.bf16.msra.mxu0 %v6065_v47  ;;  %4275 = vmatpush3.bf16.msra.mxu1 %v6069_v28 }
 0xea0   :  { %3249 = vmatprep.subr.bf16.mxu0 %v6067_v60  ;;  %4276 = vmatprep.subr.bf16.mxu1 %v4862_v18 }
 0xea1   :  { %3279 = vmatprep.mubr.bf16.mxu0 %v4861_v0  ;;  %4290 = vmatprep.mubr.msk.bf16.mxu1 %vm4879_vm12, %v4862_v18 }
 0xea3   :  { %3250 = vmatpush1.bf16.msra.mxu0 %v6073_v1  ;;  %4277 = vmatpush3.bf16.msra.mxu1 %v6081_v8 }
 0xea4   :  { %3251 = vmatprep.subr.bf16.mxu0 %v6078_v2  ;;  %4278 = vmatprep.subr.bf16.mxu1 %v4862_v18 }
 0xea7   :  { %3252 = vmatpush1.bf16.msra.mxu0 %v6087_v63  ;;  %4279 = vmatpush3.bf16.msra.mxu1 %v6093_v36 }
 0xea8   :  { %3253 = vmatprep.subr.bf16.mxu0 %v6090_v52  ;;  %4280 = vmatprep.subr.bf16.mxu1 %v4862_v18 }
 0xeab   :  { %3254 = vmatpush1.bf16.msra.mxu0 %v6097_v6  ;;  %4281 = vmatpush3.bf16.msra.mxu1 %v6103_v24 }
 0xeac   :  { %3255 = vmatprep.subr.bf16.mxu0 %v6100_v50  ;;  %4282 = vmatprep.subr.bf16.mxu1 %v4862_v18 }
 0xeaf   :  { %3256 = vmatpush1.bf16.msra.mxu0 %v6107_v59  ;;  %4283 = vmatpush3.bf16.msra.mxu1 %v6113_v45 }
 0xeb0   :  { %3257 = vmatprep.subr.bf16.mxu0 %v6110_v43  ;;  %4284 = vmatprep.subr.bf16.mxu1 %v4862_v18 }
 0xeb3   :  { %3258 = vmatpush1.bf16.msra.mxu0 %v6117_v55  ;;  %4285 = vmatpush3.bf16.msra.mxu1 %v6123_v10 }
 0xeb4   :  { %3259 = vmatprep.subr.bf16.mxu0 %v6120_v32  ;;  %4286 = vmatprep.subr.bf16.mxu1 %v4862_v18 }
 0xeb7   :  { %3260 = vmatpush1.bf16.msra.mxu0 %v6127_v5  ;;  %4287 = vmatpush3.bf16.msra.mxu1 %v6133_v29 }
 0xeb8   :  { %3261 = vmatprep.subr.bf16.mxu0 %v6130_v31  ;;  %4288 = vmatprep.subr.bf16.mxu1 %v4862_v18 }
 0xebb   :  { %3262 = vmatpush1.bf16.msra.mxu0 %v6137_v30  ;;  %4289 = vmatpush3.bf16.msra.mxu1 %v6141_v33 }
 0xebc   :  { %3403 = vmatprep.subr.bf16.mxu0 %v6054_v3  ;;  %4294 = vmatprep.subr.bf16.mxu1 %v4862_v18 }
 0xf71   :  { %v3125_v47 = vpop.f32.mrb[16].mxu0  ;;  %v3166_v60 = vpop.f32.mrb[28].mxu1 }
 0xf72   :  { %v3173_v28 = vrot.slane %v3125_v47, 5  ;;  %v3174_v1 = vrot.slane %v3125_v47, 6  ;;  %v3127_v2 = vpop.f32.mrb[17].mxu0  ;;  %v4272_v8 = vpop.f32.mrb[29].mxu1  ;;  %v3210_v23 = vadd.f32 %v6215_v12, %v3166_v60 }
 0xf73   :  { %v3192_v63 = vrot.slane %v3127_v2, 5  ;;  %v3193_v52 = vrot.slane %v3127_v2, 6  ;;  %v3129_v42 = vpop.f32.mrb[18].mxu0  ;;  %v3169_v26 = vpop.f32.mrb[30].mxu1 }
 0xf74   :  { %v3177_v15 = vadd.f32 %v3173_v28, %v6199_v40  ;;  %v3178_v61 = vadd.f32 %v3174_v1, %v6201_v27  ;;  %v3130_v48 = vpop.f32.mrb[19].mxu0  ;;  %v4273_v14 = vpop.f32.mrb[31].mxu1  ;;  %v3212_v41 = vrot.slane %v3210_v23, 5  ;;  %v3213_v57 = vrot.slane %v3210_v23, 6 }
 0xf75   :  { %v3196_v3 = vadd.f32 %v3192_v63, %v6204_v49  ;;  %v3197_v25 = vadd.f32 %v3193_v52, %v6207_v34 }
 0xf76   :  { %v4048_v11 = vmul.f32 -1.442695, %v3177_v15  ;;  %v4049_v38 = vmul.f32 -1.442695, %v3178_v61 }
 0xf77   :  { %v4050_v53 = vmul.f32 -1.442695, %v3196_v3  ;;  %v4051_v37 = vmul.f32 -1.442695, %v3197_v25 }
 0xf78   :  { %4685 = vpow2.f32 %v4048_v11 }
 0xf79   :  { %4687 = vpow2.f32 %v4049_v38 }
 0xf7a   :  { %4689 = vpow2.f32 %v4050_v53 }
 0xf7b   :  { %4691 = vpow2.f32 %v4051_v37  ;;  %v6395_v37 = vld [vmem:[#allocation2] ss:$12 sps:$4 sm:$0xff]  }
 0xf82   :  { %v4686_v54 = vpop.eup %4685 }
 0xf83   :  { %v4688_v22 = vpop.eup %4687  ;;  %v3185_v44 = vadd.f32 1.0, %v4686_v54  ;;  %v6398_v54 = vld [vmem:[#allocation2 + $0x8] ss:$12 sps:$4 sm:$0xff]  }
 0xf84   :  { %v4690_v51 = vpop.eup %4689  ;;  %v3186_v20 = vadd.f32 1.0, %v4688_v22  ;;  %v6401_v22 = vld [vmem:[#allocation2 + $0x1c] ss:$12 sps:$4 sm:$0xff]  }
 0xf85   :  { %v4692_v4 = vpop.eup %4691  ;;  %4693 = vrcp.f32 %v3185_v44  ;;  %v3204_v17 = vadd.f32 1.0, %v4690_v51  ;;  %v6408_v44 = vld [vmem:[#allocation2 + $0x18] ss:$12 sps:$4 sm:$0xff]   ;;  %v6411_v51 = vld [vmem:[#allocation2 + $0x20] ss:$12 sps:$4 sm:$0xff]  }
 0xf86   :  { %4695 = vrcp.f32 %v3186_v20  ;;  %v3205_v16 = vadd.f32 1.0, %v4692_v4  ;;  %v6414_v20 = vld [vmem:[#allocation2 + $0x34] ss:$12 sps:$4 sm:$0xff]   ;;  %v6418_v4 = vld [vmem:[#allocation2 + $0x30] ss:$12 sps:$4 sm:$0xff]  }
 0xf87   :  { %4697 = vrcp.f32 %v3204_v17  ;;  %v6422_v17 = vld [vmem:[#allocation2 + $0x4c] ss:$12 sps:$4 sm:$0xff]  }
 0xf88   :  { %4699 = vrcp.f32 %v3205_v16 }
 0xf8f   :  { %v4694_v39 = vpop.eup %4693 }
 0xf90   :  { %v4696_v62 = vpop.eup %4695  ;;  %v3216_v58 = vmul.f32 %v4694_v39, %v3212_v41 }
 0xf91   :  { %v4698_v13 = vpop.eup %4697  ;;  %v3217_v19 = vmul.f32 %v4696_v62, %v3213_v57 }
 0xf92   :  { %v4700_v47 = vpop.eup %4699  ;;  %v3218_v28 = vadd.f32 %v3216_v58, %v6221_v56  ;;  %v3232_v1 = vmul.f32 %v4698_v13, %v3228_v7  ;;  %v3222_v60 = vsub.f32 1.0, %v4698_v13 }
 0xf93   :  { %v3219_v2 = vadd.f32 %v3217_v19, %v6223_v46  ;;  %v3233_v8 = vmul.f32 %v4700_v47, %v3229_v35  ;;  %v3223_v52 = vsub.f32 1.0, %v4700_v47 }
 0xf94   :  { %4701 = vtanh.f32 %v3218_v28 }
 0xf95   :  { %4703 = vtanh.f32 %v3219_v2 }
 0xf9e   :  { %v4702_v63 = vpop.eup %4701 }
 0xf9f   :  { %v4704_v42 = vpop.eup %4703  ;;  %v3224_v26 = vmul.f32 %v4702_v63, %v3222_v60 }
 0xfa0   :  { %v3225_v21 = vmul.f32 %v4704_v42, %v3223_v52 }
 0xfa1   :  { %v6386_v15 = vadd.f32 %v3232_v1, %v3224_v26 }
 0xfa2   :  { %v6388_v61 = vadd.f32 %v3233_v8, %v3225_v21 }
 0xfa3   :  { %v3236_v9 = vpack.c.bf16 %v6386_v15, %v6386_v15  ;;  %v3384_v42 = vrot.slane %v6386_v15, 7 }
 0xfa4   :  { %v3237_v48 = vpack.c.bf16 %v6388_v61, %v6388_v61 }
 0xfa5   :  { %v3240_v14 = vunpack.c.l.b16 %v3236_v9  ;;  %v3385_v9 = vrot.slane %v6388_v61, 7 }
 0xfa6   :  { %v3241_v3 = vunpack.c.l.b16 %v3237_v48 }
 0xfa7   :  { %v3242_v25 = vrot.slane %v3240_v14, 3 }
 0xfa8   :  { %v3243_v11 = vrot.slane %v3241_v3, 2 }
 0xfaa   :  { %v3244_v38 = vsel %vm2779_vm3, %v3243_v11, %v3242_v25 }
 0xfab   :  { %v3245_v53 = vpack.c.b16 %v3244_v38, %v3244_v38 }
 0xfad   :  { %3280 = vmatmul.mubr.bf16.vlgmr.msra.gmra.mrb[20].mxu0 %v3245_v53  ;;  %4291 = vmatmul.mubr.bf16.vlgmr.msra.gmra.mrb[32].mxu1 %v3245_v53 }
 0xfae   :  { %3404 = vmatpush1.bf16.msra.mxu0 %v6395_v37  ;;  %4295 = vmatpush3.bf16.msra.mxu1 %v6398_v54 }
 0xfaf   :  { %3405 = vmatprep.subr.bf16.mxu0 %v6401_v22  ;;  %4296 = vmatprep.subr.bf16.mxu1 %v4862_v18 }
 0xfb0   :  { %3435 = vmatprep.mubr.bf16.mxu0 %v4861_v0  ;;  %4310 = vmatprep.mubr.msk.bf16.mxu1 %vm4879_vm12, %v4862_v18 }
 0xfb2   :  { %3406 = vmatpush1.bf16.msra.mxu0 %v6408_v44  ;;  %4297 = vmatpush3.bf16.msra.mxu1 %v6411_v51 }
 0xfb3   :  { %3407 = vmatprep.subr.bf16.mxu0 %v6414_v20  ;;  %4298 = vmatprep.subr.bf16.mxu1 %v4862_v18 }
 0xfb6   :  { %3408 = vmatpush1.bf16.msra.mxu0 %v6418_v4  ;;  %4299 = vmatpush3.bf16.msra.mxu1 %v6093_v36  ;;  %v6444_v36 = vld [vmem:[#allocation2 + $0x4] ss:$12 sps:$4 sm:$0xff]  }
 0xfb7   :  { %3409 = vmatprep.subr.bf16.mxu0 %v6422_v17  ;;  %4300 = vmatprep.subr.bf16.mxu1 %v4862_v18 }
 0xfba   :  { %3410 = vmatpush1.bf16.msra.mxu0 %v6097_v6  ;;  %4301 = vmatpush3.bf16.msra.mxu1 %v6103_v24 }
 0xfbb   :  { %3411 = vmatprep.subr.bf16.mxu0 %v6100_v50  ;;  %4302 = vmatprep.subr.bf16.mxu1 %v4862_v18 }
 0xfbe   :  { %3412 = vmatpush1.bf16.msra.mxu0 %v6107_v59  ;;  %4303 = vmatpush3.bf16.msra.mxu1 %v6113_v45 }
 0xfbf   :  { %3413 = vmatprep.subr.bf16.mxu0 %v6110_v43  ;;  %4304 = vmatprep.subr.bf16.mxu1 %v4862_v18 }
 0xfc2   :  { %3414 = vmatpush1.bf16.msra.mxu0 %v6117_v55  ;;  %4305 = vmatpush3.bf16.msra.mxu1 %v6123_v10 }
 0xfc3   :  { %3415 = vmatprep.subr.bf16.mxu0 %v6120_v32  ;;  %4306 = vmatprep.subr.bf16.mxu1 %v4862_v18 }
 0xfc6   :  { %3416 = vmatpush1.bf16.msra.mxu0 %v6127_v5  ;;  %4307 = vmatpush3.bf16.msra.mxu1 %v6133_v29 }
 0xfc7   :  { %3417 = vmatprep.subr.bf16.mxu0 %v6130_v31  ;;  %4308 = vmatprep.subr.bf16.mxu1 %v4862_v18 }
 0xfca   :  { %3418 = vmatpush1.bf16.msra.mxu0 %v6137_v30  ;;  %4309 = vmatpush3.bf16.msra.mxu1 %v6141_v33 }
 0xfcb   :  { %3559 = vmatprep.subr.bf16.mxu0 %v6444_v36  ;;  %4314 = vmatprep.subr.bf16.mxu1 %v4862_v18 }
0x1080   :  { %v3281_v6 = vpop.f32.mrb[20].mxu0  ;;  %v3322_v50 = vpop.f32.mrb[32].mxu1 }
0x1081   :  { %v3329_v24 = vrot.slane %v3281_v6, 4  ;;  %v3330_v59 = vrot.slane %v3281_v6, 5  ;;  %v3283_v43 = vpop.f32.mrb[21].mxu0  ;;  %v4292_v45 = vpop.f32.mrb[33].mxu1  ;;  %v3366_v2 = vadd.f32 %v6215_v12, %v3322_v50 }
0x1082   :  { %v3348_v55 = vrot.slane %v3283_v43, 4  ;;  %v3349_v32 = vrot.slane %v3283_v43, 5  ;;  %v3285_v10 = vpop.f32.mrb[22].mxu0  ;;  %v3325_v5 = vpop.f32.mrb[34].mxu1 }
0x1083   :  { %v3333_v31 = vadd.f32 %v3329_v24, %v6199_v40  ;;  %v3334_v29 = vadd.f32 %v3330_v59, %v6201_v27  ;;  %v3286_v30 = vpop.f32.mrb[23].mxu0  ;;  %v4293_v33 = vpop.f32.mrb[35].mxu1  ;;  %v3368_v8 = vrot.slane %v3366_v2, 4  ;;  %v3369_v63 = vrot.slane %v3366_v2, 5 }
0x1084   :  { %v3352_v16 = vadd.f32 %v3348_v55, %v6204_v49  ;;  %v3353_v23 = vadd.f32 %v3349_v32, %v6207_v34  ;;  %v6478_v30 = vld [vmem:[#allocation2 + $0x38] ss:$12 sps:$4 sm:$0xff]   ;;  %v6483_v33 = vld [vmem:[#allocation2 + $0x48] ss:$12 sps:$4 sm:$0xff]  }
0x1085   :  { %v4052_v41 = vmul.f32 -1.442695, %v3333_v31  ;;  %v4053_v39 = vmul.f32 -1.442695, %v3334_v29 }
0x1086   :  { %v4054_v57 = vmul.f32 -1.442695, %v3352_v16  ;;  %v4055_v62 = vmul.f32 -1.442695, %v3353_v23  ;;  %v6486_v16 = vld [vmem:[#allocation2 + $0x50] ss:$12 sps:$4 sm:$0xff]  }
0x1087   :  { %4705 = vpow2.f32 %v4052_v41  ;;  %v6489_v23 = vld [vmem:[#allocation2 + $0x64] ss:$12 sps:$4 sm:$0xff]   ;;  %v6493_v41 = vld [vmem:[#allocation2 + $0x60] ss:$12 sps:$4 sm:$0xff]  }
0x1088   :  { %4707 = vpow2.f32 %v4053_v39  ;;  %v6496_v39 = vld [vmem:[#allocation2 + $0x68] ss:$12 sps:$4 sm:$0xff]  }
0x1089   :  { %4709 = vpow2.f32 %v4054_v57  ;;  %v6499_v57 = vld [vmem:[#allocation2 + $0x7c] ss:$12 sps:$4 sm:$0xff]  }
0x108a   :  { %4711 = vpow2.f32 %v4055_v62  ;;  %v6503_v62 = vld [vmem:[#allocation2 + $0x78] ss:$12 sps:$4 sm:$0xff]  }
0x1091   :  { %v4706_v7 = vpop.eup %4705 }
0x1092   :  { %v4708_v58 = vpop.eup %4707  ;;  %v3341_v13 = vadd.f32 1.0, %v4706_v7  ;;  %v6506_v7 = vld [vmem:[#allocation2 + $0x80] ss:$12 sps:$4 sm:$0xff]  }
0x1093   :  { %v4710_v35 = vpop.eup %4709  ;;  %v3342_v19 = vadd.f32 1.0, %v4708_v58  ;;  %v6509_v58 = vld [vmem:[#allocation2 + $0x94] ss:$12 sps:$4 sm:$0xff]  }
0x1094   :  { %v4712_v47 = vpop.eup %4711  ;;  %4713 = vrcp.f32 %v3341_v13  ;;  %v3360_v28 = vadd.f32 1.0, %v4710_v35  ;;  %v6513_v13 = vld [vmem:[#allocation2 + $0x90] ss:$12 sps:$4 sm:$0xff]   ;;  %v6516_v35 = vld [vmem:[#allocation2 + $0x98] ss:$12 sps:$4 sm:$0xff]  }
0x1095   :  { %4715 = vrcp.f32 %v3342_v19  ;;  %v3361_v1 = vadd.f32 1.0, %v4712_v47  ;;  %v6519_v19 = vld [vmem:[#allocation2 + $0xac] ss:$12 sps:$4 sm:$0xff]   ;;  %v6523_v47 = vld [vmem:[#allocation2 + $0xa8] ss:$12 sps:$4 sm:$0xff]  }
0x1096   :  { %4717 = vrcp.f32 %v3360_v28  ;;  %v6526_v28 = vld [vmem:[#allocation2 + $0xb0] ss:$12 sps:$4 sm:$0xff]  }
0x1097   :  { %4719 = vrcp.f32 %v3361_v1 }
0x109e   :  { %v4714_v60 = vpop.eup %4713 }
0x109f   :  { %v4716_v52 = vpop.eup %4715  ;;  %v3372_v26 = vmul.f32 %v4714_v60, %v3368_v8 }
0x10a0   :  { %v4718_v21 = vpop.eup %4717  ;;  %v3373_v48 = vmul.f32 %v4716_v52, %v3369_v63 }
0x10a1   :  { %v4720_v14 = vpop.eup %4719  ;;  %v3374_v3 = vadd.f32 %v3372_v26, %v6221_v56  ;;  %v3388_v25 = vmul.f32 %v4718_v21, %v3384_v42  ;;  %v3378_v12 = vsub.f32 1.0, %v4718_v21 }
0x10a2   :  { %v3375_v11 = vadd.f32 %v3373_v48, %v6223_v46  ;;  %v3389_v38 = vmul.f32 %v4720_v14, %v3385_v9  ;;  %v3379_v6 = vsub.f32 1.0, %v4720_v14 }
0x10a3   :  { %4721 = vtanh.f32 %v3374_v3 }
0x10a4   :  { %4723 = vtanh.f32 %v3375_v11 }
0x10ad   :  { %v4722_v53 = vpop.eup %4721 }
0x10ae   :  { %v4724_v50 = vpop.eup %4723  ;;  %v3380_v24 = vmul.f32 %v4722_v53, %v3378_v12 }
0x10af   :  { %v3381_v15 = vmul.f32 %v4724_v50, %v3379_v6 }
0x10b0   :  { %v6457_v59 = vadd.f32 %v3388_v25, %v3380_v24 }
0x10b1   :  { %v6459_v43 = vadd.f32 %v3389_v38, %v3381_v15 }
0x10b2   :  { %v3392_v61 = vpack.c.bf16 %v6457_v59, %v6457_v59 }
0x10b3   :  { %v3393_v45 = vpack.c.bf16 %v6459_v43, %v6459_v43 }
0x10b4   :  { %v3396_v55 = vunpack.c.l.b16 %v3392_v61 }
0x10b5   :  { %v3397_v32 = vunpack.c.l.b16 %v3393_v45 }
0x10b6   :  { %v3398_v10 = vrot.slane %v3396_v55, 4 }
0x10b7   :  { %v3399_v5 = vrot.slane %v3397_v32, 3 }
0x10b9   :  { %v3400_v31 = vsel %vm2779_vm3, %v3399_v5, %v3398_v10  ;;  %v6538_v5 = vld [vmem:[%s6671_s7] ss:$0 sm:$0xff] }
0x10ba   :  { %v3401_v29 = vpack.c.b16 %v3400_v31, %v3400_v31 }
0x10bc   :  { %3436 = vmatmul.mubr.bf16.vlgmr.msra.gmra.mrb[24].mxu0 %v3401_v29  ;;  %4311 = vmatmul.mubr.bf16.vlgmr.msra.gmra.mrb[36].mxu1 %v3401_v29 }
0x10bd   :  { %3560 = vmatpush1.bf16.msra.mxu0 %v6395_v37  ;;  %4315 = vmatpush3.bf16.msra.mxu1 %v6398_v54 }
0x10be   :  { %3561 = vmatprep.subr.bf16.mxu0 %v6401_v22  ;;  %4316 = vmatprep.subr.bf16.mxu1 %v4862_v18 }
0x10bf   :  { %3591 = vmatprep.mubr.bf16.mxu0 %v4861_v0  ;;  %4330 = vmatprep.mubr.msk.bf16.mxu1 %vm4879_vm12, %v4862_v18 }
0x10c1   :  { %3562 = vmatpush1.bf16.msra.mxu0 %v6408_v44  ;;  %4317 = vmatpush3.bf16.msra.mxu1 %v6411_v51 }
0x10c2   :  { %3563 = vmatprep.subr.bf16.mxu0 %v6414_v20  ;;  %4318 = vmatprep.subr.bf16.mxu1 %v4862_v18 }
0x10c5   :  { %3564 = vmatpush1.bf16.msra.mxu0 %v6418_v4  ;;  %4319 = vmatpush3.bf16.msra.mxu1 %v6478_v30 }
0x10c6   :  { %3565 = vmatprep.subr.bf16.mxu0 %v6422_v17  ;;  %4320 = vmatprep.subr.bf16.mxu1 %v4862_v18 }
0x10c9   :  { %3566 = vmatpush1.bf16.msra.mxu0 %v6483_v33  ;;  %4321 = vmatpush3.bf16.msra.mxu1 %v6486_v16 }
0x10ca   :  { %3567 = vmatprep.subr.bf16.mxu0 %v6489_v23  ;;  %4322 = vmatprep.subr.bf16.mxu1 %v4862_v18 }
0x10cd   :  { %3568 = vmatpush1.bf16.msra.mxu0 %v6493_v41  ;;  %4323 = vmatpush3.bf16.msra.mxu1 %v6496_v39 }
0x10ce   :  { %3569 = vmatprep.subr.bf16.mxu0 %v6499_v57  ;;  %4324 = vmatprep.subr.bf16.mxu1 %v4862_v18 }
0x10d1   :  { %3570 = vmatpush1.bf16.msra.mxu0 %v6503_v62  ;;  %4325 = vmatpush3.bf16.msra.mxu1 %v6506_v7 }
0x10d2   :  { %3571 = vmatprep.subr.bf16.mxu0 %v6509_v58  ;;  %4326 = vmatprep.subr.bf16.mxu1 %v4862_v18 }
0x10d5   :  { %3572 = vmatpush1.bf16.msra.mxu0 %v6513_v13  ;;  %4327 = vmatpush3.bf16.msra.mxu1 %v6516_v35 }
0x10d6   :  { %3573 = vmatprep.subr.bf16.mxu0 %v6519_v19  ;;  %4328 = vmatprep.subr.bf16.mxu1 %v4862_v18 }
0x10d9   :  { %3574 = vmatpush1.bf16.msra.mxu0 %v6523_v47  ;;  %4329 = vmatpush3.bf16.msra.mxu1 %v6526_v28 }
0x10da   :  { %3715 = vmatprep.subr.bf16.mxu0 %v6444_v36  ;;  %4334 = vmatprep.subr.bf16.mxu1 %v4862_v18 }
0x118f   :  { %v3437_v1 = vpop.f32.mrb[24].mxu0  ;;  %v3478_v2 = vpop.f32.mrb[36].mxu1 }
0x1190   :  { %v3485_v8 = vrot.slane %v3437_v1, 3  ;;  %v3486_v60 = vrot.slane %v3437_v1, 4  ;;  %v3439_v63 = vpop.f32.mrb[25].mxu0  ;;  %v4312_v52 = vpop.f32.mrb[37].mxu1  ;;  %v3522_v31 = vadd.f32 %v6538_v5, %v3478_v2 }
0x1191   :  { %v3504_v42 = vrot.slane %v3439_v63, 3  ;;  %v3505_v26 = vrot.slane %v3439_v63, 4  ;;  %v3441_v21 = vpop.f32.mrb[26].mxu0  ;;  %v3481_v9 = vpop.f32.mrb[38].mxu1  ;;  %v3540_v63 = vrot.slane %v6457_v59, 7 }
0x1192   :  { %v3489_v48 = vadd.f32 %v3485_v8, %v6199_v40  ;;  %v3490_v14 = vadd.f32 %v3486_v60, %v6201_v27  ;;  %v3442_v3 = vpop.f32.mrb[27].mxu0  ;;  %v4313_v25 = vpop.f32.mrb[39].mxu1  ;;  %v3524_v29 = vrot.slane %v3522_v31, 3  ;;  %v3525_v8 = vrot.slane %v3522_v31, 4 }
0x1193   :  { %v3508_v36 = vadd.f32 %v3504_v42, %v6204_v49  ;;  %v3509_v11 = vadd.f32 %v3505_v26, %v6207_v34  ;;  %v3541_v26 = vrot.slane %v6459_v43, 7 }
0x1194   :  { %v4056_v38 = vmul.f32 -1.442695, %v3489_v48  ;;  %v4057_v12 = vmul.f32 -1.442695, %v3490_v14 }
0x1195   :  { %v4058_v53 = vmul.f32 -1.442695, %v3508_v36  ;;  %v4059_v6 = vmul.f32 -1.442695, %v3509_v11 }
0x1196   :  { %4725 = vpow2.f32 %v4056_v38 }
0x1197   :  { %4727 = vpow2.f32 %v4057_v12 }
0x1198   :  { %4729 = vpow2.f32 %v4058_v53 }
0x1199   :  { %4731 = vpow2.f32 %v4059_v6 }
0x11a0   :  { %v4726_v50 = vpop.eup %4725 }
0x11a1   :  { %v4728_v24 = vpop.eup %4727  ;;  %v3497_v15 = vadd.f32 1.0, %v4726_v50 }
0x11a2   :  { %v4730_v61 = vpop.eup %4729  ;;  %v3498_v45 = vadd.f32 1.0, %v4728_v24 }
0x11a3   :  { %v4732_v55 = vpop.eup %4731  ;;  %4733 = vrcp.f32 %v3497_v15  ;;  %v3516_v32 = vadd.f32 1.0, %v4730_v61 }
0x11a4   :  { %4735 = vrcp.f32 %v3498_v45  ;;  %v3517_v10 = vadd.f32 1.0, %v4732_v55 }
0x11a5   :  { %4737 = vrcp.f32 %v3516_v32 }
0x11a6   :  { %4739 = vrcp.f32 %v3517_v10 }
0x11ad   :  { %v4734_v1 = vpop.eup %4733 }
0x11ae   :  { %v4736_v60 = vpop.eup %4735  ;;  %v3528_v52 = vmul.f32 %v4734_v1, %v3524_v29 }
0x11af   :  { %v4738_v42 = vpop.eup %4737  ;;  %v3529_v21 = vmul.f32 %v4736_v60, %v3525_v8 }
0x11b0   :  { %v4740_v9 = vpop.eup %4739  ;;  %v3530_v48 = vadd.f32 %v3528_v52, %v6221_v56  ;;  %v3544_v14 = vmul.f32 %v4738_v42, %v3540_v63  ;;  %v3534_v2 = vsub.f32 1.0, %v4738_v42 }
0x11b1   :  { %v3531_v3 = vadd.f32 %v3529_v21, %v6223_v46  ;;  %v3545_v25 = vmul.f32 %v4740_v9, %v3541_v26  ;;  %v3535_v11 = vsub.f32 1.0, %v4740_v9 }
0x11b2   :  { %4741 = vtanh.f32 %v3530_v48 }
0x11b3   :  { %4743 = vtanh.f32 %v3531_v3 }
0x11bc   :  { %v4742_v36 = vpop.eup %4741 }
0x11bd   :  { %v4744_v38 = vpop.eup %4743  ;;  %v3536_v12 = vmul.f32 %v4742_v36, %v3534_v2 }
0x11be   :  { %v3537_v59 = vmul.f32 %v4744_v38, %v3535_v11 }
0x11bf   :  { %v6545_v53 = vadd.f32 %v3544_v14, %v3536_v12 }
0x11c0   :  { %v6547_v6 = vadd.f32 %v3545_v25, %v3537_v59 }
0x11c1   :  { %v3548_v43 = vpack.c.bf16 %v6545_v53, %v6545_v53  ;;  %v3696_v26 = vrot.slane %v6545_v53, 7 }
0x11c2   :  { %v3549_v50 = vpack.c.bf16 %v6547_v6, %v6547_v6  ;;  %v3697_v48 = vrot.slane %v6547_v6, 7 }
0x11c3   :  { %v3552_v24 = vunpack.c.l.b16 %v3548_v43 }
0x11c4   :  { %v3553_v15 = vunpack.c.l.b16 %v3549_v50 }
0x11c5   :  { %v3554_v61 = vrot.slane %v3552_v24, 5 }
0x11c6   :  { %v3555_v45 = vrot.slane %v3553_v15, 4 }
0x11c8   :  { %v3556_v55 = vsel %vm2779_vm3, %v3555_v45, %v3554_v61 }
0x11c9   :  { %v3557_v32 = vpack.c.b16 %v3556_v55, %v3556_v55 }
0x11cb   :  { %3592 = vmatmul.mubr.bf16.vlgmr.msra.gmra.mrb[28].mxu0 %v3557_v32  ;;  %4331 = vmatmul.mubr.bf16.vlgmr.msra.gmra.mrb[40].mxu1 %v3557_v32 }
0x11cc   :  { %3716 = vmatpush1.bf16.msra.mxu0 %v6395_v37  ;;  %4335 = vmatpush3.bf16.msra.mxu1 %v6398_v54 }
0x11cd   :  { %3717 = vmatprep.subr.bf16.mxu0 %v6401_v22  ;;  %4336 = vmatprep.subr.bf16.mxu1 %v4862_v18 }
0x11ce   :  { %3747 = vmatprep.mubr.bf16.mxu0 %v4861_v0  ;;  %4350 = vmatprep.mubr.msk.bf16.mxu1 %vm4879_vm12, %v4862_v18 }
0x11d0   :  { %3718 = vmatpush1.bf16.msra.mxu0 %v6408_v44  ;;  %4337 = vmatpush3.bf16.msra.mxu1 %v6411_v51 }
0x11d1   :  { %3719 = vmatprep.subr.bf16.mxu0 %v6414_v20  ;;  %4338 = vmatprep.subr.bf16.mxu1 %v4862_v18 }
0x11d4   :  { %3720 = vmatpush1.bf16.msra.mxu0 %v6418_v4  ;;  %4339 = vmatpush3.bf16.msra.mxu1 %v6478_v30 }
0x11d5   :  { %3721 = vmatprep.subr.bf16.mxu0 %v6422_v17  ;;  %4340 = vmatprep.subr.bf16.mxu1 %v4862_v18 }
0x11d8   :  { %3722 = vmatpush1.bf16.msra.mxu0 %v6483_v33  ;;  %4341 = vmatpush3.bf16.msra.mxu1 %v6486_v16 }
0x11d9   :  { %3723 = vmatprep.subr.bf16.mxu0 %v6489_v23  ;;  %4342 = vmatprep.subr.bf16.mxu1 %v4862_v18 }
0x11dc   :  { %3724 = vmatpush1.bf16.msra.mxu0 %v6493_v41  ;;  %4343 = vmatpush3.bf16.msra.mxu1 %v6496_v39 }
0x11dd   :  { %3725 = vmatprep.subr.bf16.mxu0 %v6499_v57  ;;  %4344 = vmatprep.subr.bf16.mxu1 %v4862_v18 }
0x11e0   :  { %3726 = vmatpush1.bf16.msra.mxu0 %v6503_v62  ;;  %4345 = vmatpush3.bf16.msra.mxu1 %v6506_v7 }
0x11e1   :  { %3727 = vmatprep.subr.bf16.mxu0 %v6509_v58  ;;  %4346 = vmatprep.subr.bf16.mxu1 %v4862_v18 }
0x11e4   :  { %3728 = vmatpush1.bf16.msra.mxu0 %v6513_v13  ;;  %4347 = vmatpush3.bf16.msra.mxu1 %v6516_v35 }
0x11e5   :  { %3729 = vmatprep.subr.bf16.mxu0 %v6519_v19  ;;  %4348 = vmatprep.subr.bf16.mxu1 %v4862_v18 }
0x11e8   :  { %3730 = vmatpush1.bf16.msra.mxu0 %v6523_v47  ;;  %4349 = vmatpush3.bf16.msra.mxu1 %v6526_v28 }
0x11e9   :  { %4354 = vmatprep.subr.bf16.mxu0 %v4862_v18 }
0x129e   :  { %v3593_v0 = vpop.f32.mrb[28].mxu0  ;;  %v3634_v37 = vpop.f32.mrb[40].mxu1 }
0x129f   :  { %v3641_v54 = vrot.slane %v3593_v0, 2  ;;  %v3642_v22 = vrot.slane %v3593_v0, 3  ;;  %v3595_v44 = vpop.f32.mrb[29].mxu0  ;;  %v4332_v51 = vpop.f32.mrb[41].mxu1  ;;  %v3678_v8 = vadd.f32 %v6538_v5, %v3634_v37 }
0x12a0   :  { %v3660_v20 = vrot.slane %v3595_v44, 2  ;;  %v3661_v4 = vrot.slane %v3595_v44, 3  ;;  %v3597_v17 = vpop.f32.mrb[30].mxu0  ;;  %v3637_v30 = vpop.f32.mrb[42].mxu1  ;;  %v4542_v44 = vld [vmem:[%s6673_s9 + $0x8] sm:$0xff]   ;;  %v4543_v51 = vld [vmem:[%s6673_s9 + $0x10] sm:$0xff]  }
0x12a1   :  { %v3645_v33 = vadd.f32 %v3641_v54, %v6199_v40  ;;  %v3646_v16 = vadd.f32 %v3642_v22, %v6201_v27  ;;  %v3598_v23 = vpop.f32.mrb[31].mxu0  ;;  %v4333_v41 = vpop.f32.mrb[43].mxu1  ;;  %v3680_v60 = vrot.slane %v3678_v8, 2  ;;  %v3681_v52 = vrot.slane %v3678_v8, 3  ;;  %v4541_v22 = vld [vmem:[%s6673_s9] sm:$0xff]   ;;  %v4546_v17 = vld [vmem:[%s6673_s9 + $0x28] sm:$0xff]  }
0x12a2   :  { %v3664_v39 = vadd.f32 %v3660_v20, %v6204_v49  ;;  %v3665_v57 = vadd.f32 %v3661_v4, %v6207_v34  ;;  %v4544_v20 = vld [vmem:[%s6673_s9 + $0x18] sm:$0xff]   ;;  %v4545_v4 = vld [vmem:[%s6673_s9 + $0x20] sm:$0xff]   ;;  %v4547_v30 = vld [vmem:[%s6673_s9 + $0x30] sm:$0xff]  }
0x12a3   :  { %v4060_v62 = vmul.f32 -1.442695, %v3645_v33  ;;  %v4061_v7 = vmul.f32 -1.442695, %v3646_v16  ;;  %v4548_v33 = vld [vmem:[%s6673_s9 + $0x38] sm:$0xff]  }
0x12a4   :  { %v4062_v58 = vmul.f32 -1.442695, %v3664_v39  ;;  %v4063_v13 = vmul.f32 -1.442695, %v3665_v57 }
0x12a5   :  { %4745 = vpow2.f32 %v4060_v62 }
0x12a6   :  { %4747 = vpow2.f32 %v4061_v7 }
0x12a7   :  { %4749 = vpow2.f32 %v4062_v58 }
0x12a8   :  { %4751 = vpow2.f32 %v4063_v13 }
0x12af   :  { %v4746_v35 = vpop.eup %4745 }
0x12b0   :  { %v4748_v19 = vpop.eup %4747  ;;  %v3653_v47 = vadd.f32 1.0, %v4746_v35 }
0x12b1   :  { %v4750_v28 = vpop.eup %4749  ;;  %v3654_v10 = vadd.f32 1.0, %v4748_v19 }
0x12b2   :  { %v4752_v31 = vpop.eup %4751  ;;  %4753 = vrcp.f32 %v3653_v47  ;;  %v3672_v29 = vadd.f32 1.0, %v4750_v28 }
0x12b3   :  { %4755 = vrcp.f32 %v3654_v10  ;;  %v3673_v1 = vadd.f32 1.0, %v4752_v31 }
0x12b4   :  { %4757 = vrcp.f32 %v3672_v29 }
0x12b5   :  { %4759 = vrcp.f32 %v3673_v1 }
0x12bc   :  { %v4754_v63 = vpop.eup %4753 }
0x12bd   :  { %v4756_v42 = vpop.eup %4755  ;;  %v3684_v21 = vmul.f32 %v4754_v63, %v3680_v60 }
0x12be   :  { %v4758_v9 = vpop.eup %4757  ;;  %v3685_v14 = vmul.f32 %v4756_v42, %v3681_v52 }
0x12bf   :  { %v4760_v3 = vpop.eup %4759  ;;  %v3686_v25 = vadd.f32 %v3684_v21, %v6221_v56  ;;  %v3700_v2 = vmul.f32 %v4758_v9, %v3696_v26  ;;  %v3690_v38 = vsub.f32 1.0, %v4758_v9 }
0x12c0   :  { %v3687_v36 = vadd.f32 %v3685_v14, %v6223_v46  ;;  %v3701_v11 = vmul.f32 %v4760_v3, %v3697_v48  ;;  %v3691_v59 = vsub.f32 1.0, %v4760_v3 }
0x12c1   :  { %4761 = vtanh.f32 %v3686_v25 }
0x12c2   :  { %4763 = vtanh.f32 %v3687_v36 }
0x12cb   :  { %v4762_v12 = vpop.eup %4761 }
0x12cc   :  { %v4764_v43 = vpop.eup %4763  ;;  %v3692_v50 = vmul.f32 %v4762_v12, %v3690_v38 }
0x12cd   :  { %v3693_v53 = vmul.f32 %v4764_v43, %v3691_v59 }
0x12ce   :  { %v6597_v24 = vadd.f32 %v3700_v2, %v3692_v50 }
0x12cf   :  { %v6599_v15 = vadd.f32 %v3701_v11, %v3693_v53 }
0x12d0   :  { %v3704_v6 = vpack.c.bf16 %v6597_v24, %v6597_v24  ;;  %v3852_v25 = vrot.slane %v6597_v24, 7 }
0x12d1   :  { %v3705_v61 = vpack.c.bf16 %v6599_v15, %v6599_v15  ;;  %v3853_v11 = vrot.slane %v6599_v15, 7 }
0x12d2   :  { %v3708_v45 = vunpack.c.l.b16 %v3704_v6 }
0x12d3   :  { %v3709_v55 = vunpack.c.l.b16 %v3705_v61 }
0x12d4   :  { %v3710_v32 = vrot.slane %v3708_v45, 6 }
0x12d5   :  { %v3711_v0 = vrot.slane %v3709_v55, 5 }
0x12d7   :  { %v3712_v37 = vsel %vm2779_vm3, %v3711_v0, %v3710_v32 }
0x12d8   :  { %v3713_v54 = vpack.c.b16 %v3712_v37, %v3712_v37 }
0x12da   :  { %3748 = vmatmul.mubr.bf16.vlgmr.msra.gmra.mrb[32].mxu0 %v3713_v54  ;;  %4351 = vmatmul.mubr.bf16.vlgmr.msra.gmra.mrb[44].mxu1 %v3713_v54 }
0x12db   :  { %4370 = vmatprep.mubr.msk.bf16.mxu0 %vm4879_vm12, %v4862_v18  ;;  %4355 = vmatpush3.bf16.msra.mxu0 %v4541_v22 }
0x12dc   :  { %4356 = vmatprep.subr.bf16.mxu0 %v4862_v18 }
0x12df   :  { %4357 = vmatpush3.bf16.msra.mxu0 %v4542_v44 }
0x12e0   :  { %4358 = vmatprep.subr.bf16.mxu0 %v4862_v18 }
0x12e3   :  { %4359 = vmatpush3.bf16.msra.mxu0 %v4543_v51 }
0x12e4   :  { %4360 = vmatprep.subr.bf16.mxu0 %v4862_v18 }
0x12e7   :  { %4361 = vmatpush3.bf16.msra.mxu0 %v4544_v20  ;;  %v4068_v20 = vld [vmem:[%s6674_s10] ss:$0 sm:$0xff] }
0x12e8   :  { %4362 = vmatprep.subr.bf16.mxu0 %v4862_v18 }
0x12eb   :  { %4363 = vmatpush3.bf16.msra.mxu0 %v4545_v4 }
0x12ec   :  { %4364 = vmatprep.subr.bf16.mxu0 %v4862_v18 }
0x12ef   :  { %4365 = vmatpush3.bf16.msra.mxu0 %v4546_v17 }
0x12f0   :  { %4366 = vmatprep.subr.bf16.mxu0 %v4862_v18 }
0x12f3   :  { %4367 = vmatpush3.bf16.msra.mxu0 %v4547_v30 }
0x12f4   :  { %4368 = vmatprep.subr.bf16.mxu0 %v4862_v18 }
0x12f7   :  { %4369 = vmatpush3.bf16.msra.mxu0 %v4548_v33 }
0x13ad   :  { %v3749_v16 = vpop.f32.mrb[32].mxu0  ;;  %v3790_v23 = vpop.f32.mrb[44].mxu1 }
0x13ae   :  { %v3797_v41 = vrot.slane %v3749_v16, 1  ;;  %v3798_v39 = vrot.slane %v3749_v16, 2  ;;  %v3751_v57 = vpop.f32.mrb[33].mxu0  ;;  %v4352_v62 = vpop.f32.mrb[45].mxu1 }
0x13af   :  { %v3816_v7 = vrot.slane %v3751_v57, 1  ;;  %v3817_v58 = vrot.slane %v3751_v57, 2  ;;  %v3753_v13 = vpop.f32.mrb[34].mxu0  ;;  %v3793_v35 = vpop.f32.mrb[46].mxu1 }
0x13b0   :  { %v3801_v19 = vadd.f32 %v3797_v41, %v6199_v40  ;;  %v3802_v47 = vadd.f32 %v3798_v39, %v6201_v27  ;;  %v3754_v28 = vpop.f32.mrb[35].mxu0  ;;  %v4353_v10 = vpop.f32.mrb[47].mxu1 }
0x13b1   :  { %v3820_v31 = vadd.f32 %v3816_v7, %v6204_v49  ;;  %v3821_v18 = vadd.f32 %v3817_v58, %v6207_v34  ;;  %v3834_v34 = vadd.f32 %v6538_v5, %v3790_v23 }
0x13b2   :  { %v4064_v29 = vmul.f32 -1.442695, %v3801_v19  ;;  %v4065_v1 = vmul.f32 -1.442695, %v3802_v47 }
0x13b3   :  { %v4066_v8 = vmul.f32 -1.442695, %v3820_v31  ;;  %v4067_v60 = vmul.f32 -1.442695, %v3821_v18  ;;  %v3836_v9 = vrot.slane %v3834_v34, 1  ;;  %v3837_v14 = vrot.slane %v3834_v34, 2 }
0x13b4   :  { %4765 = vpow2.f32 %v4064_v29 }
0x13b5   :  { %4767 = vpow2.f32 %v4065_v1 }
0x13b6   :  { %4769 = vpow2.f32 %v4066_v8 }
0x13b7   :  { %4771 = vpow2.f32 %v4067_v60 }
0x13be   :  { %v4766_v63 = vpop.eup %4765 }
0x13bf   :  { %v4768_v52 = vpop.eup %4767  ;;  %v3809_v42 = vadd.f32 1.0, %v4766_v63 }
0x13c0   :  { %v4770_v40 = vpop.eup %4769  ;;  %v3810_v26 = vadd.f32 1.0, %v4768_v52 }
0x13c1   :  { %v4772_v27 = vpop.eup %4771  ;;  %4773 = vrcp.f32 %v3809_v42  ;;  %v3828_v21 = vadd.f32 1.0, %v4770_v40 }
0x13c2   :  { %4775 = vrcp.f32 %v3810_v26  ;;  %v3829_v49 = vadd.f32 1.0, %v4772_v27 }
0x13c3   :  { %4777 = vrcp.f32 %v3828_v21 }
0x13c4   :  { %4779 = vrcp.f32 %v3829_v49 }
0x13cb   :  { %v4774_v48 = vpop.eup %4773 }
0x13cc   :  { %v4776_v3 = vpop.eup %4775  ;;  %v3840_v2 = vmul.f32 %v4774_v48, %v3836_v9 }
0x13cd   :  { %v4778_v36 = vpop.eup %4777  ;;  %v3841_v38 = vmul.f32 %v4776_v3, %v3837_v14 }
0x13ce   :  { %v4780_v12 = vpop.eup %4779  ;;  %v3842_v59 = vadd.f32 %v3840_v2, %v6221_v56  ;;  %v3856_v43 = vmul.f32 %v4778_v36, %v3852_v25  ;;  %v3846_v5 = vsub.f32 1.0, %v4778_v36 }
0x13cf   :  { %v3843_v50 = vadd.f32 %v3841_v38, %v6223_v46  ;;  %v3857_v53 = vmul.f32 %v4780_v12, %v3853_v11  ;;  %v3847_v61 = vsub.f32 1.0, %v4780_v12 }
0x13d0   :  { %4781 = vtanh.f32 %v3842_v59 }
0x13d1   :  { %4783 = vtanh.f32 %v3843_v50 }
0x13da   :  { %v4782_v6 = vpop.eup %4781 }
0x13db   :  { %v4784_v45 = vpop.eup %4783  ;;  %v3848_v55 = vmul.f32 %v4782_v6, %v3846_v5 }
0x13dc   :  { %v3849_v24 = vmul.f32 %v4784_v45, %v3847_v61 }
0x13dd   :  { %v3858_v32 = vadd.f32 %v3856_v43, %v3848_v55 }
0x13de   :  { %v3859_v0 = vadd.f32 %v3857_v53, %v3849_v24 }
0x13df   :  { %v3860_v37 = vpack.c.bf16 %v3858_v32, %v3858_v32 }
0x13e0   :  { %v3861_v15 = vpack.c.bf16 %v3859_v0, %v3859_v0 }
0x13e1   :  { %v3887_v54 = vunpack.c.l.b16 %v3860_v37 }
0x13e2   :  { %v3888_v22 = vunpack.c.l.b16 %v3861_v15 }
0x13e3   :  { %v3889_v44 = vrot.slane %v3887_v54, 7 }
0x13e4   :  { %v3890_v56 = vrot.slane %v3888_v22, 6 }
0x13e6   :  { %v3891_v51 = vsel %vm2779_vm3, %v3890_v56, %v3889_v44 }
0x13e7   :  { %v3892_v46 = vpack.c.b16 %v3891_v51, %v3891_v51 }
0x13e9   :  { %4371 = vmatmul.mubr.bf16.vlgmr.msra.gmra.mrb[36].mxu0 %v3892_v46 }
0x14bc   :  { %v3976_v4 = vpop.f32.mrb[36].mxu0 }
0x14bd   :  { %v3977_v17 = vadd.f32 %v4068_v20, %v3976_v4  ;;  %v4372_v30 = vpop.f32.mrb[37].mxu0 }
0x14be   :  { %v3979_v33 = vpop.f32.mrb[38].mxu0 }
0x14bf   :  { %v4373_v16 = vpop.f32.mrb[39].mxu0  ;;  %3983 = vst.msk [vmem:[#allocation5] sm:$0x3] %vm3982_vm4, %v3977_v17 }
0x14c0   :  { %4843 = shalt.err (!%p4840_p12)
}
0x14c1   :  { %s4844_s10 = scalar_lea.hbm %s6675_s11, 32 }
0x14c2   :  { %p4845_p13 = scmp.ne.s32.totalorder %s6675_s11, %s4844_s10  ;;  %p4848_p0 = scmp.lt.u32.totalorder %s4844_s10, %s6675_s11 }
0x14c4   :  { %p4850_p1 = pnand %p4848_p0, %p4845_p13 }
0x14c6   :  { %4853 = shalt.err (!%p4850_p1)
}
0x14c7   :  { %3993 = dma.vmem_to_hbm [thread:$0]  %s3991_s3, 32, %s6675_s11, [#allocation4]  }
0x14c8   :  { %4856 = dma.done.wait [#allocation4], 32  }
0x14c9   :  { %4857 = vsyncadd [#allocation4], 4294967264 }
0x14ca   :  { %3997 = vsyncpa [#allocation3], 1 }
0x14cb   :  { %3998 = vsyncpa [#allocation4], 1 }

</bundles_post_ra>
